<compile_context>
chip_gen: v7x
topology: tpu7x:2x2x1
jax: 0.10.0
libtpu: 0.0.40
codegen_flags: <defaults>
</compile_context>

<pallas_src>
import math
from functools import partial

import jax
import jax.numpy as jnp
from jax.experimental import pallas as pl
from jax.experimental.pallas import tpu as pltpu


# ---------------------------------------------------------------------------
# In-kernel helpers (traced inside the Pallas kernel body)
# ---------------------------------------------------------------------------

def _layernorm(x, gamma, beta, eps=1e-5):
    # x: (M, E) f32, gamma/beta: (1, E) f32
    mu = jnp.mean(x, axis=-1, keepdims=True)
    var = jnp.mean((x - mu) ** 2, axis=-1, keepdims=True)
    return (x - mu) * jax.lax.rsqrt(var + eps) * gamma + beta


def _softmax(x):
    m = jnp.max(x, axis=-1, keepdims=True)
    e = jnp.exp(x - m)
    denom = jnp.sum(e, axis=-1, keepdims=True)
    return e * pl.reciprocal(denom, approx=True)


def _attn_core(q, k, v, B, Sq, Sk, H, d):
    """Scores / softmax / PV per head; returns lane-concatenated context.

    q: (B*Sq, E) f32 (already pre-scaled by 1/sqrt(d) via Wq folding)
    k, v: (B*Sk, E) f32
    returns (B*Sq, E) f32 context, head h in lane block [h*d, (h+1)*d).
    """
    ctx_heads = []
    for h in range(H):  # static unroll; projections are NOT in this loop
        qh = q[:, h * d:(h + 1) * d].reshape(B, Sq, d).astype(jnp.bfloat16)
        kh = k[:, h * d:(h + 1) * d].reshape(B, Sk, d).astype(jnp.bfloat16)
        vh = v[:, h * d:(h + 1) * d].reshape(B, Sk, d).astype(jnp.bfloat16)

        s = jnp.einsum('bqd,bkd->bqk', qh, kh,
                       preferred_element_type=jnp.float32)       # (B, Sq, Sk)
        p = _softmax(s)                                          # f32
        c = jnp.einsum('bqk,bkd->bqd', p.astype(jnp.bfloat16), vh,
                       preferred_element_type=jnp.float32)       # (B, Sq, d)
        ctx_heads.append(c.reshape(B * Sq, d))
    return jnp.concatenate(ctx_heads, axis=-1)                   # (B*Sq, E)


# ---------------------------------------------------------------------------
# Fused Pallas kernel: the whole decoder stack (grid iterates over layers)
# ---------------------------------------------------------------------------

def fused_decoder_kernel(x_ref, enc_ref,
                         sa_wqkv_ref, sa_bqkv_ref, sa_wo_ref, sa_bo_ref,
                         ca_wq_ref, ca_bq_ref, ca_wkv_ref, ca_bkv_ref,
                         ca_wo_ref, ca_bo_ref,
                         ln_w_ref, ln_b_ref, w1_ref, b1_ref, w2_ref, b2_ref,
                         o_ref, *, num_heads, head_dim, B, S, Se, E):
    l = pl.program_id(0)

    # Layer 0: initialize the resident output block (cross-layer accumulator)
    # from the (already flattened) input activation.
    @pl.when(l == 0)
    def _():
        o_ref[...] = x_ref[...]

    H, d = num_heads, head_dim
    x = o_ref[...]                                 # (B*S, E) f32, resident
    enc = enc_ref[...]                             # (B*Se, E) f32

    ln_w = ln_w_ref[...]                           # (3, E) f32
    ln_b = ln_b_ref[...]

    # --- self attention (fused QKV) + residual + norm1 ---
    qkv = jnp.dot(x.astype(jnp.bfloat16), sa_wqkv_ref[...],
                  preferred_element_type=jnp.float32) + sa_bqkv_ref[...]
    q, k, v = qkv[:, :E], qkv[:, E:2 * E], qkv[:, 2 * E:]
    ctx = _attn_core(q, k, v, B, S, S, H, d)
    sa = jnp.dot(ctx.astype(jnp.bfloat16), sa_wo_ref[...],
                 preferred_element_type=jnp.float32) + sa_bo_ref[...]
    x = _layernorm(x + sa, ln_w[0:1, :], ln_b[0:1, :])

    # --- cross attention (fused KV) + residual + norm2 ---
    qc = jnp.dot(x.astype(jnp.bfloat16), ca_wq_ref[...],
                 preferred_element_type=jnp.float32) + ca_bq_ref[...]
    kvc = jnp.dot(enc.astype(jnp.bfloat16), ca_wkv_ref[...],
                  preferred_element_type=jnp.float32) + ca_bkv_ref[...]
    kc, vc = kvc[:, :E], kvc[:, E:]
    ctx = _attn_core(qc, kc, vc, B, S, Se, H, d)
    ca = jnp.dot(ctx.astype(jnp.bfloat16), ca_wo_ref[...],
                 preferred_element_type=jnp.float32) + ca_bo_ref[...]
    x = _layernorm(x + ca, ln_w[1:2, :], ln_b[1:2, :])

    # --- feed forward + residual + norm3 ---
    h1 = jnp.dot(x.astype(jnp.bfloat16), w1_ref[...],
                 preferred_element_type=jnp.float32) + b1_ref[...]
    h1 = jnp.maximum(h1, 0.0)
    ff = jnp.dot(h1.astype(jnp.bfloat16), w2_ref[...],
                 preferred_element_type=jnp.float32) + b2_ref[...]
    x = _layernorm(x + ff, ln_w[2:3, :], ln_b[2:3, :])

    o_ref[...] = x                                 # carry to next layer


def decoder_stack(x2d, enc2d, packed, num_heads, B, S, Se):
    """Run all decoder layers in a single fused pallas_call.

    x2d: (B*S, E) f32, enc2d: (B*Se, E) f32.  Returns (B*S, E) f32.
    """
    E = x2d.shape[-1]
    L, _, F = packed["w1"].shape
    H = num_heads
    d = E // H

    kernel = partial(fused_decoder_kernel, num_heads=H, head_dim=d,
                     B=B, S=S, Se=Se, E=E)

    weight_names = ("sa_wqkv", "sa_bqkv", "sa_wo", "sa_bo",
                    "ca_wq", "ca_bq", "ca_wkv", "ca_bkv", "ca_wo", "ca_bo",
                    "ln_w", "ln_b", "w1", "b1", "w2", "b2")
    weights = [packed[k] for k in weight_names]

    def wspec(arr):
        n_rest = arr.ndim - 1
        # leading (layer) dim squeezed out of the kernel view
        return pl.BlockSpec((None,) + arr.shape[1:],
                            lambda l, _n=n_rest: (l,) + (0,) * _n)

    def _nbytes(a):
        return math.prod(a.shape) * a.dtype.itemsize

    # Advisory cost estimate so XLA schedules around the fused custom call.
    sa_flops = 8 * B * S * E * E + 4 * B * S * S * E
    ca_flops = 4 * B * S * E * E + 4 * B * Se * E * E + 4 * B * S * Se * E
    ffn_flops = 4 * B * S * E * F
    flops = L * (sa_flops + ca_flops + ffn_flops)
    transcendentals = L * (B * H * S * (S + Se) + 8 * B * S)
    bytes_accessed = (_nbytes(x2d) + _nbytes(enc2d) + B * S * E * 4
                      + sum(_nbytes(w) for w in weights))
    cost = pl.CostEstimate(flops=int(flops),
                           transcendentals=int(transcendentals),
                           bytes_accessed=int(bytes_accessed))

    # Explicit VMEM budget from the per-step working set (double-buffered
    # per-layer weight blocks + resident activations) plus headroom.
    per_layer_w_bytes = sum(_nbytes(w) // L for w in weights)
    act_bytes = _nbytes(x2d) + _nbytes(enc2d) + B * S * E * 4
    working = 2 * per_layer_w_bytes + 2 * act_bytes
    vmem_limit = int(min(64 << 20, max(2 * working + (8 << 20), 32 << 20)))

    return pl.pallas_call(
        kernel,
        out_shape=jax.ShapeDtypeStruct((B * S, E), jnp.float32),
        grid=(L,),
        in_specs=[pl.BlockSpec((B * S, E), lambda l: (0, 0)),
                  pl.BlockSpec((B * Se, E), lambda l: (0, 0))]
                 + [wspec(a) for a in weights],
        # Constant index_map -> output block stays VMEM-resident across the
        # layer axis and acts as the cross-layer accumulator (no scratch).
        out_specs=pl.BlockSpec((B * S, E), lambda l: (0, 0)),
        compiler_params=pltpu.CompilerParams(
            dimension_semantics=("arbitrary",),
            vmem_limit_bytes=vmem_limit),
        cost_estimate=cost,
    )(x2d, enc2d, *weights)


# ---------------------------------------------------------------------------
# Parameter construction (matches the PyTorch module's layout) + packing
# ---------------------------------------------------------------------------

def init_params(key, vocab_size, embed_dim, num_heads, num_layers,
                dim_feedforward, max_len):
    keys = jax.random.split(key, 1 + num_layers)
    emb = jax.random.normal(keys[0], (vocab_size, embed_dim), jnp.float32) * 0.02

    # PositionalEncoding buffer (same formula as the PyTorch module)
    position = jnp.arange(max_len, dtype=jnp.float32)[:, None]
    div_term = jnp.exp(jnp.arange(0, embed_dim, 2, dtype=jnp.float32)
                       * (-math.log(10000.0) / embed_dim))
    pe = jnp.zeros((max_len, embed_dim), jnp.float32)
    pe = pe.at[:, 0::2].set(jnp.sin(position * div_term))
    pe = pe.at[:, 1::2].set(jnp.cos(position * div_term))

    E, F = embed_dim, dim_feedforward
    se, sf = 1.0 / math.sqrt(E), 1.0 / math.sqrt(F)
    layers = []
    for l in range(num_layers):
        k = jax.random.split(keys[1 + l], 8)
        layers.append(dict(
            # Linear weights stored (in_features, out_features): y = x @ W + b
            sa_w=jax.random.uniform(k[0], (4, E, E), jnp.float32, -se, se),
            sa_b=jax.random.uniform(k[1], (4, E), jnp.float32, -se, se),
            ca_w=jax.random.uniform(k[2], (4, E, E), jnp.float32, -se, se),
            ca_b=jax.random.uniform(k[3], (4, E), jnp.float32, -se, se),
            ln_w=jnp.ones((3, E), jnp.float32),
            ln_b=jnp.zeros((3, E), jnp.float32),
            w1=jax.random.uniform(k[4], (E, F), jnp.float32, -se, se),
            b1=jax.random.uniform(k[5], (1, F), jnp.float32, -se, se),
            w2=jax.random.uniform(k[6], (F, E), jnp.float32, -sf, sf),
            b2=jax.random.uniform(k[7], (1, E), jnp.float32, -sf, sf),
        ))
    return dict(embedding=emb, pe=pe, layers=layers)


def pack_params_for_kernel(params, num_heads):
    """Stack per-layer params (leading L dim), fuse Q/K/V weights into wide
    lane-dense matrices, fold the 1/sqrt(d) scale into Wq/bq, and cast the
    MXU weight operands to bf16.  All wrapper-side (zero in-kernel cost)."""
    E = params["layers"][0]["sa_w"].shape[-1]
    d = E // num_heads
    scale = 1.0 / math.sqrt(d)

    acc = {k: [] for k in ("sa_wqkv", "sa_bqkv", "sa_wo", "sa_bo",
                           "ca_wq", "ca_bq", "ca_wkv", "ca_bkv",
                           "ca_wo", "ca_bo",
                           "ln_w", "ln_b", "w1", "b1", "w2", "b2")}
    for layer in params["layers"]:
        sw, sb = layer["sa_w"], layer["sa_b"]      # (4,E,E)=[Wq,Wk,Wv,Wo]
        cw, cb = layer["ca_w"], layer["ca_b"]
        # Self-attention: one (E, 3E) QKV weight, Q part pre-scaled.
        acc["sa_wqkv"].append(jnp.concatenate(
            [sw[0] * scale, sw[1], sw[2]], axis=1))                 # (E, 3E)
        acc["sa_bqkv"].append(jnp.concatenate(
            [sb[0] * scale, sb[1], sb[2]]).reshape(1, 3 * E))       # (1, 3E)
        acc["sa_wo"].append(sw[3])                                  # (E, E)
        acc["sa_bo"].append(sb[3].reshape(1, E))
        # Cross-attention: Q from decoder x, fused KV from encoder output.
        acc["ca_wq"].append(cw[0] * scale)                          # (E, E)
        acc["ca_bq"].append((cb[0] * scale).reshape(1, E))
        acc["ca_wkv"].append(jnp.concatenate([cw[1], cw[2]], axis=1))  # (E,2E)
        acc["ca_bkv"].append(jnp.concatenate([cb[1], cb[2]]).reshape(1, 2 * E))
        acc["ca_wo"].append(cw[3])
        acc["ca_bo"].append(cb[3].reshape(1, E))
        acc["ln_w"].append(layer["ln_w"]); acc["ln_b"].append(layer["ln_b"])
        acc["w1"].append(layer["w1"]); acc["b1"].append(layer["b1"])
        acc["w2"].append(layer["w2"]); acc["b2"].append(layer["b2"])

    packed = {k: jnp.stack(v) for k, v in acc.items()}
    # MXU weight operands only; biases / LN params stay f32.
    # TODO(synk): per-generation weight dtype (int8 on v5e/v6e, fp8 on v7x).
    for k in ("sa_wqkv", "sa_wo", "ca_wq", "ca_wkv", "ca_wo", "w1", "w2"):
        packed[k] = packed[k].astype(jnp.bfloat16)
    return packed


def transformer_decoder(target_tokens, encoder_output, params, num_heads):
    # Glue (plain JAX): embedding gather + positional encoding add.
    # Dropout is identity (eval mode); no embedding scaling (matches reference).
    x = jnp.take(params["embedding"], target_tokens, axis=0)      # (B, S, E)
    B, S, E = x.shape
    Se = encoder_output.shape[1]
    x = x + params["pe"][None, :S, :]
    packed = pack_params_for_kernel(params, num_heads)
    # Pre-flatten I/O wrapper-side; reshape back outside the pallas_call.
    x2d = x.reshape(B * S, E)
    enc2d = encoder_output.reshape(B * Se, E)
    out2d = decoder_stack(x2d, enc2d, packed, num_heads, B, S, Se)
    return out2d.reshape(B, S, E)


if __name__ == "__main__":
    vocab_size = 50
    embed_dim = 32
    num_heads = 4
    num_layers = 2
    dim_feedforward = 64
    max_len = 64
    B, S, Se = 2, 8, 8

    key = jax.random.PRNGKey(0)
    pkey, tkey, ekey = jax.random.split(key, 3)

    params = init_params(pkey, vocab_size, embed_dim, num_heads,
                         num_layers, dim_feedforward, max_len)
    target_tokens = jax.random.randint(tkey, (B, S), 0, vocab_size)
    encoder_output = jax.random.normal(ekey, (B, Se, embed_dim), jnp.float32)

    out = transformer_decoder(target_tokens, encoder_output, params, num_heads)
    jax.block_until_ready(out)
    assert out.shape == (B, S, embed_dim) and out.dtype == jnp.float32
    assert bool(jnp.all(jnp.isfinite(out)))
    print("KERNEL_OK")
</pallas_src>

<mosaic_0001>
module attributes {stable_mosaic.version = 11 : i64} {
  func.func @fused_decoder_kernel(%arg0: i32, %arg1: memref<16x32xf32, #tpu.memory_space<vmem>>, %arg2: memref<16x32xf32, #tpu.memory_space<vmem>>, %arg3: memref<1x32x96xbf16, #tpu.memory_space<vmem>>, %arg4: memref<1x1x96xf32, #tpu.memory_space<vmem>>, %arg5: memref<1x32x32xbf16, #tpu.memory_space<vmem>>, %arg6: memref<1x1x32xf32, #tpu.memory_space<vmem>>, %arg7: memref<1x32x32xbf16, #tpu.memory_space<vmem>>, %arg8: memref<1x1x32xf32, #tpu.memory_space<vmem>>, %arg9: memref<1x32x64xbf16, #tpu.memory_space<vmem>>, %arg10: memref<1x1x64xf32, #tpu.memory_space<vmem>>, %arg11: memref<1x32x32xbf16, #tpu.memory_space<vmem>>, %arg12: memref<1x1x32xf32, #tpu.memory_space<vmem>>, %arg13: memref<1x3x32xf32, #tpu.memory_space<vmem>>, %arg14: memref<1x3x32xf32, #tpu.memory_space<vmem>>, %arg15: memref<1x32x64xbf16, #tpu.memory_space<vmem>>, %arg16: memref<1x1x64xf32, #tpu.memory_space<vmem>>, %arg17: memref<1x64x32xbf16, #tpu.memory_space<vmem>>, %arg18: memref<1x1x32xf32, #tpu.memory_space<vmem>>, %arg19: memref<16x32xf32, #tpu.memory_space<vmem>>) attributes {dimension_semantics = [#tpu.dimension_semantics<arbitrary>], iteration_bounds = array<i64: 2>, scalar_prefetch = 0 : i64, scratch_operands = 0 : i64, tpu.core_type = #tpu.core_type<tc>, window_params = [{pipeline_mode = #tpu.pipeline_mode<synchronous>, transform_indices = @transform_0, window_bounds = array<i64: 16, 32>}, {pipeline_mode = #tpu.pipeline_mode<synchronous>, transform_indices = @transform_1, window_bounds = array<i64: 16, 32>}, {transform_indices = @transform_2, window_bounds = array<i64: 1, 32, 96>}, {transform_indices = @transform_3, window_bounds = array<i64: 1, 1, 96>}, {transform_indices = @transform_4, window_bounds = array<i64: 1, 32, 32>}, {transform_indices = @transform_5, window_bounds = array<i64: 1, 1, 32>}, {transform_indices = @transform_6, window_bounds = array<i64: 1, 32, 32>}, {transform_indices = @transform_7, window_bounds = array<i64: 1, 1, 32>}, {transform_indices = @transform_8, window_bounds = array<i64: 1, 32, 64>}, {transform_indices = @transform_9, window_bounds = array<i64: 1, 1, 64>}, {transform_indices = @transform_10, window_bounds = array<i64: 1, 32, 32>}, {transform_indices = @transform_11, window_bounds = array<i64: 1, 1, 32>}, {transform_indices = @transform_12, window_bounds = array<i64: 1, 3, 32>}, {transform_indices = @transform_13, window_bounds = array<i64: 1, 3, 32>}, {transform_indices = @transform_14, window_bounds = array<i64: 1, 32, 64>}, {transform_indices = @transform_15, window_bounds = array<i64: 1, 1, 64>}, {transform_indices = @transform_16, window_bounds = array<i64: 1, 64, 32>}, {transform_indices = @transform_17, window_bounds = array<i64: 1, 1, 32>}, {pipeline_mode = #tpu.pipeline_mode<synchronous>, transform_indices = @transform_18, window_bounds = array<i64: 16, 32>}]} {
    %c0_i32 = arith.constant 0 : i32
    %0 = arith.cmpi eq, %arg0, %c0_i32 : i32
    %1 = arith.extui %0 : i1 to i32
    %c0_i32_0 = arith.constant 0 : i32
    %2 = arith.cmpi ne, %1, %c0_i32_0 : i32
    scf.if %2 {
      %c0_108 = arith.constant 0 : index
      %c0_109 = arith.constant 0 : index
      %334 = vector.load %arg1[%c0_108, %c0_109] : memref<16x32xf32, #tpu.memory_space<vmem>>, vector<16x32xf32>
      %c0_110 = arith.constant 0 : index
      %c0_111 = arith.constant 0 : index
      %335 = vector.load %arg19[%c0_110, %c0_111] : memref<16x32xf32, #tpu.memory_space<vmem>>, vector<16x32xf32>
      tpu.vector_store %arg19[%c0_110, %c0_111], %334 {strides = array<i32>} : memref<16x32xf32, #tpu.memory_space<vmem>>, vector<16x32xf32>,
    } else {
    }
    %c0 = arith.constant 0 : index
    %c0_1 = arith.constant 0 : index
    %3 = vector.load %arg19[%c0, %c0_1] : memref<16x32xf32, #tpu.memory_space<vmem>>, vector<16x32xf32>
    %c0_2 = arith.constant 0 : index
    %c0_3 = arith.constant 0 : index
    %4 = vector.load %arg2[%c0_2, %c0_3] : memref<16x32xf32, #tpu.memory_space<vmem>>, vector<16x32xf32>
    %c0_4 = arith.constant 0 : index
    %c0_5 = arith.constant 0 : index
    %c0_6 = arith.constant 0 : index
    %5 = vector.load %arg13[%c0_4, %c0_5, %c0_6] : memref<1x3x32xf32, #tpu.memory_space<vmem>>, vector<1x3x32xf32>
    %6 = vector.shape_cast %5 : vector<1x3x32xf32> to vector<3x32xf32>
    %c0_7 = arith.constant 0 : index
    %c0_8 = arith.constant 0 : index
    %c0_9 = arith.constant 0 : index
    %7 = vector.load %arg14[%c0_7, %c0_8, %c0_9] : memref<1x3x32xf32, #tpu.memory_space<vmem>>, vector<1x3x32xf32>
    %8 = vector.shape_cast %7 : vector<1x3x32xf32> to vector<3x32xf32>
    %9 = arith.truncf %3 : vector<16x32xf32> to vector<16x32xbf16>
    %c0_10 = arith.constant 0 : index
    %c0_11 = arith.constant 0 : index
    %c0_12 = arith.constant 0 : index
    %10 = vector.load %arg3[%c0_10, %c0_11, %c0_12] : memref<1x32x96xbf16, #tpu.memory_space<vmem>>, vector<1x32x96xbf16>
    %11 = vector.shape_cast %10 : vector<1x32x96xbf16> to vector<32x96xbf16>
    %cst = arith.constant dense<0.000000e+00> : vector<16x96xf32>
    %12 = tpu.matmul %9, %11, %cst {dimension_numbers = #tpu.dot_dimension_numbers<[1], [0], [0], [1], [0, 0, 1, 1], [], []>} : vector<16x32xbf16>, vector<32x96xbf16>, vector<16x96xf32> -> vector<16x96xf32>
    %c0_13 = arith.constant 0 : index
    %c0_14 = arith.constant 0 : index
    %c0_15 = arith.constant 0 : index
    %13 = vector.load %arg4[%c0_13, %c0_14, %c0_15] : memref<1x1x96xf32, #tpu.memory_space<vmem>>, vector<1x1x96xf32>
    %14 = vector.shape_cast %13 : vector<1x1x96xf32> to vector<1x96xf32>
    %15 = vector.broadcast %14 : vector<1x96xf32> to vector<16x96xf32>
    %16 = arith.addf %12, %15 : vector<16x96xf32>
    %17 = vector.extract_strided_slice %16 {offsets = [0, 0], sizes = [16, 32], strides = [1, 1]} : vector<16x96xf32> to vector<16x32xf32>
    %18 = vector.extract_strided_slice %16 {offsets = [0, 32], sizes = [16, 32], strides = [1, 1]} : vector<16x96xf32> to vector<16x32xf32>
    %19 = vector.extract_strided_slice %16 {offsets = [0, 64], sizes = [16, 32], strides = [1, 1]} : vector<16x96xf32> to vector<16x32xf32>
    %20 = vector.extract_strided_slice %17 {offsets = [0, 0], sizes = [16, 8], strides = [1, 1]} : vector<16x32xf32> to vector<16x8xf32>
    %21 = vector.shape_cast %20 : vector<16x8xf32> to vector<2x8x8xf32>
    %22 = arith.truncf %21 : vector<2x8x8xf32> to vector<2x8x8xbf16>
    %23 = vector.extract_strided_slice %18 {offsets = [0, 0], sizes = [16, 8], strides = [1, 1]} : vector<16x32xf32> to vector<16x8xf32>
    %24 = vector.shape_cast %23 : vector<16x8xf32> to vector<2x8x8xf32>
    %25 = arith.truncf %24 : vector<2x8x8xf32> to vector<2x8x8xbf16>
    %26 = vector.extract_strided_slice %19 {offsets = [0, 0], sizes = [16, 8], strides = [1, 1]} : vector<16x32xf32> to vector<16x8xf32>
    %27 = vector.shape_cast %26 : vector<16x8xf32> to vector<2x8x8xf32>
    %28 = arith.truncf %27 : vector<2x8x8xf32> to vector<2x8x8xbf16>
    "tpu.trace_start"() <{level = 10 : i32, message = "bqd,bkd->bqk"}> : () -> ()
    %cst_16 = arith.constant dense<0.000000e+00> : vector<2x8x8xf32>
    %29 = tpu.matmul %22, %25, %cst_16 {dimension_numbers = #tpu.dot_dimension_numbers<[2], [2], [1], [1], [0, 0, 0, 1, 1, 1], [0], [0]>} : vector<2x8x8xbf16>, vector<2x8x8xbf16>, vector<2x8x8xf32> -> vector<2x8x8xf32>
    "tpu.trace_stop"() : () -> ()
    %cst_17 = arith.constant dense<0xFF800000> : vector<2x8xf32>
    %30 = vector.multi_reduction <maximumf>, %29, %cst_17 [2] : vector<2x8x8xf32> to vector<2x8xf32>
    %31 = vector.shape_cast %30 : vector<2x8xf32> to vector<2x8x1xf32>
    %32 = vector.broadcast %31 : vector<2x8x1xf32> to vector<2x8x8xf32>
    %33 = arith.subf %29, %32 : vector<2x8x8xf32>
    %34 = math.exp %33 : vector<2x8x8xf32>
    %cst_18 = arith.constant dense<0.000000e+00> : vector<2x8xf32>
    %35 = vector.multi_reduction <add>, %34, %cst_18 [2] : vector<2x8x8xf32> to vector<2x8xf32>
    %36 = vector.shape_cast %35 : vector<2x8xf32> to vector<2x8x1xf32>
    %37 = tpu.reciprocal %36 {approx = true} : vector<2x8x1xf32> -> vector<2x8x1xf32>
    %38 = vector.broadcast %37 : vector<2x8x1xf32> to vector<2x8x8xf32>
    %39 = arith.mulf %34, %38 : vector<2x8x8xf32>
    %40 = arith.truncf %39 : vector<2x8x8xf32> to vector<2x8x8xbf16>
    "tpu.trace_start"() <{level = 10 : i32, message = "bqk,bkd->bqd"}> : () -> ()
    %cst_19 = arith.constant dense<0.000000e+00> : vector<2x8x8xf32>
    %41 = tpu.matmul %40, %28, %cst_19 {dimension_numbers = #tpu.dot_dimension_numbers<[2], [1], [1], [2], [0, 0, 0, 1, 1, 2], [0], [0]>} : vector<2x8x8xbf16>, vector<2x8x8xbf16>, vector<2x8x8xf32> -> vector<2x8x8xf32>
    "tpu.trace_stop"() : () -> ()
    %42 = vector.shape_cast %41 : vector<2x8x8xf32> to vector<16x8xf32>
    %43 = vector.extract_strided_slice %17 {offsets = [0, 8], sizes = [16, 8], strides = [1, 1]} : vector<16x32xf32> to vector<16x8xf32>
    %44 = vector.shape_cast %43 : vector<16x8xf32> to vector<2x8x8xf32>
    %45 = arith.truncf %44 : vector<2x8x8xf32> to vector<2x8x8xbf16>
    %46 = vector.extract_strided_slice %18 {offsets = [0, 8], sizes = [16, 8], strides = [1, 1]} : vector<16x32xf32> to vector<16x8xf32>
    %47 = vector.shape_cast %46 : vector<16x8xf32> to vector<2x8x8xf32>
    %48 = arith.truncf %47 : vector<2x8x8xf32> to vector<2x8x8xbf16>
    %49 = vector.extract_strided_slice %19 {offsets = [0, 8], sizes = [16, 8], strides = [1, 1]} : vector<16x32xf32> to vector<16x8xf32>
    %50 = vector.shape_cast %49 : vector<16x8xf32> to vector<2x8x8xf32>
    %51 = arith.truncf %50 : vector<2x8x8xf32> to vector<2x8x8xbf16>
    "tpu.trace_start"() <{level = 10 : i32, message = "bqd,bkd->bqk"}> : () -> ()
    %cst_20 = arith.constant dense<0.000000e+00> : vector<2x8x8xf32>
    %52 = tpu.matmul %45, %48, %cst_20 {dimension_numbers = #tpu.dot_dimension_numbers<[2], [2], [1], [1], [0, 0, 0, 1, 1, 1], [0], [0]>} : vector<2x8x8xbf16>, vector<2x8x8xbf16>, vector<2x8x8xf32> -> vector<2x8x8xf32>
    "tpu.trace_stop"() : () -> ()
    %cst_21 = arith.constant dense<0xFF800000> : vector<2x8xf32>
    %53 = vector.multi_reduction <maximumf>, %52, %cst_21 [2] : vector<2x8x8xf32> to vector<2x8xf32>
    %54 = vector.shape_cast %53 : vector<2x8xf32> to vector<2x8x1xf32>
    %55 = vector.broadcast %54 : vector<2x8x1xf32> to vector<2x8x8xf32>
    %56 = arith.subf %52, %55 : vector<2x8x8xf32>
    %57 = math.exp %56 : vector<2x8x8xf32>
    %cst_22 = arith.constant dense<0.000000e+00> : vector<2x8xf32>
    %58 = vector.multi_reduction <add>, %57, %cst_22 [2] : vector<2x8x8xf32> to vector<2x8xf32>
    %59 = vector.shape_cast %58 : vector<2x8xf32> to vector<2x8x1xf32>
    %60 = tpu.reciprocal %59 {approx = true} : vector<2x8x1xf32> -> vector<2x8x1xf32>
    %61 = vector.broadcast %60 : vector<2x8x1xf32> to vector<2x8x8xf32>
    %62 = arith.mulf %57, %61 : vector<2x8x8xf32>
    %63 = arith.truncf %62 : vector<2x8x8xf32> to vector<2x8x8xbf16>
    "tpu.trace_start"() <{level = 10 : i32, message = "bqk,bkd->bqd"}> : () -> ()
    %cst_23 = arith.constant dense<0.000000e+00> : vector<2x8x8xf32>
    %64 = tpu.matmul %63, %51, %cst_23 {dimension_numbers = #tpu.dot_dimension_numbers<[2], [1], [1], [2], [0, 0, 0, 1, 1, 2], [0], [0]>} : vector<2x8x8xbf16>, vector<2x8x8xbf16>, vector<2x8x8xf32> -> vector<2x8x8xf32>
    "tpu.trace_stop"() : () -> ()
    %65 = vector.shape_cast %64 : vector<2x8x8xf32> to vector<16x8xf32>
    %66 = vector.extract_strided_slice %17 {offsets = [0, 16], sizes = [16, 8], strides = [1, 1]} : vector<16x32xf32> to vector<16x8xf32>
    %67 = vector.shape_cast %66 : vector<16x8xf32> to vector<2x8x8xf32>
    %68 = arith.truncf %67 : vector<2x8x8xf32> to vector<2x8x8xbf16>
    %69 = vector.extract_strided_slice %18 {offsets = [0, 16], sizes = [16, 8], strides = [1, 1]} : vector<16x32xf32> to vector<16x8xf32>
    %70 = vector.shape_cast %69 : vector<16x8xf32> to vector<2x8x8xf32>
    %71 = arith.truncf %70 : vector<2x8x8xf32> to vector<2x8x8xbf16>
    %72 = vector.extract_strided_slice %19 {offsets = [0, 16], sizes = [16, 8], strides = [1, 1]} : vector<16x32xf32> to vector<16x8xf32>
    %73 = vector.shape_cast %72 : vector<16x8xf32> to vector<2x8x8xf32>
    %74 = arith.truncf %73 : vector<2x8x8xf32> to vector<2x8x8xbf16>
    "tpu.trace_start"() <{level = 10 : i32, message = "bqd,bkd->bqk"}> : () -> ()
    %cst_24 = arith.constant dense<0.000000e+00> : vector<2x8x8xf32>
    %75 = tpu.matmul %68, %71, %cst_24 {dimension_numbers = #tpu.dot_dimension_numbers<[2], [2], [1], [1], [0, 0, 0, 1, 1, 1], [0], [0]>} : vector<2x8x8xbf16>, vector<2x8x8xbf16>, vector<2x8x8xf32> -> vector<2x8x8xf32>
    "tpu.trace_stop"() : () -> ()
    %cst_25 = arith.constant dense<0xFF800000> : vector<2x8xf32>
    %76 = vector.multi_reduction <maximumf>, %75, %cst_25 [2] : vector<2x8x8xf32> to vector<2x8xf32>
    %77 = vector.shape_cast %76 : vector<2x8xf32> to vector<2x8x1xf32>
    %78 = vector.broadcast %77 : vector<2x8x1xf32> to vector<2x8x8xf32>
    %79 = arith.subf %75, %78 : vector<2x8x8xf32>
    %80 = math.exp %79 : vector<2x8x8xf32>
    %cst_26 = arith.constant dense<0.000000e+00> : vector<2x8xf32>
    %81 = vector.multi_reduction <add>, %80, %cst_26 [2] : vector<2x8x8xf32> to vector<2x8xf32>
    %82 = vector.shape_cast %81 : vector<2x8xf32> to vector<2x8x1xf32>
    %83 = tpu.reciprocal %82 {approx = true} : vector<2x8x1xf32> -> vector<2x8x1xf32>
    %84 = vector.broadcast %83 : vector<2x8x1xf32> to vector<2x8x8xf32>
    %85 = arith.mulf %80, %84 : vector<2x8x8xf32>
    %86 = arith.truncf %85 : vector<2x8x8xf32> to vector<2x8x8xbf16>
    "tpu.trace_start"() <{level = 10 : i32, message = "bqk,bkd->bqd"}> : () -> ()
    %cst_27 = arith.constant dense<0.000000e+00> : vector<2x8x8xf32>
    %87 = tpu.matmul %86, %74, %cst_27 {dimension_numbers = #tpu.dot_dimension_numbers<[2], [1], [1], [2], [0, 0, 0, 1, 1, 2], [0], [0]>} : vector<2x8x8xbf16>, vector<2x8x8xbf16>, vector<2x8x8xf32> -> vector<2x8x8xf32>
    "tpu.trace_stop"() : () -> ()
    %88 = vector.shape_cast %87 : vector<2x8x8xf32> to vector<16x8xf32>
    %89 = vector.extract_strided_slice %17 {offsets = [0, 24], sizes = [16, 8], strides = [1, 1]} : vector<16x32xf32> to vector<16x8xf32>
    %90 = vector.shape_cast %89 : vector<16x8xf32> to vector<2x8x8xf32>
    %91 = arith.truncf %90 : vector<2x8x8xf32> to vector<2x8x8xbf16>
    %92 = vector.extract_strided_slice %18 {offsets = [0, 24], sizes = [16, 8], strides = [1, 1]} : vector<16x32xf32> to vector<16x8xf32>
    %93 = vector.shape_cast %92 : vector<16x8xf32> to vector<2x8x8xf32>
    %94 = arith.truncf %93 : vector<2x8x8xf32> to vector<2x8x8xbf16>
    %95 = vector.extract_strided_slice %19 {offsets = [0, 24], sizes = [16, 8], strides = [1, 1]} : vector<16x32xf32> to vector<16x8xf32>
    %96 = vector.shape_cast %95 : vector<16x8xf32> to vector<2x8x8xf32>
    %97 = arith.truncf %96 : vector<2x8x8xf32> to vector<2x8x8xbf16>
    "tpu.trace_start"() <{level = 10 : i32, message = "bqd,bkd->bqk"}> : () -> ()
    %cst_28 = arith.constant dense<0.000000e+00> : vector<2x8x8xf32>
    %98 = tpu.matmul %91, %94, %cst_28 {dimension_numbers = #tpu.dot_dimension_numbers<[2], [2], [1], [1], [0, 0, 0, 1, 1, 1], [0], [0]>} : vector<2x8x8xbf16>, vector<2x8x8xbf16>, vector<2x8x8xf32> -> vector<2x8x8xf32>
    "tpu.trace_stop"() : () -> ()
    %cst_29 = arith.constant dense<0xFF800000> : vector<2x8xf32>
    %99 = vector.multi_reduction <maximumf>, %98, %cst_29 [2] : vector<2x8x8xf32> to vector<2x8xf32>
    %100 = vector.shape_cast %99 : vector<2x8xf32> to vector<2x8x1xf32>
    %101 = vector.broadcast %100 : vector<2x8x1xf32> to vector<2x8x8xf32>
    %102 = arith.subf %98, %101 : vector<2x8x8xf32>
    %103 = math.exp %102 : vector<2x8x8xf32>
    %cst_30 = arith.constant dense<0.000000e+00> : vector<2x8xf32>
    %104 = vector.multi_reduction <add>, %103, %cst_30 [2] : vector<2x8x8xf32> to vector<2x8xf32>
    %105 = vector.shape_cast %104 : vector<2x8xf32> to vector<2x8x1xf32>
    %106 = tpu.reciprocal %105 {approx = true} : vector<2x8x1xf32> -> vector<2x8x1xf32>
    %107 = vector.broadcast %106 : vector<2x8x1xf32> to vector<2x8x8xf32>
    %108 = arith.mulf %103, %107 : vector<2x8x8xf32>
    %109 = arith.truncf %108 : vector<2x8x8xf32> to vector<2x8x8xbf16>
    "tpu.trace_start"() <{level = 10 : i32, message = "bqk,bkd->bqd"}> : () -> ()
    %cst_31 = arith.constant dense<0.000000e+00> : vector<2x8x8xf32>
    %110 = tpu.matmul %109, %97, %cst_31 {dimension_numbers = #tpu.dot_dimension_numbers<[2], [1], [1], [2], [0, 0, 0, 1, 1, 2], [0], [0]>} : vector<2x8x8xbf16>, vector<2x8x8xbf16>, vector<2x8x8xf32> -> vector<2x8x8xf32>
    "tpu.trace_stop"() : () -> ()
    %111 = vector.shape_cast %110 : vector<2x8x8xf32> to vector<16x8xf32>
    %112 = tpu.concatenate %42, %65, %88, %111 in 1 : vector<16x8xf32>, vector<16x8xf32>, vector<16x8xf32>, vector<16x8xf32> -> vector<16x32xf32>
    %113 = arith.truncf %112 : vector<16x32xf32> to vector<16x32xbf16>
    %c0_32 = arith.constant 0 : index
    %c0_33 = arith.constant 0 : index
    %c0_34 = arith.constant 0 : index
    %114 = vector.load %arg5[%c0_32, %c0_33, %c0_34] : memref<1x32x32xbf16, #tpu.memory_space<vmem>>, vector<1x32x32xbf16>
    %115 = vector.shape_cast %114 : vector<1x32x32xbf16> to vector<32x32xbf16>
    %cst_35 = arith.constant dense<0.000000e+00> : vector<16x32xf32>
    %116 = tpu.matmul %113, %115, %cst_35 {dimension_numbers = #tpu.dot_dimension_numbers<[1], [0], [0], [1], [0, 0, 1, 1], [], []>} : vector<16x32xbf16>, vector<32x32xbf16>, vector<16x32xf32> -> vector<16x32xf32>
    %c0_36 = arith.constant 0 : index
    %c0_37 = arith.constant 0 : index
    %c0_38 = arith.constant 0 : index
    %117 = vector.load %arg6[%c0_36, %c0_37, %c0_38] : memref<1x1x32xf32, #tpu.memory_space<vmem>>, vector<1x1x32xf32>
    %118 = vector.shape_cast %117 : vector<1x1x32xf32> to vector<1x32xf32>
    %119 = vector.broadcast %118 : vector<1x32xf32> to vector<16x32xf32>
    %120 = arith.addf %116, %119 : vector<16x32xf32>
    %121 = arith.addf %3, %120 : vector<16x32xf32>
    %122 = vector.extract_strided_slice %6 {offsets = [0, 0], sizes = [1, 32], strides = [1, 1]} : vector<3x32xf32> to vector<1x32xf32>
    %123 = vector.extract_strided_slice %8 {offsets = [0, 0], sizes = [1, 32], strides = [1, 1]} : vector<3x32xf32> to vector<1x32xf32>
    %cst_39 = arith.constant dense<0.000000e+00> : vector<16xf32>
    %124 = vector.multi_reduction <add>, %121, %cst_39 [1] : vector<16x32xf32> to vector<16xf32>
    %125 = vector.shape_cast %124 : vector<16xf32> to vector<16x1xf32>
    %cst_40 = arith.constant 3.200000e+01 : f32
    %126 = vector.broadcast %cst_40 : f32 to vector<16x1xf32>
    %127 = arith.divf %125, %126 : vector<16x1xf32>
    %128 = vector.broadcast %127 : vector<16x1xf32> to vector<16x32xf32>
    %129 = arith.subf %121, %128 : vector<16x32xf32>
    %130 = arith.mulf %129, %129 : vector<16x32xf32>
    %cst_41 = arith.constant dense<0.000000e+00> : vector<16xf32>
    %131 = vector.multi_reduction <add>, %130, %cst_41 [1] : vector<16x32xf32> to vector<16xf32>
    %132 = vector.shape_cast %131 : vector<16xf32> to vector<16x1xf32>
    %cst_42 = arith.constant 3.200000e+01 : f32
    %133 = vector.broadcast %cst_42 : f32 to vector<16x1xf32>
    %134 = arith.divf %132, %133 : vector<16x1xf32>
    %135 = vector.broadcast %127 : vector<16x1xf32> to vector<16x32xf32>
    %136 = arith.subf %121, %135 : vector<16x32xf32>
    %cst_43 = arith.constant 9.99999974E-6 : f32
    %137 = vector.broadcast %cst_43 : f32 to vector<16x1xf32>
    %138 = arith.addf %134, %137 : vector<16x1xf32>
    %139 = math.rsqrt %138 : vector<16x1xf32>
    %140 = vector.broadcast %139 : vector<16x1xf32> to vector<16x32xf32>
    %141 = arith.mulf %136, %140 : vector<16x32xf32>
    %142 = vector.broadcast %122 : vector<1x32xf32> to vector<16x32xf32>
    %143 = arith.mulf %141, %142 : vector<16x32xf32>
    %144 = vector.broadcast %123 : vector<1x32xf32> to vector<16x32xf32>
    %145 = arith.addf %143, %144 : vector<16x32xf32>
    %146 = arith.truncf %145 : vector<16x32xf32> to vector<16x32xbf16>
    %c0_44 = arith.constant 0 : index
    %c0_45 = arith.constant 0 : index
    %c0_46 = arith.constant 0 : index
    %147 = vector.load %arg7[%c0_44, %c0_45, %c0_46] : memref<1x32x32xbf16, #tpu.memory_space<vmem>>, vector<1x32x32xbf16>
    %148 = vector.shape_cast %147 : vector<1x32x32xbf16> to vector<32x32xbf16>
    %cst_47 = arith.constant dense<0.000000e+00> : vector<16x32xf32>
    %149 = tpu.matmul %146, %148, %cst_47 {dimension_numbers = #tpu.dot_dimension_numbers<[1], [0], [0], [1], [0, 0, 1, 1], [], []>} : vector<16x32xbf16>, vector<32x32xbf16>, vector<16x32xf32> -> vector<16x32xf32>
    %c0_48 = arith.constant 0 : index
    %c0_49 = arith.constant 0 : index
    %c0_50 = arith.constant 0 : index
    %150 = vector.load %arg8[%c0_48, %c0_49, %c0_50] : memref<1x1x32xf32, #tpu.memory_space<vmem>>, vector<1x1x32xf32>
    %151 = vector.shape_cast %150 : vector<1x1x32xf32> to vector<1x32xf32>
    %152 = vector.broadcast %151 : vector<1x32xf32> to vector<16x32xf32>
    %153 = arith.addf %149, %152 : vector<16x32xf32>
    %154 = arith.truncf %4 : vector<16x32xf32> to vector<16x32xbf16>
    %c0_51 = arith.constant 0 : index
    %c0_52 = arith.constant 0 : index
    %c0_53 = arith.constant 0 : index
    %155 = vector.load %arg9[%c0_51, %c0_52, %c0_53] : memref<1x32x64xbf16, #tpu.memory_space<vmem>>, vector<1x32x64xbf16>
    %156 = vector.shape_cast %155 : vector<1x32x64xbf16> to vector<32x64xbf16>
    %cst_54 = arith.constant dense<0.000000e+00> : vector<16x64xf32>
    %157 = tpu.matmul %154, %156, %cst_54 {dimension_numbers = #tpu.dot_dimension_numbers<[1], [0], [0], [1], [0, 0, 1, 1], [], []>} : vector<16x32xbf16>, vector<32x64xbf16>, vector<16x64xf32> -> vector<16x64xf32>
    %c0_55 = arith.constant 0 : index
    %c0_56 = arith.constant 0 : index
    %c0_57 = arith.constant 0 : index
    %158 = vector.load %arg10[%c0_55, %c0_56, %c0_57] : memref<1x1x64xf32, #tpu.memory_space<vmem>>, vector<1x1x64xf32>
    %159 = vector.shape_cast %158 : vector<1x1x64xf32> to vector<1x64xf32>
    %160 = vector.broadcast %159 : vector<1x64xf32> to vector<16x64xf32>
    %161 = arith.addf %157, %160 : vector<16x64xf32>
    %162 = vector.extract_strided_slice %161 {offsets = [0, 0], sizes = [16, 32], strides = [1, 1]} : vector<16x64xf32> to vector<16x32xf32>
    %163 = vector.extract_strided_slice %161 {offsets = [0, 32], sizes = [16, 32], strides = [1, 1]} : vector<16x64xf32> to vector<16x32xf32>
    %164 = vector.extract_strided_slice %153 {offsets = [0, 0], sizes = [16, 8], strides = [1, 1]} : vector<16x32xf32> to vector<16x8xf32>
    %165 = vector.shape_cast %164 : vector<16x8xf32> to vector<2x8x8xf32>
    %166 = arith.truncf %165 : vector<2x8x8xf32> to vector<2x8x8xbf16>
    %167 = vector.extract_strided_slice %162 {offsets = [0, 0], sizes = [16, 8], strides = [1, 1]} : vector<16x32xf32> to vector<16x8xf32>
    %168 = vector.shape_cast %167 : vector<16x8xf32> to vector<2x8x8xf32>
    %169 = arith.truncf %168 : vector<2x8x8xf32> to vector<2x8x8xbf16>
    %170 = vector.extract_strided_slice %163 {offsets = [0, 0], sizes = [16, 8], strides = [1, 1]} : vector<16x32xf32> to vector<16x8xf32>
    %171 = vector.shape_cast %170 : vector<16x8xf32> to vector<2x8x8xf32>
    %172 = arith.truncf %171 : vector<2x8x8xf32> to vector<2x8x8xbf16>
    "tpu.trace_start"() <{level = 10 : i32, message = "bqd,bkd->bqk"}> : () -> ()
    %cst_58 = arith.constant dense<0.000000e+00> : vector<2x8x8xf32>
    %173 = tpu.matmul %166, %169, %cst_58 {dimension_numbers = #tpu.dot_dimension_numbers<[2], [2], [1], [1], [0, 0, 0, 1, 1, 1], [0], [0]>} : vector<2x8x8xbf16>, vector<2x8x8xbf16>, vector<2x8x8xf32> -> vector<2x8x8xf32>
    "tpu.trace_stop"() : () -> ()
    %cst_59 = arith.constant dense<0xFF800000> : vector<2x8xf32>
    %174 = vector.multi_reduction <maximumf>, %173, %cst_59 [2] : vector<2x8x8xf32> to vector<2x8xf32>
    %175 = vector.shape_cast %174 : vector<2x8xf32> to vector<2x8x1xf32>
    %176 = vector.broadcast %175 : vector<2x8x1xf32> to vector<2x8x8xf32>
    %177 = arith.subf %173, %176 : vector<2x8x8xf32>
    %178 = math.exp %177 : vector<2x8x8xf32>
    %cst_60 = arith.constant dense<0.000000e+00> : vector<2x8xf32>
    %179 = vector.multi_reduction <add>, %178, %cst_60 [2] : vector<2x8x8xf32> to vector<2x8xf32>
    %180 = vector.shape_cast %179 : vector<2x8xf32> to vector<2x8x1xf32>
    %181 = tpu.reciprocal %180 {approx = true} : vector<2x8x1xf32> -> vector<2x8x1xf32>
    %182 = vector.broadcast %181 : vector<2x8x1xf32> to vector<2x8x8xf32>
    %183 = arith.mulf %178, %182 : vector<2x8x8xf32>
    %184 = arith.truncf %183 : vector<2x8x8xf32> to vector<2x8x8xbf16>
    "tpu.trace_start"() <{level = 10 : i32, message = "bqk,bkd->bqd"}> : () -> ()
    %cst_61 = arith.constant dense<0.000000e+00> : vector<2x8x8xf32>
    %185 = tpu.matmul %184, %172, %cst_61 {dimension_numbers = #tpu.dot_dimension_numbers<[2], [1], [1], [2], [0, 0, 0, 1, 1, 2], [0], [0]>} : vector<2x8x8xbf16>, vector<2x8x8xbf16>, vector<2x8x8xf32> -> vector<2x8x8xf32>
    "tpu.trace_stop"() : () -> ()
    %186 = vector.shape_cast %185 : vector<2x8x8xf32> to vector<16x8xf32>
    %187 = vector.extract_strided_slice %153 {offsets = [0, 8], sizes = [16, 8], strides = [1, 1]} : vector<16x32xf32> to vector<16x8xf32>
    %188 = vector.shape_cast %187 : vector<16x8xf32> to vector<2x8x8xf32>
    %189 = arith.truncf %188 : vector<2x8x8xf32> to vector<2x8x8xbf16>
    %190 = vector.extract_strided_slice %162 {offsets = [0, 8], sizes = [16, 8], strides = [1, 1]} : vector<16x32xf32> to vector<16x8xf32>
    %191 = vector.shape_cast %190 : vector<16x8xf32> to vector<2x8x8xf32>
    %192 = arith.truncf %191 : vector<2x8x8xf32> to vector<2x8x8xbf16>
    %193 = vector.extract_strided_slice %163 {offsets = [0, 8], sizes = [16, 8], strides = [1, 1]} : vector<16x32xf32> to vector<16x8xf32>
    %194 = vector.shape_cast %193 : vector<16x8xf32> to vector<2x8x8xf32>
    %195 = arith.truncf %194 : vector<2x8x8xf32> to vector<2x8x8xbf16>
    "tpu.trace_start"() <{level = 10 : i32, message = "bqd,bkd->bqk"}> : () -> ()
    %cst_62 = arith.constant dense<0.000000e+00> : vector<2x8x8xf32>
    %196 = tpu.matmul %189, %192, %cst_62 {dimension_numbers = #tpu.dot_dimension_numbers<[2], [2], [1], [1], [0, 0, 0, 1, 1, 1], [0], [0]>} : vector<2x8x8xbf16>, vector<2x8x8xbf16>, vector<2x8x8xf32> -> vector<2x8x8xf32>
    "tpu.trace_stop"() : () -> ()
    %cst_63 = arith.constant dense<0xFF800000> : vector<2x8xf32>
    %197 = vector.multi_reduction <maximumf>, %196, %cst_63 [2] : vector<2x8x8xf32> to vector<2x8xf32>
    %198 = vector.shape_cast %197 : vector<2x8xf32> to vector<2x8x1xf32>
    %199 = vector.broadcast %198 : vector<2x8x1xf32> to vector<2x8x8xf32>
    %200 = arith.subf %196, %199 : vector<2x8x8xf32>
    %201 = math.exp %200 : vector<2x8x8xf32>
    %cst_64 = arith.constant dense<0.000000e+00> : vector<2x8xf32>
    %202 = vector.multi_reduction <add>, %201, %cst_64 [2] : vector<2x8x8xf32> to vector<2x8xf32>
    %203 = vector.shape_cast %202 : vector<2x8xf32> to vector<2x8x1xf32>
    %204 = tpu.reciprocal %203 {approx = true} : vector<2x8x1xf32> -> vector<2x8x1xf32>
    %205 = vector.broadcast %204 : vector<2x8x1xf32> to vector<2x8x8xf32>
    %206 = arith.mulf %201, %205 : vector<2x8x8xf32>
    %207 = arith.truncf %206 : vector<2x8x8xf32> to vector<2x8x8xbf16>
    "tpu.trace_start"() <{level = 10 : i32, message = "bqk,bkd->bqd"}> : () -> ()
    %cst_65 = arith.constant dense<0.000000e+00> : vector<2x8x8xf32>
    %208 = tpu.matmul %207, %195, %cst_65 {dimension_numbers = #tpu.dot_dimension_numbers<[2], [1], [1], [2], [0, 0, 0, 1, 1, 2], [0], [0]>} : vector<2x8x8xbf16>, vector<2x8x8xbf16>, vector<2x8x8xf32> -> vector<2x8x8xf32>
    "tpu.trace_stop"() : () -> ()
    %209 = vector.shape_cast %208 : vector<2x8x8xf32> to vector<16x8xf32>
    %210 = vector.extract_strided_slice %153 {offsets = [0, 16], sizes = [16, 8], strides = [1, 1]} : vector<16x32xf32> to vector<16x8xf32>
    %211 = vector.shape_cast %210 : vector<16x8xf32> to vector<2x8x8xf32>
    %212 = arith.truncf %211 : vector<2x8x8xf32> to vector<2x8x8xbf16>
    %213 = vector.extract_strided_slice %162 {offsets = [0, 16], sizes = [16, 8], strides = [1, 1]} : vector<16x32xf32> to vector<16x8xf32>
    %214 = vector.shape_cast %213 : vector<16x8xf32> to vector<2x8x8xf32>
    %215 = arith.truncf %214 : vector<2x8x8xf32> to vector<2x8x8xbf16>
    %216 = vector.extract_strided_slice %163 {offsets = [0, 16], sizes = [16, 8], strides = [1, 1]} : vector<16x32xf32> to vector<16x8xf32>
    %217 = vector.shape_cast %216 : vector<16x8xf32> to vector<2x8x8xf32>
    %218 = arith.truncf %217 : vector<2x8x8xf32> to vector<2x8x8xbf16>
    "tpu.trace_start"() <{level = 10 : i32, message = "bqd,bkd->bqk"}> : () -> ()
    %cst_66 = arith.constant dense<0.000000e+00> : vector<2x8x8xf32>
    %219 = tpu.matmul %212, %215, %cst_66 {dimension_numbers = #tpu.dot_dimension_numbers<[2], [2], [1], [1], [0, 0, 0, 1, 1, 1], [0], [0]>} : vector<2x8x8xbf16>, vector<2x8x8xbf16>, vector<2x8x8xf32> -> vector<2x8x8xf32>
    "tpu.trace_stop"() : () -> ()
    %cst_67 = arith.constant dense<0xFF800000> : vector<2x8xf32>
    %220 = vector.multi_reduction <maximumf>, %219, %cst_67 [2] : vector<2x8x8xf32> to vector<2x8xf32>
    %221 = vector.shape_cast %220 : vector<2x8xf32> to vector<2x8x1xf32>
    %222 = vector.broadcast %221 : vector<2x8x1xf32> to vector<2x8x8xf32>
    %223 = arith.subf %219, %222 : vector<2x8x8xf32>
    %224 = math.exp %223 : vector<2x8x8xf32>
    %cst_68 = arith.constant dense<0.000000e+00> : vector<2x8xf32>
    %225 = vector.multi_reduction <add>, %224, %cst_68 [2] : vector<2x8x8xf32> to vector<2x8xf32>
    %226 = vector.shape_cast %225 : vector<2x8xf32> to vector<2x8x1xf32>
    %227 = tpu.reciprocal %226 {approx = true} : vector<2x8x1xf32> -> vector<2x8x1xf32>
    %228 = vector.broadcast %227 : vector<2x8x1xf32> to vector<2x8x8xf32>
    %229 = arith.mulf %224, %228 : vector<2x8x8xf32>
    %230 = arith.truncf %229 : vector<2x8x8xf32> to vector<2x8x8xbf16>
    "tpu.trace_start"() <{level = 10 : i32, message = "bqk,bkd->bqd"}> : () -> ()
    %cst_69 = arith.constant dense<0.000000e+00> : vector<2x8x8xf32>
    %231 = tpu.matmul %230, %218, %cst_69 {dimension_numbers = #tpu.dot_dimension_numbers<[2], [1], [1], [2], [0, 0, 0, 1, 1, 2], [0], [0]>} : vector<2x8x8xbf16>, vector<2x8x8xbf16>, vector<2x8x8xf32> -> vector<2x8x8xf32>
    "tpu.trace_stop"() : () -> ()
    %232 = vector.shape_cast %231 : vector<2x8x8xf32> to vector<16x8xf32>
    %233 = vector.extract_strided_slice %153 {offsets = [0, 24], sizes = [16, 8], strides = [1, 1]} : vector<16x32xf32> to vector<16x8xf32>
    %234 = vector.shape_cast %233 : vector<16x8xf32> to vector<2x8x8xf32>
    %235 = arith.truncf %234 : vector<2x8x8xf32> to vector<2x8x8xbf16>
    %236 = vector.extract_strided_slice %162 {offsets = [0, 24], sizes = [16, 8], strides = [1, 1]} : vector<16x32xf32> to vector<16x8xf32>
    %237 = vector.shape_cast %236 : vector<16x8xf32> to vector<2x8x8xf32>
    %238 = arith.truncf %237 : vector<2x8x8xf32> to vector<2x8x8xbf16>
    %239 = vector.extract_strided_slice %163 {offsets = [0, 24], sizes = [16, 8], strides = [1, 1]} : vector<16x32xf32> to vector<16x8xf32>
    %240 = vector.shape_cast %239 : vector<16x8xf32> to vector<2x8x8xf32>
    %241 = arith.truncf %240 : vector<2x8x8xf32> to vector<2x8x8xbf16>
    "tpu.trace_start"() <{level = 10 : i32, message = "bqd,bkd->bqk"}> : () -> ()
    %cst_70 = arith.constant dense<0.000000e+00> : vector<2x8x8xf32>
    %242 = tpu.matmul %235, %238, %cst_70 {dimension_numbers = #tpu.dot_dimension_numbers<[2], [2], [1], [1], [0, 0, 0, 1, 1, 1], [0], [0]>} : vector<2x8x8xbf16>, vector<2x8x8xbf16>, vector<2x8x8xf32> -> vector<2x8x8xf32>
    "tpu.trace_stop"() : () -> ()
    %cst_71 = arith.constant dense<0xFF800000> : vector<2x8xf32>
    %243 = vector.multi_reduction <maximumf>, %242, %cst_71 [2] : vector<2x8x8xf32> to vector<2x8xf32>
    %244 = vector.shape_cast %243 : vector<2x8xf32> to vector<2x8x1xf32>
    %245 = vector.broadcast %244 : vector<2x8x1xf32> to vector<2x8x8xf32>
    %246 = arith.subf %242, %245 : vector<2x8x8xf32>
    %247 = math.exp %246 : vector<2x8x8xf32>
    %cst_72 = arith.constant dense<0.000000e+00> : vector<2x8xf32>
    %248 = vector.multi_reduction <add>, %247, %cst_72 [2] : vector<2x8x8xf32> to vector<2x8xf32>
    %249 = vector.shape_cast %248 : vector<2x8xf32> to vector<2x8x1xf32>
    %250 = tpu.reciprocal %249 {approx = true} : vector<2x8x1xf32> -> vector<2x8x1xf32>
    %251 = vector.broadcast %250 : vector<2x8x1xf32> to vector<2x8x8xf32>
    %252 = arith.mulf %247, %251 : vector<2x8x8xf32>
    %253 = arith.truncf %252 : vector<2x8x8xf32> to vector<2x8x8xbf16>
    "tpu.trace_start"() <{level = 10 : i32, message = "bqk,bkd->bqd"}> : () -> ()
    %cst_73 = arith.constant dense<0.000000e+00> : vector<2x8x8xf32>
    %254 = tpu.matmul %253, %241, %cst_73 {dimension_numbers = #tpu.dot_dimension_numbers<[2], [1], [1], [2], [0, 0, 0, 1, 1, 2], [0], [0]>} : vector<2x8x8xbf16>, vector<2x8x8xbf16>, vector<2x8x8xf32> -> vector<2x8x8xf32>
    "tpu.trace_stop"() : () -> ()
    %255 = vector.shape_cast %254 : vector<2x8x8xf32> to vector<16x8xf32>
    %256 = tpu.concatenate %186, %209, %232, %255 in 1 : vector<16x8xf32>, vector<16x8xf32>, vector<16x8xf32>, vector<16x8xf32> -> vector<16x32xf32>
    %257 = arith.truncf %256 : vector<16x32xf32> to vector<16x32xbf16>
    %c0_74 = arith.constant 0 : index
    %c0_75 = arith.constant 0 : index
    %c0_76 = arith.constant 0 : index
    %258 = vector.load %arg11[%c0_74, %c0_75, %c0_76] : memref<1x32x32xbf16, #tpu.memory_space<vmem>>, vector<1x32x32xbf16>
    %259 = vector.shape_cast %258 : vector<1x32x32xbf16> to vector<32x32xbf16>
    %cst_77 = arith.constant dense<0.000000e+00> : vector<16x32xf32>
    %260 = tpu.matmul %257, %259, %cst_77 {dimension_numbers = #tpu.dot_dimension_numbers<[1], [0], [0], [1], [0, 0, 1, 1], [], []>} : vector<16x32xbf16>, vector<32x32xbf16>, vector<16x32xf32> -> vector<16x32xf32>
    %c0_78 = arith.constant 0 : index
    %c0_79 = arith.constant 0 : index
    %c0_80 = arith.constant 0 : index
    %261 = vector.load %arg12[%c0_78, %c0_79, %c0_80] : memref<1x1x32xf32, #tpu.memory_space<vmem>>, vector<1x1x32xf32>
    %262 = vector.shape_cast %261 : vector<1x1x32xf32> to vector<1x32xf32>
    %263 = vector.broadcast %262 : vector<1x32xf32> to vector<16x32xf32>
    %264 = arith.addf %260, %263 : vector<16x32xf32>
    %265 = arith.addf %145, %264 : vector<16x32xf32>
    %266 = vector.extract_strided_slice %6 {offsets = [1, 0], sizes = [1, 32], strides = [1, 1]} : vector<3x32xf32> to vector<1x32xf32>
    %267 = vector.extract_strided_slice %8 {offsets = [1, 0], sizes = [1, 32], strides = [1, 1]} : vector<3x32xf32> to vector<1x32xf32>
    %cst_81 = arith.constant dense<0.000000e+00> : vector<16xf32>
    %268 = vector.multi_reduction <add>, %265, %cst_81 [1] : vector<16x32xf32> to vector<16xf32>
    %269 = vector.shape_cast %268 : vector<16xf32> to vector<16x1xf32>
    %cst_82 = arith.constant 3.200000e+01 : f32
    %270 = vector.broadcast %cst_82 : f32 to vector<16x1xf32>
    %271 = arith.divf %269, %270 : vector<16x1xf32>
    %272 = vector.broadcast %271 : vector<16x1xf32> to vector<16x32xf32>
    %273 = arith.subf %265, %272 : vector<16x32xf32>
    %274 = arith.mulf %273, %273 : vector<16x32xf32>
    %cst_83 = arith.constant dense<0.000000e+00> : vector<16xf32>
    %275 = vector.multi_reduction <add>, %274, %cst_83 [1] : vector<16x32xf32> to vector<16xf32>
    %276 = vector.shape_cast %275 : vector<16xf32> to vector<16x1xf32>
    %cst_84 = arith.constant 3.200000e+01 : f32
    %277 = vector.broadcast %cst_84 : f32 to vector<16x1xf32>
    %278 = arith.divf %276, %277 : vector<16x1xf32>
    %279 = vector.broadcast %271 : vector<16x1xf32> to vector<16x32xf32>
    %280 = arith.subf %265, %279 : vector<16x32xf32>
    %cst_85 = arith.constant 9.99999974E-6 : f32
    %281 = vector.broadcast %cst_85 : f32 to vector<16x1xf32>
    %282 = arith.addf %278, %281 : vector<16x1xf32>
    %283 = math.rsqrt %282 : vector<16x1xf32>
    %284 = vector.broadcast %283 : vector<16x1xf32> to vector<16x32xf32>
    %285 = arith.mulf %280, %284 : vector<16x32xf32>
    %286 = vector.broadcast %266 : vector<1x32xf32> to vector<16x32xf32>
    %287 = arith.mulf %285, %286 : vector<16x32xf32>
    %288 = vector.broadcast %267 : vector<1x32xf32> to vector<16x32xf32>
    %289 = arith.addf %287, %288 : vector<16x32xf32>
    %290 = arith.truncf %289 : vector<16x32xf32> to vector<16x32xbf16>
    %c0_86 = arith.constant 0 : index
    %c0_87 = arith.constant 0 : index
    %c0_88 = arith.constant 0 : index
    %291 = vector.load %arg15[%c0_86, %c0_87, %c0_88] : memref<1x32x64xbf16, #tpu.memory_space<vmem>>, vector<1x32x64xbf16>
    %292 = vector.shape_cast %291 : vector<1x32x64xbf16> to vector<32x64xbf16>
    %cst_89 = arith.constant dense<0.000000e+00> : vector<16x64xf32>
    %293 = tpu.matmul %290, %292, %cst_89 {dimension_numbers = #tpu.dot_dimension_numbers<[1], [0], [0], [1], [0, 0, 1, 1], [], []>} : vector<16x32xbf16>, vector<32x64xbf16>, vector<16x64xf32> -> vector<16x64xf32>
    %c0_90 = arith.constant 0 : index
    %c0_91 = arith.constant 0 : index
    %c0_92 = arith.constant 0 : index
    %294 = vector.load %arg16[%c0_90, %c0_91, %c0_92] : memref<1x1x64xf32, #tpu.memory_space<vmem>>, vector<1x1x64xf32>
    %295 = vector.shape_cast %294 : vector<1x1x64xf32> to vector<1x64xf32>
    %296 = vector.broadcast %295 : vector<1x64xf32> to vector<16x64xf32>
    %297 = arith.addf %293, %296 : vector<16x64xf32>
    %cst_93 = arith.constant 0.000000e+00 : f32
    %298 = vector.broadcast %cst_93 : f32 to vector<16x64xf32>
    %299 = arith.maximumf %297, %298 : vector<16x64xf32>
    %300 = arith.truncf %299 : vector<16x64xf32> to vector<16x64xbf16>
    %c0_94 = arith.constant 0 : index
    %c0_95 = arith.constant 0 : index
    %c0_96 = arith.constant 0 : index
    %301 = vector.load %arg17[%c0_94, %c0_95, %c0_96] : memref<1x64x32xbf16, #tpu.memory_space<vmem>>, vector<1x64x32xbf16>
    %302 = vector.shape_cast %301 : vector<1x64x32xbf16> to vector<64x32xbf16>
    %cst_97 = arith.constant dense<0.000000e+00> : vector<16x32xf32>
    %303 = tpu.matmul %300, %302, %cst_97 {dimension_numbers = #tpu.dot_dimension_numbers<[1], [0], [0], [1], [0, 0, 1, 1], [], []>} : vector<16x64xbf16>, vector<64x32xbf16>, vector<16x32xf32> -> vector<16x32xf32>
    %c0_98 = arith.constant 0 : index
    %c0_99 = arith.constant 0 : index
    %c0_100 = arith.constant 0 : index
    %304 = vector.load %arg18[%c0_98, %c0_99, %c0_100] : memref<1x1x32xf32, #tpu.memory_space<vmem>>, vector<1x1x32xf32>
    %305 = vector.shape_cast %304 : vector<1x1x32xf32> to vector<1x32xf32>
    %306 = vector.broadcast %305 : vector<1x32xf32> to vector<16x32xf32>
    %307 = arith.addf %303, %306 : vector<16x32xf32>
    %308 = arith.addf %289, %307 : vector<16x32xf32>
    %309 = vector.extract_strided_slice %6 {offsets = [2, 0], sizes = [1, 32], strides = [1, 1]} : vector<3x32xf32> to vector<1x32xf32>
    %310 = vector.extract_strided_slice %8 {offsets = [2, 0], sizes = [1, 32], strides = [1, 1]} : vector<3x32xf32> to vector<1x32xf32>
    %cst_101 = arith.constant dense<0.000000e+00> : vector<16xf32>
    %311 = vector.multi_reduction <add>, %308, %cst_101 [1] : vector<16x32xf32> to vector<16xf32>
    %312 = vector.shape_cast %311 : vector<16xf32> to vector<16x1xf32>
    %cst_102 = arith.constant 3.200000e+01 : f32
    %313 = vector.broadcast %cst_102 : f32 to vector<16x1xf32>
    %314 = arith.divf %312, %313 : vector<16x1xf32>
    %315 = vector.broadcast %314 : vector<16x1xf32> to vector<16x32xf32>
    %316 = arith.subf %308, %315 : vector<16x32xf32>
    %317 = arith.mulf %316, %316 : vector<16x32xf32>
    %cst_103 = arith.constant dense<0.000000e+00> : vector<16xf32>
    %318 = vector.multi_reduction <add>, %317, %cst_103 [1] : vector<16x32xf32> to vector<16xf32>
    %319 = vector.shape_cast %318 : vector<16xf32> to vector<16x1xf32>
    %cst_104 = arith.constant 3.200000e+01 : f32
    %320 = vector.broadcast %cst_104 : f32 to vector<16x1xf32>
    %321 = arith.divf %319, %320 : vector<16x1xf32>
    %322 = vector.broadcast %314 : vector<16x1xf32> to vector<16x32xf32>
    %323 = arith.subf %308, %322 : vector<16x32xf32>
    %cst_105 = arith.constant 9.99999974E-6 : f32
    %324 = vector.broadcast %cst_105 : f32 to vector<16x1xf32>
    %325 = arith.addf %321, %324 : vector<16x1xf32>
    %326 = math.rsqrt %325 : vector<16x1xf32>
    %327 = vector.broadcast %326 : vector<16x1xf32> to vector<16x32xf32>
    %328 = arith.mulf %323, %327 : vector<16x32xf32>
    %329 = vector.broadcast %309 : vector<1x32xf32> to vector<16x32xf32>
    %330 = arith.mulf %328, %329 : vector<16x32xf32>
    %331 = vector.broadcast %310 : vector<1x32xf32> to vector<16x32xf32>
    %332 = arith.addf %330, %331 : vector<16x32xf32>
    %c0_106 = arith.constant 0 : index
    %c0_107 = arith.constant 0 : index
    %333 = vector.load %arg19[%c0_106, %c0_107] : memref<16x32xf32, #tpu.memory_space<vmem>>, vector<16x32xf32>
    tpu.vector_store %arg19[%c0_106, %c0_107], %332 {strides = array<i32>} : memref<16x32xf32, #tpu.memory_space<vmem>>, vector<16x32xf32>,
    return
  }
  func.func @transform_0(%arg0: i32) -> (i32, i32) {
    %c0_i32 = arith.constant 0 : i32
    %c0_i32_0 = arith.constant 0 : i32
    %c0_i32_1 = arith.constant 0 : i32
    return %c0_i32, %c0_i32_0 : i32, i32
  }
  func.func @transform_1(%arg0: i32) -> (i32, i32) {
    %c0_i32 = arith.constant 0 : i32
    %c0_i32_0 = arith.constant 0 : i32
    %c0_i32_1 = arith.constant 0 : i32
    return %c0_i32, %c0_i32_0 : i32, i32
  }
  func.func @transform_2(%arg0: i32) -> (i32, i32, i32) {
    %c0_i32 = arith.constant 0 : i32
    %c0_i32_0 = arith.constant 0 : i32
    %c0_i32_1 = arith.constant 0 : i32
    return %arg0, %c0_i32, %c0_i32_0 : i32, i32, i32
  }
  func.func @transform_3(%arg0: i32) -> (i32, i32, i32) {
    %c0_i32 = arith.constant 0 : i32
    %c0_i32_0 = arith.constant 0 : i32
    %c0_i32_1 = arith.constant 0 : i32
    return %arg0, %c0_i32, %c0_i32_0 : i32, i32, i32
  }
  func.func @transform_4(%arg0: i32) -> (i32, i32, i32) {
    %c0_i32 = arith.constant 0 : i32
    %c0_i32_0 = arith.constant 0 : i32
    %c0_i32_1 = arith.constant 0 : i32
    return %arg0, %c0_i32, %c0_i32_0 : i32, i32, i32
  }
  func.func @transform_5(%arg0: i32) -> (i32, i32, i32) {
    %c0_i32 = arith.constant 0 : i32
    %c0_i32_0 = arith.constant 0 : i32
    %c0_i32_1 = arith.constant 0 : i32
    return %arg0, %c0_i32, %c0_i32_0 : i32, i32, i32
  }
  func.func @transform_6(%arg0: i32) -> (i32, i32, i32) {
    %c0_i32 = arith.constant 0 : i32
    %c0_i32_0 = arith.constant 0 : i32
    %c0_i32_1 = arith.constant 0 : i32
    return %arg0, %c0_i32, %c0_i32_0 : i32, i32, i32
  }
  func.func @transform_7(%arg0: i32) -> (i32, i32, i32) {
    %c0_i32 = arith.constant 0 : i32
    %c0_i32_0 = arith.constant 0 : i32
    %c0_i32_1 = arith.constant 0 : i32
    return %arg0, %c0_i32, %c0_i32_0 : i32, i32, i32
  }
  func.func @transform_8(%arg0: i32) -> (i32, i32, i32) {
    %c0_i32 = arith.constant 0 : i32
    %c0_i32_0 = arith.constant 0 : i32
    %c0_i32_1 = arith.constant 0 : i32
    return %arg0, %c0_i32, %c0_i32_0 : i32, i32, i32
  }
  func.func @transform_9(%arg0: i32) -> (i32, i32, i32) {
    %c0_i32 = arith.constant 0 : i32
    %c0_i32_0 = arith.constant 0 : i32
    %c0_i32_1 = arith.constant 0 : i32
    return %arg0, %c0_i32, %c0_i32_0 : i32, i32, i32
  }
  func.func @transform_10(%arg0: i32) -> (i32, i32, i32) {
    %c0_i32 = arith.constant 0 : i32
    %c0_i32_0 = arith.constant 0 : i32
    %c0_i32_1 = arith.constant 0 : i32
    return %arg0, %c0_i32, %c0_i32_0 : i32, i32, i32
  }
  func.func @transform_11(%arg0: i32) -> (i32, i32, i32) {
    %c0_i32 = arith.constant 0 : i32
    %c0_i32_0 = arith.constant 0 : i32
    %c0_i32_1 = arith.constant 0 : i32
    return %arg0, %c0_i32, %c0_i32_0 : i32, i32, i32
  }
  func.func @transform_12(%arg0: i32) -> (i32, i32, i32) {
    %c0_i32 = arith.constant 0 : i32
    %c0_i32_0 = arith.constant 0 : i32
    %c0_i32_1 = arith.constant 0 : i32
    return %arg0, %c0_i32, %c0_i32_0 : i32, i32, i32
  }
  func.func @transform_13(%arg0: i32) -> (i32, i32, i32) {
    %c0_i32 = arith.constant 0 : i32
    %c0_i32_0 = arith.constant 0 : i32
    %c0_i32_1 = arith.constant 0 : i32
    return %arg0, %c0_i32, %c0_i32_0 : i32, i32, i32
  }
  func.func @transform_14(%arg0: i32) -> (i32, i32, i32) {
    %c0_i32 = arith.constant 0 : i32
    %c0_i32_0 = arith.constant 0 : i32
    %c0_i32_1 = arith.constant 0 : i32
    return %arg0, %c0_i32, %c0_i32_0 : i32, i32, i32
  }
  func.func @transform_15(%arg0: i32) -> (i32, i32, i32) {
    %c0_i32 = arith.constant 0 : i32
    %c0_i32_0 = arith.constant 0 : i32
    %c0_i32_1 = arith.constant 0 : i32
    return %arg0, %c0_i32, %c0_i32_0 : i32, i32, i32
  }
  func.func @transform_16(%arg0: i32) -> (i32, i32, i32) {
    %c0_i32 = arith.constant 0 : i32
    %c0_i32_0 = arith.constant 0 : i32
    %c0_i32_1 = arith.constant 0 : i32
    return %arg0, %c0_i32, %c0_i32_0 : i32, i32, i32
  }
  func.func @transform_17(%arg0: i32) -> (i32, i32, i32) {
    %c0_i32 = arith.constant 0 : i32
    %c0_i32_0 = arith.constant 0 : i32
    %c0_i32_1 = arith.constant 0 : i32
    return %arg0, %c0_i32, %c0_i32_0 : i32, i32, i32
  }
  func.func @transform_18(%arg0: i32) -> (i32, i32) {
    %c0_i32 = arith.constant 0 : i32
    %c0_i32_0 = arith.constant 0 : i32
    %c0_i32_1 = arith.constant 0 : i32
    return %c0_i32, %c0_i32_0 : i32, i32
  }
}

</mosaic_0001>

<bundles_post_ra>
// kernel: tpu_custom_call.1
= control target key start
LH: loop header
LB: loop body
LE: loop exit
PB: predicated region body
PF: predicated region fallthrough
CT: control target
= control target key end

     0   :  { %s5760_s0 = inlined_call_operand.hbm [shape: f32[16,32], index: 0, kind: input, shape index: {}]   ;;  %s5761_s1 = inlined_call_operand.hbm [shape: f32[16,32], index: 1, kind: input, shape index: {}]   ;;  %s5762_s2 = inlined_call_operand.vmem [shape: bf16[2,32,96], index: 2, kind: input, shape index: {}]   ;;  %s5763_s3 = inlined_call_operand.hbm [shape: f32[2,1,96], index: 3, kind: input, shape index: {}]   ;;  %s5764_s4 = inlined_call_operand.vmem [shape: bf16[2,32,32], index: 4, kind: input, shape index: {}]   ;;  %s5765_s5 = inlined_call_operand.hbm [shape: f32[2,1,32], index: 5, kind: input, shape index: {}]   ;;  %s5766_s6 = inlined_call_operand.vmem [shape: bf16[2,32,32], index: 6, kind: input, shape index: {}]   ;;  %s5767_s7 = inlined_call_operand.hbm [shape: f32[2,1,32], index: 7, kind: input, shape index: {}]   ;;  %s5768_s8 = inlined_call_operand.vmem [shape: bf16[2,32,64], index: 8, kind: input, shape index: {}]   ;;  %s5769_s9 = inlined_call_operand.hbm [shape: f32[2,1,64], index: 9, kind: input, shape index: {}]   ;;  %s5770_s10 = inlined_call_operand.hbm [shape: bf16[2,32,32], index: 10, kind: input, shape index: {}]   ;;  %s5771_s11 = inlined_call_operand.hbm [shape: f32[2,1,32], index: 11, kind: input, shape index: {}]   ;;  %s5772_s12 = inlined_call_operand.vmem [shape: f32[2,3,32], index: 12, kind: input, shape index: {}]   ;;  %s5773_s13 = inlined_call_operand.vmem [shape: f32[2,3,32], index: 13, kind: input, shape index: {}]   ;;  %s5774_s14 = inlined_call_operand.hbm [shape: bf16[2,32,64], index: 14, kind: input, shape index: {}]   ;;  %s5775_s15 = inlined_call_operand.vmem [shape: f32[2,1,64], index: 15, kind: input, shape index: {}]   ;;  %s5776_s16 = inlined_call_operand.vmem [shape: bf16[2,64,32], index: 16, kind: input, shape index: {}]   ;;  %s5777_s17 = inlined_call_operand.vmem [shape: f32[2,1,32], index: 17, kind: input, shape index: {}]   ;;  %s5778_s18 = inlined_call_operand.hbm [shape: f32[16,32], index: 18, kind: output, shape index: {}]  }
   0x1   :  { %5803 = sst [smem:[#allocation22_spill]] %s5760_s0 }
   0x2   :  { %5804 = sst [smem:[#allocation23_spill]] %s5761_s1 }
   0x3   :  { %5805 = sst [smem:[#allocation24_spill]] %s5762_s2 }
   0x4   :  { %5806 = sst [smem:[#allocation25_spill]] %s5763_s3 }
   0x5   :  { %5807 = sst [smem:[#allocation26_spill]] %s5764_s4 }
   0x6   :  { %5808 = sst [smem:[#allocation27_spill]] %s5765_s5 }
   0x7   :  { %5809 = sst [smem:[#allocation28_spill]] %s5766_s6 }
   0x8   :  { %5810 = sst [smem:[#allocation29_spill]] %s5767_s7 }
   0x9   :  { %5811 = sst [smem:[#allocation30_spill]] %s5768_s8 }
   0xa   :  { %5812 = sst [smem:[#allocation31_spill]] %s5769_s9 }
   0xb   :  { %5813 = sst [smem:[#allocation32_spill]] %s5770_s10 }
   0xc   :  { %5814 = sst [smem:[#allocation33_spill]] %s5771_s11 }
   0xd   :  { %5815 = sst [smem:[#allocation34_spill]] %s5772_s12 }
   0xe   :  { %5816 = sst [smem:[#allocation35_spill]] %s5773_s13 }
   0xf   :  { %5817 = sst [smem:[#allocation36_spill]] %s5774_s14 }
  0x10   :  { %5818 = sst [smem:[#allocation37_spill]] %s5775_s15 }
  0x11   :  { %5819 = sst [smem:[#allocation38_spill]] %s5776_s16 }
  0x12   :  { %5820 = sst [smem:[#allocation39_spill]] %s5777_s17 }
  0x13   :  { %5821 = sst [smem:[#allocation40_spill]] %s5778_s18 }
  0x14   :  { %23 = vsyncpa [#allocation3], 0 }
  0x15   :  { %24 = vsyncpa [#allocation6], 0 }
  0x16   :  { %25 = vsyncpa [#allocation4], 0  ;;  %s4859_s27 = smov 0   ;;  %s4861_s28 = smov 0  }
  0x17   :  { %s4863_s29 = smov 0   ;;  %s4865_s30 = smov 0  }
  0x18 LB: > { %5822 = sst [smem:[#allocation19_spill]] %s4727_s29  ;;  %s4878_s0 = sadd.s32 4294967295, %s4731_s30   ;;  %s4731_s30 = sphi %s4865_s30, %s5877_s30   ;;  %s4727_s29 = sphi %s4863_s29, %s5879_s29   ;;  %s4723_s28 = sphi %s4861_s28, %s5881_s28   ;;  %s4719_s27 = sphi %s4859_s27, %s5880_s27  }
  0x19   : > { %s4881_s19 = sadd.s32 1, %s4731_s30   ;;  %s106_s20 = sadd.s32 1, %s4727_s29 }
  0x1a   : > { %5823 = sst [smem:[#allocation20_spill]] %s4881_s19  ;;  %s103_s1 = ssub.s32 %s4731_s30, %s4881_s19 }
  0x1b   : > { %p104_p0 = scmp.eq.s32.totalorder %s103_s1, 0  ;;  %p113_p1 = scmp.ne.s32.totalorder %s4727_s29, %s4723_s28 }
  0x1c   : > { %p114_p2 = scmp.eq.s32.totalorder %s4731_s30, 0  ;;  %p119_p3 = scmp.ne.s32.totalorder %s4723_s28, %s4719_s27 }
  0x1d   : > { %s4891_s21 = scalar_select %p104_p0, %s4727_s29, %s106_s20  }
  0x1e   : > { %p4893_p4 = por %p114_p2, %p113_p1  ;;  %p5785_p5 = scmp.eq.s32.totalorder %s4878_s0, 0 }
  0x1f   : > { %5824 = sst [smem:[#allocation21_spill]] %s4891_s21  ;;  %p3708_p6 = scmp.ge.s32.totalorder %s4731_s30, 1 }
  0x20   : > { %p515_p7 = scmp.lt.s32.totalorder %s4731_s30, 3  ;;  %p4902_p8 = por %p5785_p5, %p119_p3 }
  0x21   : > { %s4733_s24 = smov [#allocation2]   ;;  %p4210_p13 = scmp.lt.s32.totalorder %s4731_s30, 2 }
  0x22   : > { %s5826_s2 = scalar_select %p4902_p8, 1, 0 }
  0x23   : > { %p4907_p10 = pnand %p3708_p6, %p515_p7  ;;  %s527_s25 = sshll.u32 %s4733_s24, 4  ;;  %s528_s25 = int_to_ptr.vmem [resolvable:$true] %s527_s25 }
  0x24   : > { %s562_s27 = sand.u32 1, %s4731_s30   ;;  %s4922_s1 = sand.u32 1, %s4727_s29  }
  0x25   : > { %s5827_s23 = scalar_select %p4907_p10, 1, 0 }
  0x26   : > { %p4179_p11 = pneg %p4907_p10  ;;  %p4926_p0 = pnand %p4210_p13, %p4893_p4 }
  0x27   : > { %s5830_s19 = sld [smem:[#allocation22_spill]] }
  0x28   : > { %p4915_p12 = pnand %p4179_p11, %p5785_p5 }
  0x29   : > { %s5829_s20 = scalar_select %p4926_p0, 1, 0 }
  0x2a   : > { %s5828_s26 = scalar_select %p4915_p12, 1, 0 }
  0x2b   : > { %p5790_p2 = pneg %p4915_p12 }
  0x2d   : > { %s4393_s18 = scalar_lea.hbm %s5830_s19, 256 }
  0x2e   : > { %p4394_p1 = scmp.ne.s32.totalorder %s5830_s19, %s4393_s18  ;;  %p4400_p4 = scmp.lt.u32.totalorder %s4393_s18, %s5830_s19 }
  0x30   : > { %p4396_p3 = pnand %p5790_p2, %p4394_p1 }
  0x32   : > { %p4397_p6 = pneg %p4396_p3 }
  0x34   : > { %p4402_p7 = pnand %p4400_p4, %p4397_p6 }
  0x36   : > { %4405 = shalt.err (!%p4402_p7)
}
  0x37   : > { %s4406_s15 = scalar_lea.vmem %s528_s25, 256  ;;  %p4414_p5 = scmp.lt.s32.totalorder %s528_s25, %s528_s25 }
  0x38   : > { %p4407_p11 = scmp.ne.s32.totalorder %s528_s25, %s4406_s15  ;;  %p4415_p8 = scmp.lt.s32.totalorder %s4406_s15, %s4406_s15 }
  0x3a   : > { %p4409_p13 = pnand %p4407_p11, %p5790_p2  ;;  %p4416_p10 = por %p4415_p8, %p4414_p5 }
  0x3c   : > { %p4410_p9 = pneg %p4409_p13 }
  0x3e   : > { %p4417_p0 = pnand %p4416_p10, %p4410_p9 }
  0x40   : > { %4420 = shalt.err (!%p4417_p0)
}
  0x41   : > { %s5789_s16 = smov 128   ;;  %s5793_s17 = smov 8  }
  0x42   : > { %4182 = dma.hbm_to_vmem [thread:$0]  (!%p4915_p12), %s5830_s19, 256, %s528_s25, [#allocation3], %s5789_s16, %s5789_s16, %s5793_s17  }
  0x43   : > { %s4956_s21 = sshll.u32 %s4731_s30, 4  ;;  %s5831_s3 = sld [smem:[#allocation25_spill]] }
  0x44   : > { %s565_s13 = scalar_lea.vmem [#allocation7], %s4922_s1  ;;  %s4967_s8 = scalar_lea.sflag [#allocation3], %s562_s27 }
  0x45   : > { %s572_s12 = sshll.u32 %s565_s13, 4  ;;  %p5832_p8 = scmp.ne.s32.totalorder %s5829_s20, 0  ;;  %s4965_s12 = int_to_ptr.vmem [resolvable:$true] %s572_s12 }
  0x47   : > { %p4973_p9 = pneg %p5832_p8 }
  0x49   : > { %s4962_s22 = scalar_lea.hbm %s5831_s3, %s4956_s21  ;;  %s4426_s24 = scalar_lea.hbm %s5831_s3, 32 }
  0x4a   : > { %s4421_s18 = scalar_lea.hbm %s4962_s22, 16  ;;  %p4427_p1 = scmp.lt.u32.totalorder %s4962_s22, %s5831_s3 }
  0x4b   : > { %p4422_p5 = scmp.ne.s32.totalorder %s4962_s22, %s4421_s18  ;;  %p4428_p3 = scmp.lt.u32.totalorder %s4426_s24, %s4421_s18 }
  0x4c   : > { %s5833_s25 = scalar_select %p4973_p9, 1, 0 }
  0x4d   : > { %p4424_p10 = pnand %p4973_p9, %p4422_p5  ;;  %p4429_p6 = por %p4428_p3, %p4427_p1 }
  0x4e   : > { %p4430_p4 = scmp.lt.u32.totalorder %s4421_s18, %s4962_s22 }
  0x4f   : > { %p4425_p0 = pneg %p4424_p10 }
  0x50   : > { %p4431_p7 = por %p4430_p4, %p4429_p6 }
  0x52   : > { %p4432_p11 = pnand %p4431_p7, %p4425_p0 }
  0x54   : > { %4435 = shalt.err (!%p4432_p11)
}
  0x55   : > { %s4436_s27 = scalar_lea.vmem %s4965_s12, 16  ;;  %s4736_s29 = smov [#allocation7]  }
  0x56   : > { %p4437_p13 = scmp.ne.s32.totalorder %s4965_s12, %s4436_s27  ;;  %s4441_s15 = sshll.u32 %s4736_s29, 4  ;;  %s4442_s15 = int_to_ptr.vmem [resolvable:$false] %s4441_s15 }
  0x57   : > { %s4443_s16 = scalar_lea.vmem %s4442_s15, 32  ;;  %p4444_p2 = scmp.lt.s32.totalorder %s4965_s12, %s4442_s15 }
  0x58   : > { %p4439_p5 = pnand %p4437_p13, %p4973_p9  ;;  %p4445_p12 = scmp.lt.s32.totalorder %s4443_s16, %s4436_s27 }
  0x5a   : > { %p4440_p10 = pneg %p4439_p5  ;;  %p4446_p1 = por %p4445_p12, %p4444_p2 }
  0x5c   : > { %p4447_p3 = pnand %p4446_p1, %p4440_p10 }
  0x5e   : > { %4450 = shalt.err (!%p4447_p3)
}
  0x5f   : > { %4189 = dma.hbm_to_vmem [thread:$0]  (!%p5832_p8), %s4962_s22, 16, %s4965_s12, %s4967_s8  }
  0x60   : > { %s5834_s5 = sld [smem:[#allocation27_spill]]  ;;  %s590_s27 = scalar_lea.vmem [#allocation8], %s4922_s1 }
  0x61   : > { %s597_s29 = sshll.u32 %s590_s27, 4  ;;  %s598_s29 = int_to_ptr.vmem [resolvable:$true] %s597_s29 }
  0x66   : > { %s5001_s13 = scalar_lea.hbm %s5834_s5, %s4956_s21  ;;  %s4456_s12 = scalar_lea.hbm %s5834_s5, 32 }
  0x67   : > { %s4451_s15 = scalar_lea.hbm %s5001_s13, 16  ;;  %p4457_p6 = scmp.lt.u32.totalorder %s5001_s13, %s5834_s5 }
  0x68   : > { %p4452_p12 = scmp.ne.s32.totalorder %s5001_s13, %s4451_s15  ;;  %p4458_p4 = scmp.lt.u32.totalorder %s4456_s12, %s4451_s15 }
  0x69   : > { %p4460_p11 = scmp.lt.u32.totalorder %s4451_s15, %s5001_s13 }
  0x6a   : > { %p4454_p2 = pnand %p4452_p12, %p4973_p9  ;;  %p4459_p7 = por %p4458_p4, %p4457_p6 }
  0x6c   : > { %p4455_p0 = pneg %p4454_p2  ;;  %p4461_p13 = por %p4460_p11, %p4459_p7 }
  0x6e   : > { %p4462_p5 = pnand %p4461_p13, %p4455_p0 }
  0x70   : > { %4465 = shalt.err (!%p4462_p5)
}
  0x71   : > { %s4466_s24 = scalar_lea.vmem %s598_s29, 16  ;;  %s4737_s27 = smov [#allocation8]  }
  0x72   : > { %p4467_p10 = scmp.ne.s32.totalorder %s598_s29, %s4466_s24  ;;  %s4471_s3 = sshll.u32 %s4737_s27, 4  ;;  %s4472_s3 = int_to_ptr.vmem [resolvable:$false] %s4471_s3 }
  0x73   : > { %s4473_s17 = scalar_lea.vmem %s4472_s3, 32  ;;  %p4474_p12 = scmp.lt.s32.totalorder %s598_s29, %s4472_s3 }
  0x74   : > { %p4469_p1 = pnand %p4467_p10, %p4973_p9  ;;  %p4475_p2 = scmp.lt.s32.totalorder %s4473_s17, %s4466_s24 }
  0x76   : > { %p4470_p3 = pneg %p4469_p1  ;;  %p4476_p8 = por %p4475_p2, %p4474_p12 }
  0x78   : > { %p4477_p4 = pnand %p4476_p8, %p4470_p3 }
  0x7a   : > { %4480 = shalt.err (!%p4477_p4)
}
  0x7b   : > { %p5835_p6 = scmp.ne.s32.totalorder %s5829_s20, 0  ;;  %s5836_s7 = sld [smem:[#allocation29_spill]] }
  0x7c   : > { %s615_s3 = scalar_lea.vmem [#allocation9], %s4922_s1 }
  0x7d   : > { %4192 = dma.hbm_to_vmem [thread:$0]  (!%p5835_p6), %s5001_s13, 16, %s598_s29, %s4967_s8  }
  0x7e   : > { %s622_s22 = sshll.u32 %s615_s3, 4  ;;  %s623_s22 = int_to_ptr.vmem [resolvable:$true] %s622_s22 }
  0x81   : > { %s5026_s12 = scalar_lea.hbm %s5836_s7, %s4956_s21  ;;  %s4486_s13 = scalar_lea.hbm %s5836_s7, 32 }
  0x82   : > { %s4481_s18 = scalar_lea.hbm %s5026_s12, 16  ;;  %p4487_p11 = scmp.lt.u32.totalorder %s5026_s12, %s5836_s7 }
  0x83   : > { %p4482_p8 = scmp.ne.s32.totalorder %s5026_s12, %s4481_s18  ;;  %p4488_p13 = scmp.lt.u32.totalorder %s4486_s13, %s4481_s18 }
  0x84   : > { %p4490_p10 = scmp.lt.u32.totalorder %s4481_s18, %s5026_s12 }
  0x85   : > { %p4484_p0 = pnand %p4482_p8, %p4973_p9  ;;  %p4489_p5 = por %p4488_p13, %p4487_p11 }
  0x87   : > { %p4485_p7 = pneg %p4484_p0  ;;  %p4491_p1 = por %p4490_p10, %p4489_p5 }
  0x89   : > { %p4492_p3 = pnand %p4491_p1, %p4485_p7 }
  0x8b   : > { %4495 = shalt.err (!%p4492_p3)
}
  0x8c   : > { %s4496_s15 = scalar_lea.vmem %s623_s22, 16  ;;  %s4738_s16 = smov [#allocation9]  }
  0x8d   : > { %p4497_p12 = scmp.ne.s32.totalorder %s623_s22, %s4496_s15  ;;  %s4501_s3 = sshll.u32 %s4738_s16, 4  ;;  %s4502_s3 = int_to_ptr.vmem [resolvable:$false] %s4501_s3 }
  0x8e   : > { %s4503_s24 = scalar_lea.vmem %s4502_s3, 32  ;;  %p4504_p8 = scmp.lt.s32.totalorder %s623_s22, %s4502_s3 }
  0x8f   : > { %p4499_p2 = pnand %p4497_p12, %p4973_p9  ;;  %p4505_p0 = scmp.lt.s32.totalorder %s4503_s24, %s4496_s15 }
  0x91   : > { %p4500_p4 = pneg %p4499_p2  ;;  %p4506_p6 = por %p4505_p0, %p4504_p8 }
  0x93   : > { %p4507_p11 = pnand %p4506_p6, %p4500_p4 }
  0x95   : > { %4510 = shalt.err (!%p4507_p11)
}
  0x96   : > { %p5837_p13 = scmp.ne.s32.totalorder %s5829_s20, 0  ;;  %s5838_s9 = sld [smem:[#allocation31_spill]] }
  0x97   : > { %s640_s29 = scalar_lea.vmem [#allocation10], %s4922_s1 }
  0x98   : > { %4195 = dma.hbm_to_vmem [thread:$0]  (!%p5837_p13), %s5026_s12, 16, %s623_s22, %s4967_s8  }
  0x99   : > { %s647_s17 = sshll.u32 %s640_s29, 4  ;;  %s648_s17 = int_to_ptr.vmem [resolvable:$true] %s647_s17 }
  0x9c   : > { %s5051_s13 = scalar_lea.hbm %s5838_s9, %s4956_s21  ;;  %s4516_s22 = scalar_lea.hbm %s5838_s9, 32 }
  0x9d   : > { %s4511_s16 = scalar_lea.hbm %s5051_s13, 16  ;;  %p4517_p10 = scmp.lt.u32.totalorder %s5051_s13, %s5838_s9 }
  0x9e   : > { %p4512_p6 = scmp.ne.s32.totalorder %s5051_s13, %s4511_s16  ;;  %p4518_p1 = scmp.lt.u32.totalorder %s4516_s22, %s4511_s16 }
  0x9f   : > { %p4520_p12 = scmp.lt.u32.totalorder %s4511_s16, %s5051_s13 }
  0xa0   : > { %p4514_p7 = pnand %p4512_p6, %p4973_p9  ;;  %p4519_p3 = por %p4518_p1, %p4517_p10 }
  0xa2   : > { %p4515_p5 = pneg %p4514_p7  ;;  %p4521_p2 = por %p4520_p12, %p4519_p3 }
  0xa4   : > { %p4522_p4 = pnand %p4521_p2, %p4515_p5 }
  0xa6   : > { %4525 = shalt.err (!%p4522_p4)
}
  0xa7   : > { %s4526_s27 = scalar_lea.vmem %s648_s17, 16  ;;  %s4739_s29 = smov [#allocation10]  }
  0xa8   : > { %p4527_p8 = scmp.ne.s32.totalorder %s648_s17, %s4526_s27  ;;  %s4531_s15 = sshll.u32 %s4739_s29, 4  ;;  %s4532_s15 = int_to_ptr.vmem [resolvable:$false] %s4531_s15 }
  0xa9   : > { %s4533_s3 = scalar_lea.vmem %s4532_s15, 32  ;;  %p4534_p6 = scmp.lt.s32.totalorder %s648_s17, %s4532_s15 }
  0xaa   : > { %p4529_p0 = pnand %p4527_p8, %p4973_p9  ;;  %p4535_p7 = scmp.lt.s32.totalorder %s4533_s3, %s4526_s27 }
  0xac   : > { %p4530_p11 = pneg %p4529_p0  ;;  %p4536_p13 = por %p4535_p7, %p4534_p6 }
  0xae   : > { %p4537_p1 = pnand %p4536_p13, %p4530_p11 }
  0xb0   : > { %4540 = shalt.err (!%p4537_p1)
}
  0xb1   : > { %p5839_p10 = scmp.ne.s32.totalorder %s5829_s20, 0  ;;  %s5795_s16 = sshll.u32 %s4731_s30, 8 }
  0xb2   : > { %s5840_s10 = sld [smem:[#allocation32_spill]]  ;;  %s5841_s15 = sshll.u32 %s4922_s1, 4 }
  0xb3   : > { %4198 = dma.hbm_to_vmem [thread:$0]  (!%p5839_p10), %s5051_s13, 16, %s648_s17, %s4967_s8  }
  0xb4   : > { %s658_s18 = scalar_lea.vmem [#allocation11], %s5841_s15 }
  0xb5   : > { %s665_s27 = sshll.u32 %s658_s18, 4  ;;  %s5083_s27 = int_to_ptr.vmem [resolvable:$true] %s665_s27 }
  0xb8   : > { %s5079_s24 = scalar_lea.hbm %s5840_s10, %s5795_s16  ;;  %s4546_s3 = scalar_lea.hbm %s5840_s10, 512 }
  0xb9   : > { %s4541_s29 = scalar_lea.hbm %s5079_s24, 256  ;;  %p4547_p12 = scmp.lt.u32.totalorder %s5079_s24, %s5840_s10 }
  0xba   : > { %p4542_p13 = scmp.ne.s32.totalorder %s5079_s24, %s4541_s29  ;;  %p4548_p2 = scmp.lt.u32.totalorder %s4546_s3, %s4541_s29 }
  0xbb   : > { %p4550_p8 = scmp.lt.u32.totalorder %s4541_s29, %s5079_s24 }
  0xbc   : > { %p4544_p5 = pnand %p4542_p13, %p4973_p9  ;;  %p4549_p4 = por %p4548_p2, %p4547_p12 }
  0xbe   : > { %p4545_p3 = pneg %p4544_p5  ;;  %p4551_p0 = por %p4550_p8, %p4549_p4 }
  0xc0   : > { %p4552_p11 = pnand %p4551_p0, %p4545_p3 }
  0xc2   : > { %4555 = shalt.err (!%p4552_p11)
}
  0xc3   : > { %s4556_s15 = scalar_lea.vmem %s5083_s27, 256  ;;  %s4740_s18 = smov [#allocation11]  }
  0xc4   : > { %p4557_p6 = scmp.ne.s32.totalorder %s5083_s27, %s4556_s15  ;;  %s4561_s13 = sshll.u32 %s4740_s18, 4  ;;  %s4562_s13 = int_to_ptr.vmem [resolvable:$false] %s4561_s13 }
  0xc5   : > { %s4563_s17 = scalar_lea.vmem %s4562_s13, 512  ;;  %p4564_p13 = scmp.lt.s32.totalorder %s5083_s27, %s4562_s13 }
  0xc6   : > { %p4559_p7 = pnand %p4557_p6, %p4973_p9  ;;  %p4565_p5 = scmp.lt.s32.totalorder %s4563_s17, %s4556_s15 }
  0xc8   : > { %p4560_p1 = pneg %p4559_p7  ;;  %p4566_p12 = por %p4565_p5, %p4564_p13 }
  0xca   : > { %p4567_p2 = pnand %p4566_p12, %p4560_p1 }
  0xcc   : > { %4570 = shalt.err (!%p4567_p2)
}
  0xcd   : > { %s5797_s29 = smov 64   ;;  %s5798_s3 = smov 4  }
  0xce   : > { %4201 = dma.hbm_to_vmem [thread:$0]  (!%p5839_p10), %s5079_s24, 256, %s5083_s27, %s4967_s8, %s5797_s29, %s5797_s29, %s5798_s3  }
  0xcf   : > { %s5842_s11 = sld [smem:[#allocation33_spill]]  ;;  %s678_s18 = scalar_lea.vmem [#allocation12], %s4922_s1 }
  0xd0   : > { %s685_s13 = sshll.u32 %s678_s18, 4  ;;  %s686_s13 = int_to_ptr.vmem [resolvable:$true] %s685_s13 }
  0xd5   : > { %s5114_s15 = scalar_lea.hbm %s5842_s11, %s4956_s21  ;;  %s4576_s24 = scalar_lea.hbm %s5842_s11, 32 }
  0xd6   : > { %s4571_s17 = scalar_lea.hbm %s5114_s15, 16  ;;  %p4577_p0 = scmp.lt.u32.totalorder %s5114_s15, %s5842_s11 }
  0xd7   : > { %p4572_p3 = scmp.ne.s32.totalorder %s5114_s15, %s4571_s17  ;;  %p4578_p11 = scmp.lt.u32.totalorder %s4576_s24, %s4571_s17 }
  0xd8   : > { %p4580_p7 = scmp.lt.u32.totalorder %s4571_s17, %s5114_s15 }
  0xd9   : > { %p4574_p4 = pnand %p4572_p3, %p4973_p9  ;;  %p4579_p6 = por %p4578_p11, %p4577_p0 }
  0xdb   : > { %p4575_p8 = pneg %p4574_p4  ;;  %p4581_p1 = por %p4580_p7, %p4579_p6 }
  0xdd   : > { %p4582_p13 = pnand %p4581_p1, %p4575_p8 }
  0xdf   : > { %4585 = shalt.err (!%p4582_p13)
}
  0xe0   : > { %s4586_s21 = scalar_lea.vmem %s686_s13, 16  ;;  %s4743_s22 = smov [#allocation12]  }
  0xe1   : > { %p4587_p5 = scmp.ne.s32.totalorder %s686_s13, %s4586_s21  ;;  %s4591_s18 = sshll.u32 %s4743_s22, 4  ;;  %s4592_s18 = int_to_ptr.vmem [resolvable:$false] %s4591_s18 }
  0xe2   : > { %s4593_s5 = scalar_lea.vmem %s4592_s18, 32  ;;  %p4594_p3 = scmp.lt.s32.totalorder %s686_s13, %s4592_s18 }
  0xe3   : > { %p4589_p12 = pnand %p4587_p5, %p4973_p9  ;;  %p4595_p4 = scmp.lt.s32.totalorder %s4593_s5, %s4586_s21 }
  0xe5   : > { %p4590_p2 = pneg %p4589_p12  ;;  %p4596_p10 = por %p4595_p4, %p4594_p3 }
  0xe7   : > { %p4597_p0 = pnand %p4596_p10, %p4590_p2 }
  0xe9   : > { %4600 = shalt.err (!%p4597_p0)
}
  0xea   : > { %p5843_p11 = scmp.ne.s32.totalorder %s5829_s20, 0  ;;  %s4744_s16 = smov [#allocation5]  }
  0xeb   : > { %s540_s17 = sshll.u32 %s4744_s16, 4  ;;  %s5844_s24 = sshll.u32 %s4731_s30, 8  ;;  %s541_s17 = int_to_ptr.vmem [resolvable:$true] %s540_s17 }
  0xec   : > { %4204 = dma.hbm_to_vmem [thread:$0]  (!%p5843_p11), %s5114_s15, 16, %s686_s13, %s4967_s8  }
  0xed   : > { %s5845_s14 = sld [smem:[#allocation36_spill]]  ;;  %s5846_s5 = sld [smem:[#allocation23_spill]] }
  0xee   : > { %p5847_p8 = scmp.ne.s32.totalorder %s5828_s26, 0 }
  0xf0   : > { %p5848_p6 = pneg %p5847_p8 }
  0xf3   : > { %s5140_s22 = scalar_lea.hbm %s5845_s14, %s5844_s24  ;;  %s4601_s29 = scalar_lea.hbm %s5846_s5, 256 }
  0xf4   : > { %p4602_p10 = scmp.ne.s32.totalorder %s5846_s5, %s4601_s29  ;;  %p4608_p13 = scmp.lt.u32.totalorder %s4601_s29, %s5846_s5 }
  0xf6   : > { %p4604_p7 = pnand %p4602_p10, %p5848_p6 }
  0xf8   : > { %p4605_p1 = pneg %p4604_p7 }
  0xfa   : > { %p4610_p5 = pnand %p4608_p13, %p4605_p1 }
  0xfc   : > { %4613 = shalt.err (!%p4610_p5)
}
  0xfd   : > { %s4614_s30 = scalar_lea.vmem %s541_s17, 256  ;;  %p5849_p2 = pmov %p5848_p6 }
  0xfe   : > { %p4615_p12 = scmp.ne.s32.totalorder %s541_s17, %s4614_s30  ;;  %p4622_p0 = scmp.lt.s32.totalorder %s541_s17, %s541_s17 }
  0xff   : > { %p4623_p11 = scmp.lt.s32.totalorder %s4614_s30, %s4614_s30 }
 0x100   : > { %p4617_p3 = pnand %p4615_p12, %p5849_p2 }
 0x101   : > { %p4624_p9 = por %p4623_p11, %p4622_p0 }
 0x102   : > { %p4618_p4 = pneg %p4617_p3 }
 0x104   : > { %p4625_p6 = pnand %p4624_p9, %p4618_p4 }
 0x106   : > { %4628 = shalt.err (!%p4625_p6)
}
 0x107   : > { %s5850_s7 = smov 8   ;;  %s5851_s3 = smov 128  }
 0x108   : > { %4185 = dma.hbm_to_vmem [thread:$0]  (!%p5847_p8), %s5846_s5, 256, %s541_s17, [#allocation6], %s5851_s3, %s5851_s3, %s5850_s7  }
 0x109   : > { %s5852_s24 = sshll.u32 %s4922_s1, 4  ;;  %s4629_s21 = scalar_lea.hbm %s5140_s22, 256 }
 0x10a   : > { %s710_s27 = scalar_lea.vmem [#allocation13], %s5852_s24  ;;  %p4630_p9 = scmp.ne.s32.totalorder %s5140_s22, %s4629_s21 }
 0x10b   : > { %s717_s12 = sshll.u32 %s710_s27, 4  ;;  %p5853_p11 = scmp.ne.s32.totalorder %s5833_s25, 0  ;;  %s5167_s12 = int_to_ptr.vmem [resolvable:$true] %s717_s12 }
 0x10c   : > { %s4634_s15 = scalar_lea.hbm %s5845_s14, 512  ;;  %p4635_p1 = scmp.lt.u32.totalorder %s5140_s22, %s5845_s14 }
 0x10d   : > { %p4632_p10 = pnand %p4630_p9, %p5853_p11  ;;  %p4636_p13 = scmp.lt.u32.totalorder %s4634_s15, %s4629_s21 }
 0x10e   : > { %p4638_p5 = scmp.lt.u32.totalorder %s4629_s21, %s5140_s22 }
 0x10f   : > { %p4633_p7 = pneg %p4632_p10  ;;  %p4637_p8 = por %p4636_p13, %p4635_p1 }
 0x111   : > { %p4639_p12 = por %p4638_p5, %p4637_p8 }
 0x113   : > { %p4640_p2 = pnand %p4639_p12, %p4633_p7 }
 0x115   : > { %4643 = shalt.err (!%p4640_p2)
}
 0x116   : > { %s4644_s1 = scalar_lea.vmem %s5167_s12, 256  ;;  %s4745_s17 = smov [#allocation13]  }
 0x117   : > { %p4645_p3 = scmp.ne.s32.totalorder %s5167_s12, %s4644_s1  ;;  %s4649_s7 = sshll.u32 %s4745_s17, 4  ;;  %s4650_s7 = int_to_ptr.vmem [resolvable:$false] %s4649_s7 }
 0x118   : > { %s4651_s3 = scalar_lea.vmem %s4650_s7, 512  ;;  %p4652_p6 = scmp.lt.s32.totalorder %s5167_s12, %s4650_s7 }
 0x119   : > { %p4647_p4 = pnand %p4645_p3, %p5853_p11  ;;  %p4653_p9 = scmp.lt.s32.totalorder %s4651_s3, %s4644_s1 }
 0x11b   : > { %p4648_p0 = pneg %p4647_p4  ;;  %p4654_p10 = por %p4653_p9, %p4652_p6 }
 0x11d   : > { %p4655_p1 = pnand %p4654_p10, %p4648_p0 }
 0x11f   : > { %4658 = shalt.err (!%p4655_p1)
}
 0x120   : > { %p5854_p7 = scmp.ne.s32.totalorder %s5829_s20, 0  ;;  %s5855_s29 = smov 4  }
 0x121   : > { %s5856_s16 = smov 64   ;;  %p5857_p11 = scmp.ne.s32.totalorder %s5827_s23, 0 }
 0x122   : > { %4207 = dma.hbm_to_vmem [thread:$0]  (!%p5854_p7), %s5140_s22, 256, %s5167_s12, %s4967_s8, %s5856_s16, %s5856_s16, %s5855_s29  }
 0x123   : > { %749 = sbr.rel (%p5857_p11) target bundleno = 7682 (0x1e02), region = 92  ;;  %p5858_p13 = scmp.eq.s32.totalorder (!%p5857_p11), %s4878_s0, 0 }
 0x12a   : > { %4702 = dma.done.wait (%p5858_p13), [#allocation3], 256   ;;  %p5859_p8 = pmov %p5858_p13 }
 0x12c   : > { %4704 = vsyncadd (%p5859_p8), [#allocation3], 4294967040  ;;  %p5860_p5 = pmov %p5859_p8 }
 0x12e   : > { %4706 = dma.done.wait (%p5860_p5), [#allocation6], 256   ;;  %p5861_p12 = pmov %p5860_p5 }
 0x12f   : > { %s759_s20 = sand.u32 1, %s4878_s0   ;;  %s5206_s8 = sand.u32 1, %s4723_s28  }
 0x130   : > { %4708 = vsyncadd (%p5861_p12), [#allocation6], 4294967040  ;;  %s760_s23 = scalar_lea.sflag [#allocation3], %s759_s20  ;;  %p5862_p2 = scmp.ne.s32.totalorder %s5826_s2, 0 }
 0x132   : > { %4710 = dma.done.wait (%p5862_p2), %s760_s23, 592  }
 0x133   : > { %4712 = vsyncadd (%p5862_p2), %s760_s23, 4294966704  ;;  %s3726_s22 = sshll.u32 %s5206_s8, 4  ;;  %p924_p3 = scmp.lt.s32.totalorder %s4878_s0, 1 }
 0x134   : > { %s5863_s26 = sld [smem:[#allocation24_spill]]  ;;  %s5864_s4 = sld [smem:[#allocation26_spill]] }
 0x135   : > { %s5216_s24 = scalar_select %p924_p3, %s4878_s0, 1 }
 0x136   : > { %s5865_s6 = sld [smem:[#allocation28_spill]]  ;;  %s5866_s16 = sld [smem:[#allocation30_spill]] }
 0x137   : > { %s3809_s27 = sshll.u32 %s5216_s24, 4  ;;  %s3736_s12 = sshll.u32 %s5216_s24, 2 }
 0x138   : > { %s5867_s5 = sld [smem:[#allocation34_spill]]  ;;  %s5868_s15 = sld [smem:[#allocation35_spill]] }
 0x139   : > { %s5869_s1 = sld [smem:[#allocation37_spill]]  ;;  %s5870_s3 = sld [smem:[#allocation38_spill]] }
 0x13a   : > { %s928_s18 = scalar_lea.vmem %s5863_s26, %s3809_s27  ;;  %s5226_s30 = scalar_lea.vmem %s5864_s4, %s3809_s27 }
 0x13b   : > { %s5871_s25 = sld [smem:[#allocation39_spill]]  ;;  %s770_s23 = scalar_lea.vmem [#allocation8], %s5206_s8 }
 0x13c   : > { %s5231_s7 = scalar_lea.vmem %s5865_s6, %s3809_s27  ;;  %s5236_s20 = scalar_lea.vmem %s5866_s16, %s3809_s27 }
 0x13d   : > { %s3813_s6 = sshll.u32 %s5216_s24, 5  ;;  %s778_s14 = scalar_lea.vmem [#allocation9], %s5206_s8 }
 0x13e   : > { %s5241_s2 = scalar_lea.vmem %s5867_s5, %s3736_s12  ;;  %s5246_s13 = scalar_lea.vmem %s5868_s15, %s3736_s12 }
 0x13f   : > { %s954_s17 = scalar_lea.vmem %s5869_s1, %s5216_s24  ;;  %s5256_s27 = scalar_lea.vmem %s5870_s3, %s3813_s6 }
 0x140   : > { %s786_s19 = scalar_lea.vmem [#allocation10], %s5206_s8  ;;  %s5265_s21 = scalar_lea.vmem [#allocation11], %s3726_s22 }
 0x141   : > { %s962_s5 = scalar_lea.vmem %s5871_s25, %s5216_s24  ;;  %s803_s12 = scalar_lea.vmem [#allocation12], %s5206_s8 }
 0x142   : > { %s5268_s26 = scalar_lea.vmem [#allocation13], %s3726_s22  ;;  %p5872_p4 = scmp.ne.s32.totalorder %s4878_s0, 0 }
 0x143   : > { %v968_v0 = vld [vmem:[#allocation2] sm:$0xff] (!%p5872_p4)  ;;  %vm970_vm0 = vcmask (!%p5872_p4), 261120   ;;  %v969_v1 = vld [vmem:[#allocation2 + $0x8] sm:$0xff] (!%p5872_p4) }
 0x144   : > { %967 = sbr.rel (%p5872_p4) target bundleno = 331 (0x14b), region = 132  ;;  %971 = vst.msk [vmem:[#allocation14] sm:$0xff] (!%p5872_p4), %vm970_vm0, %v968_v0  ;;  %972 = vst.msk [vmem:[#allocation14 + $0x8] sm:$0xff] (!%p5872_p4), %vm970_vm0, %v969_v1 }
 0x14b PF: > { %v4301_v2 = vld [vmem:[%s928_s18] sm:$0xff]   ;;  %v4746_v3 = vmov 0.0   ;;  %v4302_v4 = vld [vmem:[%s928_s18 + $0x8] sm:$0xff]   ;;  %vm4747_vm1 = vmmov 0   ;;  %v5278_v6 = vld [vmem:[#allocation14 + $0x8] sm:$0xff]  ;;  %vm1003_vm2 = vcmask 261120  }
 0x14c   : > { %3901 = vmatprep.subr.bf16.mxu1 %v4746_v3  ;;  %3915 = vmatprep.subr.bf16.mxu0 %v4746_v3  ;;  %v5276_v5 = vld [vmem:[#allocation14] sm:$0xff]  ;;  %s5873_s4 = scalar_lea.vmem [#allocation7], %s5206_s8  ;;  %s4748_s6 = smov 96   ;;  %vm1053_vm3 = vcmask 64512   ;;  %vm1178_vm4 = vcmask 1043456   ;;  %vm1956_vm5 = vcmask 130048  }
 0x14d   : > { %3902 = vmatpush3.bf16.msra.mxu1 %v4301_v2  ;;  %3905 = vmatprep.mubr.msk.bf16.mxu1 %vm4747_vm1, %v4746_v3  ;;  %v979_v7 = vpack.c.bf16 %v5278_v6, %v5276_v5  ;;  %v3741_v8 = vld [vmem:[%s5873_s4] ss:$0 sm:$0xff]  ;;  %s4749_s9 = smov 64   ;;  %s4750_s10 = smov 88   ;;  %vm1959_vm6 = vcmask 195584   ;;  %vm3335_vm7 = vcmask 523264  }
 0x14e   : > { %3903 = vmatprep.subr.bf16.mxu1 %v4746_v3  ;;  %3917 = vmatprep.mubr.msk.bf16.mxu0 %vm4747_vm1, %v4746_v3  ;;  %s4751_s11 = smov 120   ;;  %s4752_s22 = smov 56  }
 0x14f   : > { %s4753_s18 = smov 80   ;;  %s4754_s15 = smov 112  }
 0x150   : > { %s4755_s1 = smov 48   ;;  %s4756_s3 = smov 72  }
 0x151   : > { %3904 = vmatpush3.bf16.msra.mxu1 %v4302_v4  ;;  %s4757_s29 = smov 104   ;;  %s4758_s16 = smov 40  }
 0x152   : > { %3909 = vmatprep.subr.bf16.mxu1 %v4746_v3  ;;  %s4759_s25 = smov 8   ;;  %s4760_s4 = smov 16  }
 0x153   : > { %s4762_s24 = smov [#allocation14]   ;;  %p4213_p0 = scmp.eq.s32.totalorder %s4878_s0, 1 }
 0x154   : > { %3906 = vmatmul.mubr.msk.bf16.vlgmr.msra.gmra.mrb[0].mxu1 %vm1003_vm2, %v979_v7 }
 0x155   : > { %3911 = vmatprep.mubr.msk.bf16.mxu1 %vm4747_vm1, %v4746_v3 }
 0x227   : > { %v1041_v9 = vpop.f32.mrb[0].mxu1 }
 0x228   : > { %v1042_v10 = vadd.f32 %v3741_v8, %v1041_v9  ;;  %v3907_v11 = vpop.f32.mrb[1].mxu1 }
 0x229   : > { %v1044_v12 = vpop.f32.mrb[2].mxu1 }
 0x22a   : > { %v5291_v13 = vpack.c.bf16 %v1042_v10, %v1042_v10  ;;  %v1045_v14 = vadd.f32 %v3741_v8, %v1044_v12  ;;  %v3908_v15 = vpop.f32.mrb[3].mxu1 }
 0x22c   : > { %1051 = vrot.lane.b32.xlu0 %v5291_v13, %s4748_s6  ;;  %v5295_v16 = vpack.c.bf16 %v1045_v14, %v1045_v14 }
 0x230   : > { %1101 = vrot.lane.b32.xlu0 %v5295_v16, %s4748_s6 }
 0x29e   : > { %v1052_v17 = vpop.permute.xlu0 %1051 }
 0x29f   : > { %v1058_v18 = vsel %vm1053_vm3, %v1052_v17, 0 }
 0x2a0   : > { %3910 = vmatpush3.bf16.xpose.msra.mxu1 %v1058_v18 }
 0x2a1   : > { %3921 = vmatprep.subr.bf16.mxu1 %v4746_v3 }
 0x2a2   : > { %v1102_v19 = vpop.permute.xlu0 %1101 }
 0x2a3   : > { %v1107_v20 = vsel %vm1053_vm3, %v1102_v19, 0 }
 0x2a4   : > { %3916 = vmatpush3.bf16.xpose.msra.mxu0 %v1107_v20 }
 0x2a5   : > { %3927 = vmatprep.subr.bf16.mxu0 %v4746_v3 }
 0x2a7   : > { %3912 = vmatmul.mubr.msk.bf16.vlgmr.msra.gmra.mrb[4].mxu1 %vm1053_vm3, %v5291_v13 }
 0x2a8   : > { %3923 = vmatprep.mubr.msk.bf16.mxu1 %vm4747_vm1, %v4746_v3 }
 0x2ab   : > { %3918 = vmatmul.mubr.msk.bf16.vlgmr.msra.gmra.mrb[0].mxu0 %vm1053_vm3, %v5295_v16 }
 0x2ac   : > { %3929 = vmatprep.mubr.msk.bf16.mxu0 %vm4747_vm1, %v4746_v3 }
 0x37a   : > { %v1094_v21 = vpop.f32.mrb[4].mxu1 }
 0x37b   : > { %v3913_v22 = vpop.f32.mrb[5].mxu1  ;;  %v1149_v23 = vsel %vm1053_vm3, %v1094_v21, -inf }
 0x37c   : > { %1150 = vmax.xlane.f32.xlu1 %v1149_v23  ;;  %v1097_v24 = vpop.f32.mrb[6].mxu1 }
 0x37d   : > { %v3914_v25 = vpop.f32.mrb[7].mxu1 }
 0x37e   : > { %v1143_v26 = vpop.f32.mrb[0].mxu0 }
 0x37f   : > { %v3919_v27 = vpop.f32.mrb[1].mxu0  ;;  %v1152_v28 = vsel %vm1053_vm3, %v1143_v26, -inf }
 0x380   : > { %v1146_v29 = vpop.f32.mrb[2].mxu0  ;;  %1153 = vmax.xlane.f32.xlu1 %v1152_v28 }
 0x381   : > { %v3920_v30 = vpop.f32.mrb[3].mxu0 }
 0x391   : > { %1173 = vrot.lane.b32.xlu1 %v5291_v13, %s4749_s9 }
 0x395   : > { %1222 = vrot.lane.b32.xlu1 %v5295_v16, %s4749_s9  ;;  %s4761_s9 = smov 24  }
 0x399   : > { %1272 = vrot.lane.b32.xlu1 %v5291_v13, %s4750_s10 }
 0x409   : > { %v1151_v31 = vpop.xlane.xlu1 %1150 }
 0x40a   : > { %v1155_v32 = vsub.f32 %v1094_v21, %v1151_v31 }
 0x40c   : > { %v1157_v33 = vmul.f32 1.442695, %v1155_v32 }
 0x40d   : > { %v1154_v34 = vpop.xlane.xlu1 %1153 }
 0x40e   : > { %4317 = vpow2.f32 %v1157_v33  ;;  %v1156_v35 = vsub.f32 %v1143_v26, %v1154_v34 }
 0x410   : > { %v1159_v36 = vmul.f32 1.442695, %v1156_v35 }
 0x411   : > { %v1174_v37 = vpop.permute.xlu1 %1173 }
 0x412   : > { %4319 = vpow2.f32 %v1159_v36  ;;  %v1180_v38 = vsel %vm1178_vm4, %v1174_v37, 0 }
 0x413   : > { %3922 = vmatpush3.bf16.msra.mxu1 %v1180_v38 }
 0x414   : > { %3933 = vmatprep.subr.bf16.mxu1 %v4746_v3 }
 0x415   : > { %v1223_v39 = vpop.permute.xlu1 %1222 }
 0x416   : > { %v1228_v40 = vsel %vm1178_vm4, %v1223_v39, 0 }
 0x417   : > { %3928 = vmatpush3.bf16.msra.mxu0 %v1228_v40 }
 0x418   : > { %v4318_v41 = vpop.eup %4317  ;;  %3939 = vmatprep.subr.bf16.mxu0 %v4746_v3 }
 0x419   : > { %v1161_v42 = vsel %vm1053_vm3, %v4318_v41, 0.0  ;;  %v1273_v45 = vpop.permute.xlu1 %1272 }
 0x41a   : > { %1162 = vadd.xlane.f32.xlu0 %v1161_v42  ;;  %v1278_v52 = vsel %vm1053_vm3, %v1273_v45, 0 }
 0x41c   : > { %v4320_v43 = vpop.eup %4319 }
 0x41d   : > { %v1164_v44 = vsel %vm1053_vm3, %v4320_v43, 0.0 }
 0x41e   : > { %1165 = vadd.xlane.f32.xlu1 %v1164_v44 }
 0x42f   : > { %1322 = vrot.lane.b32.xlu1 %v5295_v16, %s4750_s10 }
 0x430   : > { %1270 = vrot.lane.b32.xlu0 %v5291_v13, %s4751_s11 }
 0x433   : > { %1320 = vrot.lane.b32.xlu1 %v5295_v16, %s4751_s11 }
 0x4a7   : > { %v1163_v46 = vpop.xlane.xlu0 %1162 }
 0x4a8   : > { %4321 = vrcp.f32 %v1163_v46 }
 0x4ab   : > { %v1166_v47 = vpop.xlane.xlu1 %1165  ;;  %v1271_v57 = vpop.permute.xlu0 %1270 }
 0x4ac   : > { %4323 = vrcp.f32 %v1166_v47 }
 0x4af   : > { %v1323_v54 = vpop.permute.xlu1 %1322 }
 0x4b0   : > { %v1328_v56 = vsel %vm1053_vm3, %v1323_v54, 0 }
 0x4b2   : > { %v4322_v48 = vpop.eup %4321 }
 0x4b3   : > { %v1169_v49 = vmul.f32 %v4322_v48, %v4318_v41  ;;  %v1321_v58 = vpop.permute.xlu1 %1320 }
 0x4b5   : > { %v1171_v50 = vpack.c.bf16 %v1169_v49, %v1169_v49 }
 0x4b6   : > { %v4324_v51 = vpop.eup %4323 }
 0x4b7   : > { %v1170_v53 = vmul.f32 %v4324_v51, %v4320_v43  ;;  %3924 = vmatmul.mubr.msk.bf16.vlgmr.msra.gmra.mrb[8].mxu1 %vm1053_vm3, %v1171_v50 }
 0x4b8   : > { %3934 = vmatpush3.bf16.xpose.msra.mxu1 %v1278_v52  ;;  %3935 = vmatprep.mubr.msk.bf16.mxu1 %vm4747_vm1, %v4746_v3 }
 0x4b9   : > { %v1172_v55 = vpack.c.bf16 %v1170_v53, %v1170_v53  ;;  %3945 = vmatprep.subr.bf16.mxu1 %v4746_v3 }
 0x4bb   : > { %3930 = vmatmul.mubr.msk.bf16.vlgmr.msra.gmra.mrb[4].mxu0 %vm1053_vm3, %v1172_v55 }
 0x4bc   : > { %3940 = vmatpush3.bf16.xpose.msra.mxu0 %v1328_v56  ;;  %3941 = vmatprep.mubr.msk.bf16.mxu0 %vm4747_vm1, %v4746_v3 }
 0x4bd   : > { %3951 = vmatprep.subr.bf16.mxu0 %v4746_v3 }
 0x4bf   : > { %3936 = vmatmul.mubr.msk.bf16.vlgmr.msra.gmra.mrb[12].mxu1 %vm1053_vm3, %v1271_v57 }
 0x4c0   : > { %3947 = vmatprep.mubr.msk.bf16.mxu1 %vm4747_vm1, %v4746_v3 }
 0x4c3   : > { %3942 = vmatmul.mubr.msk.bf16.vlgmr.msra.gmra.mrb[8].mxu0 %vm1053_vm3, %v1321_v58 }
 0x4c4   : > { %3953 = vmatprep.mubr.msk.bf16.mxu0 %vm4747_vm1, %v4746_v3 }
 0x58a   : > { %v5345_v59 = vpop.f32.mrb[8].mxu1 }
 0x58b   : > { %v3925_v60 = vpop.f32.mrb[9].mxu1 }
 0x58c   : > { %v1219_v61 = vpop.f32.mrb[10].mxu1 }
 0x58d   : > { %v3926_v62 = vpop.f32.mrb[11].mxu1 }
 0x58e   : > { %v5347_v63 = vpop.f32.mrb[4].mxu0 }
 0x58f   : > { %v3931_v0 = vpop.f32.mrb[5].mxu0 }
 0x590   : > { %v1267_v1 = vpop.f32.mrb[6].mxu0 }
 0x591   : > { %v3932_v2 = vpop.f32.mrb[7].mxu0 }
 0x592   : > { %v1314_v4 = vpop.f32.mrb[12].mxu1 }
 0x593   : > { %v3937_v7 = vpop.f32.mrb[13].mxu1  ;;  %v1370_v8 = vsel %vm1053_vm3, %v1314_v4, -inf }
 0x594   : > { %1371 = vmax.xlane.f32.xlu1 %v1370_v8  ;;  %v1317_v9 = vpop.f32.mrb[14].mxu1 }
 0x595   : > { %v3938_v10 = vpop.f32.mrb[15].mxu1 }
 0x596   : > { %v1364_v11 = vpop.f32.mrb[8].mxu0 }
 0x597   : > { %v3943_v12 = vpop.f32.mrb[9].mxu0  ;;  %v1373_v14 = vsel %vm1053_vm3, %v1364_v11, -inf }
 0x598   : > { %1374 = vmax.xlane.f32.xlu0 %v1373_v14  ;;  %v1367_v15 = vpop.f32.mrb[10].mxu0 }
 0x599   : > { %v3944_v17 = vpop.f32.mrb[11].mxu0 }
 0x5a5   : > { %1394 = vrot.lane.b32.xlu1 %v5291_v13, %s4752_s22 }
 0x5a9   : > { %1492 = vrot.lane.b32.xlu1 %v5291_v13, %s4753_s18 }
 0x5ae   : > { %1442 = vrot.lane.b32.xlu0 %v5295_v16, %s4752_s22 }
 0x5b2   : > { %1490 = vrot.lane.b32.xlu0 %v5291_v13, %s4754_s15 }
 0x621   : > { %v1372_v18 = vpop.xlane.xlu1 %1371 }
 0x622   : > { %v1376_v19 = vsub.f32 %v1314_v4, %v1372_v18 }
 0x624   : > { %v1378_v20 = vmul.f32 1.442695, %v1376_v19 }
 0x625   : > { %v1375_v21 = vpop.xlane.xlu0 %1374  ;;  %v1395_v22 = vpop.permute.xlu1 %1394 }
 0x626   : > { %4325 = vpow2.f32 %v1378_v20  ;;  %v1377_v23 = vsub.f32 %v1364_v11, %v1375_v21  ;;  %v1400_v24 = vsel %vm1178_vm4, %v1395_v22, 0 }
 0x627   : > { %3946 = vmatpush3.bf16.msra.mxu1 %v1400_v24 }
 0x628   : > { %v1380_v25 = vmul.f32 1.442695, %v1377_v23  ;;  %3957 = vmatprep.subr.bf16.mxu1 %v4746_v3 }
 0x629   : > { %v1443_v26 = vpop.permute.xlu0 %1442  ;;  %v1493_v32 = vpop.permute.xlu1 %1492 }
 0x62a   : > { %4327 = vpow2.f32 %v1380_v25  ;;  %v1448_v27 = vsel %vm1178_vm4, %v1443_v26, 0  ;;  %v1498_v39 = vsel %vm1053_vm3, %v1493_v32, 0 }
 0x62b   : > { %3952 = vmatpush3.bf16.msra.mxu0 %v1448_v27 }
 0x62c   : > { %3963 = vmatprep.subr.bf16.mxu0 %v4746_v3 }
 0x62d   : > { %v1491_v44 = vpop.permute.xlu0 %1490 }
 0x630   : > { %v4326_v28 = vpop.eup %4325 }
 0x631   : > { %v1382_v29 = vsel %vm1053_vm3, %v4326_v28, 0.0 }
 0x632   : > { %1383 = vadd.xlane.f32.xlu1 %v1382_v29 }
 0x634   : > { %v4328_v30 = vpop.eup %4327 }
 0x635   : > { %v1385_v31 = vsel %vm1053_vm3, %v4328_v30, 0.0 }
 0x636   : > { %1386 = vadd.xlane.f32.xlu1 %v1385_v31 }
 0x647   : > { %1542 = vrot.lane.b32.xlu1 %v5295_v16, %s4753_s18 }
 0x64b   : > { %1540 = vrot.lane.b32.xlu1 %v5295_v16, %s4754_s15 }
 0x6bf   : > { %v1384_v33 = vpop.xlane.xlu1 %1383 }
 0x6c0   : > { %4329 = vrcp.f32 %v1384_v33 }
 0x6c3   : > { %v1387_v34 = vpop.xlane.xlu1 %1386 }
 0x6c4   : > { %4331 = vrcp.f32 %v1387_v34 }
 0x6c7   : > { %v1543_v41 = vpop.permute.xlu1 %1542 }
 0x6c8   : > { %v1548_v43 = vsel %vm1053_vm3, %v1543_v41, 0 }
 0x6ca   : > { %v4330_v35 = vpop.eup %4329 }
 0x6cb   : > { %v1390_v36 = vmul.f32 %v4330_v35, %v4326_v28  ;;  %v1541_v45 = vpop.permute.xlu1 %1540 }
 0x6cd   : > { %v1392_v37 = vpack.c.bf16 %v1390_v36, %v1390_v36 }
 0x6ce   : > { %v4332_v38 = vpop.eup %4331 }
 0x6cf   : > { %v1391_v40 = vmul.f32 %v4332_v38, %v4328_v30  ;;  %3948 = vmatmul.mubr.msk.bf16.vlgmr.msra.gmra.mrb[16].mxu1 %vm1053_vm3, %v1392_v37 }
 0x6d0   : > { %3958 = vmatpush3.bf16.xpose.msra.mxu1 %v1498_v39  ;;  %3959 = vmatprep.mubr.msk.bf16.mxu1 %vm4747_vm1, %v4746_v3 }
 0x6d1   : > { %v1393_v42 = vpack.c.bf16 %v1391_v40, %v1391_v40  ;;  %3969 = vmatprep.subr.bf16.mxu1 %v4746_v3 }
 0x6d3   : > { %3954 = vmatmul.mubr.msk.bf16.vlgmr.msra.gmra.mrb[12].mxu0 %vm1053_vm3, %v1393_v42 }
 0x6d4   : > { %3964 = vmatpush3.bf16.xpose.msra.mxu0 %v1548_v43  ;;  %3965 = vmatprep.mubr.msk.bf16.mxu0 %vm4747_vm1, %v4746_v3 }
 0x6d5   : > { %3975 = vmatprep.subr.bf16.mxu0 %v4746_v3 }
 0x6d7   : > { %3960 = vmatmul.mubr.msk.bf16.vlgmr.msra.gmra.mrb[20].mxu1 %vm1053_vm3, %v1491_v44 }
 0x6d8   : > { %3971 = vmatprep.mubr.msk.bf16.mxu1 %vm4747_vm1, %v4746_v3 }
 0x6db   : > { %3966 = vmatmul.mubr.msk.bf16.vlgmr.msra.gmra.mrb[16].mxu0 %vm1053_vm3, %v1541_v45 }
 0x6dc   : > { %3977 = vmatprep.mubr.msk.bf16.mxu0 %vm4747_vm1, %v4746_v3 }
 0x7a2   : > { %v5383_v46 = vpop.f32.mrb[16].mxu1 }
 0x7a3   : > { %v3949_v47 = vpop.f32.mrb[17].mxu1 }
 0x7a4   : > { %v1439_v48 = vpop.f32.mrb[18].mxu1 }
 0x7a5   : > { %v3950_v49 = vpop.f32.mrb[19].mxu1 }
 0x7a6   : > { %v5385_v50 = vpop.f32.mrb[12].mxu0 }
 0x7a7   : > { %v4271_v51 = vpack.i.bf16 %v5385_v50, %v5383_v46  ;;  %v3955_v52 = vpop.f32.mrb[13].mxu0 }
 0x7a8   : > { %v1487_v53 = vpop.f32.mrb[14].mxu0 }
 0x7a9   : > { %v3956_v54 = vpop.f32.mrb[15].mxu0 }
 0x7aa   : > { %v1534_v55 = vpop.f32.mrb[20].mxu1 }
 0x7ab   : > { %v3961_v56 = vpop.f32.mrb[21].mxu1  ;;  %v1590_v57 = vsel %vm1053_vm3, %v1534_v55, -inf }
 0x7ac   : > { %1591 = vmax.xlane.f32.xlu0 %v1590_v57  ;;  %v1537_v58 = vpop.f32.mrb[22].mxu1 }
 0x7ad   : > { %v3962_v60 = vpop.f32.mrb[23].mxu1 }
 0x7ae   : > { %v1584_v61 = vpop.f32.mrb[16].mxu0 }
 0x7af   : > { %v3967_v62 = vpop.f32.mrb[17].mxu0  ;;  %v1593_v0 = vsel %vm1053_vm3, %v1584_v61, -inf }
 0x7b0   : > { %1594 = vmax.xlane.f32.xlu1 %v1593_v0  ;;  %v1587_v1 = vpop.f32.mrb[18].mxu0 }
 0x7b1   : > { %v3968_v2 = vpop.f32.mrb[19].mxu0 }
 0x7c1   : > { %1614 = vrot.lane.b32.xlu1 %v5291_v13, %s4755_s1 }
 0x7c5   : > { %1712 = vrot.lane.b32.xlu1 %v5291_v13, %s4756_s3 }
 0x7c9   : > { %1762 = vrot.lane.b32.xlu1 %v5295_v16, %s4756_s3 }
 0x7cd   : > { %1760 = vrot.lane.b32.xlu1 %v5295_v16, %s4757_s29 }
 0x839   : > { %v1592_v4 = vpop.xlane.xlu0 %1591 }
 0x83a   : > { %v1596_v7 = vsub.f32 %v1534_v55, %v1592_v4 }
 0x83c   : > { %v1598_v8 = vmul.f32 1.442695, %v1596_v7 }
 0x83d   : > { %v1595_v9 = vpop.xlane.xlu1 %1594 }
 0x83e   : > { %4333 = vpow2.f32 %v1598_v8  ;;  %v1597_v10 = vsub.f32 %v1584_v61, %v1595_v9 }
 0x840   : > { %v1600_v11 = vmul.f32 1.442695, %v1597_v10 }
 0x841   : > { %v1615_v12 = vpop.permute.xlu1 %1614 }
 0x842   : > { %4335 = vpow2.f32 %v1600_v11  ;;  %v1620_v14 = vsel %vm1178_vm4, %v1615_v12, 0 }
 0x843   : > { %3970 = vmatpush3.bf16.msra.mxu1 %v1620_v14 }
 0x844   : > { %3981 = vmatprep.subr.bf16.mxu1 %v4746_v3 }
 0x845   : > { %v1713_v25 = vpop.permute.xlu1 %1712 }
 0x846   : > { %v1718_v29 = vsel %vm1053_vm3, %v1713_v25, 0 }
 0x848   : > { %v4334_v15 = vpop.eup %4333 }
 0x849   : > { %v1602_v17 = vsel %vm1053_vm3, %v4334_v15, 0.0  ;;  %v1763_v31 = vpop.permute.xlu1 %1762 }
 0x84a   : > { %1603 = vadd.xlane.f32.xlu0 %v1602_v17  ;;  %v1768_v33 = vsel %vm1053_vm3, %v1763_v31, 0 }
 0x84c   : > { %v4336_v18 = vpop.eup %4335 }
 0x84d   : > { %v1605_v19 = vsel %vm1053_vm3, %v4336_v18, 0.0  ;;  %v1761_v35 = vpop.permute.xlu1 %1760 }
 0x84e   : > { %1606 = vadd.xlane.f32.xlu0 %v1605_v19  ;;  %v4304_v19 = vld [vmem:[%s5226_s30 + $0x8] sm:$0xff]  }
 0x864   : > { %1662 = vrot.lane.b32.xlu0 %v5295_v16, %s4755_s1 }
 0x868   : > { %1710 = vrot.lane.b32.xlu0 %v5291_v13, %s4757_s29 }
 0x8d7   : > { %v1604_v20 = vpop.xlane.xlu0 %1603 }
 0x8d8   : > { %4337 = vrcp.f32 %v1604_v20 }
 0x8db   : > { %v1607_v21 = vpop.xlane.xlu0 %1606 }
 0x8dc   : > { %4339 = vrcp.f32 %v1607_v21 }
 0x8df   : > { %v1663_v22 = vpop.permute.xlu0 %1662 }
 0x8e0   : > { %v1668_v23 = vsel %vm1178_vm4, %v1663_v22, 0 }
 0x8e1   : > { %3976 = vmatpush3.bf16.msra.mxu0 %v1668_v23 }
 0x8e2   : > { %v4338_v24 = vpop.eup %4337  ;;  %3987 = vmatprep.subr.bf16.mxu0 %v4746_v3 }
 0x8e3   : > { %v1610_v26 = vmul.f32 %v4338_v24, %v4334_v15  ;;  %v1711_v34 = vpop.permute.xlu0 %1710 }
 0x8e5   : > { %v1612_v27 = vpack.c.bf16 %v1610_v26, %v1610_v26 }
 0x8e6   : > { %v4340_v28 = vpop.eup %4339 }
 0x8e7   : > { %v1611_v30 = vmul.f32 %v4340_v28, %v4336_v18  ;;  %3972 = vmatmul.mubr.msk.bf16.vlgmr.msra.gmra.mrb[24].mxu1 %vm1053_vm3, %v1612_v27  ;;  %v4303_v18 = vld [vmem:[%s5226_s30] sm:$0xff]  }
 0x8e8   : > { %3982 = vmatpush3.bf16.xpose.msra.mxu1 %v1718_v29  ;;  %3983 = vmatprep.mubr.msk.bf16.mxu1 %vm4747_vm1, %v4746_v3 }
 0x8e9   : > { %v1613_v32 = vpack.c.bf16 %v1611_v30, %v1611_v30  ;;  %3993 = vmatprep.subr.bf16.mxu1 %v4746_v3 }
 0x8eb   : > { %3978 = vmatmul.mubr.msk.bf16.vlgmr.msra.gmra.mrb[20].mxu0 %vm1053_vm3, %v1613_v32 }
 0x8ec   : > { %3988 = vmatpush3.bf16.xpose.msra.mxu0 %v1768_v33  ;;  %3989 = vmatprep.mubr.msk.bf16.mxu0 %vm4747_vm1, %v4746_v3 }
 0x8ed   : > { %3999 = vmatprep.subr.bf16.mxu0 %v4746_v3 }
 0x8ef   : > { %3984 = vmatmul.mubr.msk.bf16.vlgmr.msra.gmra.mrb[28].mxu1 %vm1053_vm3, %v1711_v34 }
 0x8f0   : > { %3995 = vmatprep.mubr.msk.bf16.mxu1 %vm4747_vm1, %v4746_v3 }
 0x8f3   : > { %3990 = vmatmul.mubr.msk.bf16.vlgmr.msra.gmra.mrb[24].mxu0 %vm1053_vm3, %v1761_v35 }
 0x8f4   : > { %4001 = vmatprep.mubr.msk.bf16.mxu0 %vm4747_vm1, %v4746_v3 }
 0x9ba   : > { %v1656_v36 = vpop.f32.mrb[24].mxu1 }
 0x9bb   : > { %v3973_v37 = vpop.f32.mrb[25].mxu1 }
 0x9bc   : > { %v1659_v38 = vpop.f32.mrb[26].mxu1 }
 0x9bd   : > { %v3974_v39 = vpop.f32.mrb[27].mxu1 }
 0x9be   : > { %v1704_v40 = vpop.f32.mrb[20].mxu0 }
 0x9bf   : > { %v4276_v41 = vpack.i.bf16 %v1704_v40, %v1656_v36  ;;  %v3979_v42 = vpop.f32.mrb[21].mxu0 }
 0x9c0   : > { %v1707_v43 = vpop.f32.mrb[22].mxu0 }
 0x9c1   : > { %v3980_v44 = vpop.f32.mrb[23].mxu0 }
 0x9c2   : > { %v1754_v45 = vpop.f32.mrb[28].mxu1 }
 0x9c3   : > { %v3985_v47 = vpop.f32.mrb[29].mxu1  ;;  %v1810_v48 = vsel %vm1053_vm3, %v1754_v45, -inf }
 0x9c4   : > { %1811 = vmax.xlane.f32.xlu0 %v1810_v48  ;;  %v1757_v49 = vpop.f32.mrb[30].mxu1 }
 0x9c5   : > { %v3986_v52 = vpop.f32.mrb[31].mxu1 }
 0x9c6   : > { %v1804_v53 = vpop.f32.mrb[24].mxu0 }
 0x9c7   : > { %v3991_v54 = vpop.f32.mrb[25].mxu0  ;;  %v1813_v55 = vsel %vm1053_vm3, %v1804_v53, -inf }
 0x9c8   : > { %1814 = vmax.xlane.f32.xlu1 %v1813_v55  ;;  %v1807_v56 = vpop.f32.mrb[26].mxu0 }
 0x9c9   : > { %v3992_v57 = vpop.f32.mrb[27].mxu0 }
 0x9d9   : > { %1834 = vrot.lane.b32.xlu1 %v5291_v13, %s4758_s16 }
 0x9dd   : > { %4272 = vrot.lane.b32.xlu1 %v4271_v51, %s4759_s25 }
 0x9e1   : > { %4277 = vrot.lane.b32.xlu1 %v4276_v41, %s4760_s4 }
 0xa51   : > { %v1812_v58 = vpop.xlane.xlu0 %1811 }
 0xa52   : > { %v1816_v60 = vsub.f32 %v1754_v45, %v1812_v58 }
 0xa54   : > { %v1818_v61 = vmul.f32 1.442695, %v1816_v60 }
 0xa55   : > { %v1815_v62 = vpop.xlane.xlu1 %1814 }
 0xa56   : > { %4341 = vpow2.f32 %v1818_v61  ;;  %v1817_v0 = vsub.f32 %v1804_v53, %v1815_v62 }
 0xa58   : > { %v1820_v1 = vmul.f32 1.442695, %v1817_v0 }
 0xa59   : > { %v1835_v2 = vpop.permute.xlu1 %1834 }
 0xa5a   : > { %4343 = vpow2.f32 %v1820_v1  ;;  %v1840_v13 = vsel %vm1178_vm4, %v1835_v2, 0 }
 0xa5b   : > { %3994 = vmatpush3.bf16.msra.mxu1 %v1840_v13  ;;  %v4305_v13 = vld [vmem:[%s5236_s20] sm:$0xff]  }
 0xa5c   : > { %4005 = vmatprep.subr.bf16.mxu1 %v4746_v3 }
 0xa5d   : > { %v4273_v29 = vpop.permute.xlu1 %4272 }
 0xa5e   : > { %v4275_v31 = vunpack.i.h.bf16 %v4273_v29  ;;  %v4274_v32 = vunpack.i.l.bf16 %v4273_v29 }
 0xa60   : > { %v4342_v4 = vpop.eup %4341  ;;  %v1955_v36 = vsel %vm1053_vm3, %v5347_v63, %v4275_v31  ;;  %v1954_v37 = vsel %vm1053_vm3, %v5345_v59, %v4274_v32  ;;  %v3761_v63 = vld [vmem:[%s770_s23] ss:$0 sm:$0xff] }
 0xa61   : > { %v1822_v46 = vsel %vm1053_vm3, %v4342_v4, 0.0  ;;  %v4278_v30 = vpop.permute.xlu1 %4277  ;;  %v3769_v32 = vld [vmem:[%s786_s19] ss:$0 sm:$0xff] }
 0xa62   : > { %1823 = vadd.xlane.f32.xlu0 %v1822_v46  ;;  %v4280_v33 = vunpack.i.h.bf16 %v4278_v30  ;;  %v4279_v34 = vunpack.i.l.bf16 %v4278_v30  ;;  %v975_v46 = vld [vmem:[#allocation5] sm:$0xff] }
 0xa64   : > { %v4344_v50 = vpop.eup %4343  ;;  %v1958_v40 = vsel %vm1956_vm5, %v1955_v36, %v4280_v33  ;;  %v1957_v41 = vsel %vm1956_vm5, %v1954_v37, %v4279_v34 }
 0xa65   : > { %v1825_v51 = vsel %vm1053_vm3, %v4344_v50, 0.0 }
 0xa66   : > { %1826 = vadd.xlane.f32.xlu0 %v1825_v51 }
 0xa7c   : > { %1882 = vrot.lane.b32.xlu0 %v5295_v16, %s4758_s16 }
 0xaef   : > { %v1824_v7 = vpop.xlane.xlu0 %1823 }
 0xaf0   : > { %4345 = vrcp.f32 %v1824_v7  ;;  %v4307_v7 = vld [vmem:[%s5231_s7] sm:$0xff]  }
 0xaf3   : > { %v1827_v8 = vpop.xlane.xlu0 %1826 }
 0xaf4   : > { %4347 = vrcp.f32 %v1827_v8  ;;  %v4308_v8 = vld [vmem:[%s5231_s7 + $0x8] sm:$0xff]  }
 0xaf7   : > { %v1883_v9 = vpop.permute.xlu0 %1882 }
 0xaf8   : > { %v1888_v10 = vsel %vm1178_vm4, %v1883_v9, 0 }
 0xaf9   : > { %4000 = vmatpush3.bf16.msra.mxu0 %v1888_v10 }
 0xafa   : > { %v4346_v11 = vpop.eup %4345  ;;  %4013 = vmatprep.subr.bf16.mxu0 %v4746_v3 }
 0xafb   : > { %v1830_v12 = vmul.f32 %v4346_v11, %v4342_v4  ;;  %v4306_v4 = vld [vmem:[%s5236_s20 + $0x8] sm:$0xff]   ;;  %v2059_v11 = vlaneseq }
 0xafd   : > { %v1832_v14 = vpack.c.bf16 %v1830_v12, %v1830_v12 }
 0xafe   : > { %v4348_v15 = vpop.eup %4347 }
 0xaff   : > { %v1831_v17 = vmul.f32 %v4348_v15, %v4344_v50  ;;  %3996 = vmatmul.mubr.msk.bf16.vlgmr.msra.gmra.mrb[32].mxu1 %vm1053_vm3, %v1832_v14  ;;  %v976_v50 = vld [vmem:[#allocation5 + $0x8] sm:$0xff] }
 0xb00   : > { %4009 = vmatprep.mubr.msk.bf16.mxu1 %vm4747_vm1, %v4746_v3  ;;  %4006 = vmatpush3.bf16.msra.mxu1 %v4303_v18  ;;  %v2139_v51 = vpack.c.bf16 %v976_v50, %v975_v46 }
 0xb01   : > { %v1833_v16 = vpack.c.bf16 %v1831_v17, %v1831_v17  ;;  %4007 = vmatprep.subr.bf16.mxu1 %v4746_v3 }
 0xb03   : > { %4002 = vmatmul.mubr.msk.bf16.vlgmr.msra.gmra.mrb[28].mxu0 %vm1053_vm3, %v1833_v16  ;;  %v5479_v16 = vshrl.u32 %v2059_v11, 7 }
 0xb04   : > { %4017 = vmatprep.mubr.msk.bf16.mxu0 %vm4747_vm1, %v4746_v3  ;;  %4008 = vmatpush3.bf16.msra.mxu1 %v4304_v19  ;;  %v5483_v19 = vld [vmem:[%s5241_s2] sm:$0x7]  ;;  %s3428_s2 = sshll.u32 %s4762_s24, 4  ;;  %s3429_s2 = int_to_ptr.vmem [resolvable:$true] %s3428_s2 }
 0xb05   : > { %4021 = vmatprep.subr.bf16.mxu1 %v4746_v3  ;;  %4014 = vmatpush3.bf16.msra.mxu0 %v4307_v7  ;;  %v2061_v18 = vsub.s32 0, %v5479_v16  ;;  %p4666_p1 = scmp.lt.s32.totalorder %s3429_s2, %s3429_s2 }
 0xb06   : > { %4015 = vmatprep.subr.bf16.mxu0 %v4746_v3 }
 0xb09   : > { %4016 = vmatpush3.bf16.msra.mxu0 %v4308_v8 }
 0xb0a   : > { %4029 = vmatprep.subr.bf16.mxu0 %v4746_v3 }
 0xbd2   : > { %v1876_v20 = vpop.f32.mrb[32].mxu1 }
 0xbd3   : > { %v3997_v21 = vpop.f32.mrb[33].mxu1 }
 0xbd4   : > { %v1879_v22 = vpop.f32.mrb[34].mxu1 }
 0xbd5   : > { %v3998_v23 = vpop.f32.mrb[35].mxu1  ;;  %v5487_v22 = vld [vmem:[%s5246_s13] sm:$0x7]  ;;  %s4659_s13 = scalar_lea.vmem %s3429_s2, 256 }
 0xbd6   : > { %v1924_v24 = vpop.f32.mrb[28].mxu0  ;;  %p4660_p6 = scmp.ne.s32.totalorder %s3429_s2, %s4659_s13  ;;  %p4667_p7 = scmp.lt.s32.totalorder %s4659_s13, %s4659_s13 }
 0xbd7   : > { %v4281_v25 = vpack.i.bf16 %v1924_v24, %v1876_v20  ;;  %v4003_v26 = vpop.f32.mrb[29].mxu0  ;;  %v2062_v20 = vrot.slane %v5483_v19, %v2061_v18 }
 0xbd8   : > { %v1927_v27 = vpop.f32.mrb[30].mxu0  ;;  %p4661_p9 = pnand %p4660_p6, %p4213_p0  ;;  %p4668_p11 = por %p4667_p7, %p4666_p1 }
 0xbd9   : > { %v4004_v28 = vpop.f32.mrb[31].mxu0  ;;  %4282 = vrot.lane.b32.xlu0 %v4281_v25, %s4761_s9  ;;  %v2068_v27 = vrot.slane %v5487_v22, %v2061_v18 }
 0xbda   : > { %p4662_p10 = pneg %p4661_p9 }
 0xbdc   : > { %p4669_p13 = pnand %p4668_p11, %p4662_p10 }
 0xc4b   : > { %v4283_v35 = vpop.permute.xlu0 %4282 }
 0xc4c   : > { %v4285_v38 = vunpack.i.h.bf16 %v4283_v35  ;;  %v4284_v39 = vunpack.i.l.bf16 %v4283_v35 }
 0xc4e   : > { %v1961_v42 = vsel %vm1959_vm6, %v1958_v40, %v4285_v38  ;;  %v1960_v43 = vsel %vm1959_vm6, %v1957_v41, %v4284_v39 }
 0xc4f   : > { %v1962_v44 = vpack.c.bf16 %v1961_v42, %v1960_v43  ;;  %v3765_v43 = vld [vmem:[%s778_s14] ss:$0 sm:$0xff] }
 0xc51   : > { %4010 = vmatmul.mubr.msk.bf16.vlgmr.msra.gmra.mrb[36].mxu1 %vm1003_vm2, %v1962_v44 }
 0xc52   : > { %4025 = vmatprep.mubr.msk.bf16.mxu1 %vm4747_vm1, %v4746_v3  ;;  %4022 = vmatpush3.bf16.msra.mxu1 %v4305_v13 }
 0xc53   : > { %4023 = vmatprep.subr.bf16.mxu1 %v4746_v3 }
 0xc56   : > { %4024 = vmatpush3.bf16.msra.mxu1 %v4306_v4 }
 0xc57   : > { %4035 = vmatprep.subr.bf16.mxu1 %v4746_v3 }
 0xc59   : > { %4026 = vmatmul.mubr.msk.bf16.vlgmr.msra.gmra.mrb[40].mxu1 %vm1003_vm2, %v2139_v51 }
 0xc5a   : > { %4037 = vmatprep.mubr.msk.bf16.mxu1 %vm4747_vm1, %v4746_v3 }
 0xd24   : > { %v2023_v45 = vpop.f32.mrb[36].mxu1 }
 0xd25   : > { %v2024_v59 = vadd.f32 %v3761_v63, %v2023_v45  ;;  %v4011_v47 = vpop.f32.mrb[37].mxu1 }
 0xd26   : > { %v2026_v48 = vpop.f32.mrb[38].mxu1 }
 0xd27   : > { %v2027_v49 = vadd.f32 %v3761_v63, %v2026_v48  ;;  %v4012_v52 = vpop.f32.mrb[39].mxu1  ;;  %v2030_v53 = vadd.f32 %v2024_v59, %v5276_v5 }
 0xd29   : > { %v2032_v54 = vsel %vm1003_vm2, %v2030_v53, 0.0  ;;  %v2031_v55 = vadd.f32 %v2027_v49, %v5278_v6 }
 0xd2a   : > { %2033 = vadd.xlane.f32.xlu1 %v2032_v54 }
 0xd2b   : > { %v2035_v56 = vsel %vm1003_vm2, %v2031_v55, 0.0 }
 0xd2c   : > { %2036 = vadd.xlane.f32.xlu0 %v2035_v56  ;;  %v2200_v33 = vpop.f32.mrb[40].mxu1 }
 0xd2d   : > { %v2201_v34 = vadd.f32 %v3769_v32, %v2200_v33  ;;  %v4027_v35 = vpop.f32.mrb[41].mxu1 }
 0xd2e   : > { %v2203_v36 = vpop.f32.mrb[42].mxu1 }
 0xd2f   : > { %v5501_v37 = vpack.c.bf16 %v2201_v34, %v2201_v34  ;;  %v2204_v38 = vadd.f32 %v3769_v32, %v2203_v36  ;;  %v4028_v39 = vpop.f32.mrb[43].mxu1 }
 0xd31   : > { %v5503_v40 = vpack.c.bf16 %v2204_v38, %v2204_v38  ;;  %v2215_v41 = vsel %vm1053_vm3, %v5501_v37, 0 }
 0xd33   : > { %v2261_v42 = vsel %vm1053_vm3, %v5503_v40, 0 }
 0xd34   : > { %4036 = vmatpush3.bf16.xpose.msra.mxu1 %v2261_v42 }
 0xd35   : > { %4047 = vmatprep.subr.bf16.mxu1 %v4746_v3 }
 0xdb7   : > { %v2034_v57 = vpop.xlane.xlu1 %2033 }
 0xdb8   : > { %v2039_v58 = vmul.f32 0.03125, %v2034_v57 }
 0xdb9   : > { %v2037_v60 = vpop.xlane.xlu0 %2036 }
 0xdba   : > { %v2041_v61 = vsub.f32 %v2030_v53, %v2039_v58  ;;  %v2040_v62 = vmul.f32 0.03125, %v2037_v60 }
 0xdbc   : > { %v2042_v0 = vsub.f32 %v2031_v55, %v2040_v62  ;;  %v2043_v1 = vmul.f32 %v2041_v61, %v2041_v61 }
 0xdbe   : > { %v2045_v2 = vsel %vm1003_vm2, %v2043_v1, 0.0  ;;  %v2044_v5 = vmul.f32 %v2042_v0, %v2042_v0 }
 0xdbf   : > { %2046 = vadd.xlane.f32.xlu0 %v2045_v2 }
 0xdc0   : > { %v2048_v6 = vsel %vm1003_vm2, %v2044_v5, 0.0 }
 0xdc1   : > { %2049 = vadd.xlane.f32.xlu1 %v2048_v6 }
 0xe4c   : > { %v2047_v9 = vpop.xlane.xlu0 %2046 }
 0xe4d   : > { %v2051_v10 = vmul.f32 0.03125, %v2047_v9 }
 0xe4e   : > { %v2050_v12 = vpop.xlane.xlu1 %2049 }
 0xe4f   : > { %v2053_v14 = vadd.f32 1e-05, %v2051_v10  ;;  %v2052_v15 = vmul.f32 0.03125, %v2050_v12 }
 0xe51   : > { %4349 = vrsqrt.f32 %v2053_v14  ;;  %v2054_v17 = vadd.f32 1e-05, %v2052_v15 }
 0xe53   : > { %4351 = vrsqrt.f32 %v2054_v17 }
 0xe5b   : > { %v4350_v21 = vpop.eup %4349 }
 0xe5c   : > { %v2057_v23 = vmul.f32 %v4350_v21, %v2041_v61 }
 0xe5d   : > { %v4352_v24 = vpop.eup %4351 }
 0xe5e   : > { %v2063_v25 = vmul.f32 %v2062_v20, %v2057_v23  ;;  %v2058_v26 = vmul.f32 %v4352_v24, %v2042_v0 }
 0xe60   : > { %v2064_v28 = vmul.f32 %v2062_v20, %v2058_v26  ;;  %v5490_v29 = vadd.f32 %v2068_v27, %v2063_v25 }
 0xe62   : > { %v5492_v30 = vadd.f32 %v2068_v27, %v2064_v28 }
 0xe64   : > { %v2071_v31 = vpack.c.bf16 %v5492_v30, %v5490_v29 }
 0xe66   : > { %4018 = vmatmul.mubr.msk.bf16.vlgmr.msra.gmra.mrb[32].mxu0 %vm1003_vm2, %v2071_v31 }
 0xe67   : > { %4031 = vmatprep.mubr.msk.bf16.mxu0 %vm4747_vm1, %v4746_v3  ;;  %4030 = vmatpush3.bf16.xpose.msra.mxu0 %v2215_v41 }
 0xe68   : > { %4041 = vmatprep.subr.bf16.mxu0 %v4746_v3 }
 0xf39   : > { %v2132_v44 = vpop.f32.mrb[32].mxu0 }
 0xf3a   : > { %v2133_v63 = vadd.f32 %v3765_v43, %v2132_v44  ;;  %v4019_v45 = vpop.f32.mrb[33].mxu0 }
 0xf3b   : > { %v2135_v59 = vpop.f32.mrb[34].mxu0 }
 0xf3c   : > { %v5513_v47 = vpack.c.bf16 %v2133_v63, %v2133_v63  ;;  %v2136_v48 = vadd.f32 %v3765_v43, %v2135_v59  ;;  %v4020_v49 = vpop.f32.mrb[35].mxu0 }
 0xf3e   : > { %v5515_v52 = vpack.c.bf16 %v2136_v48, %v2136_v48  ;;  %4032 = vmatmul.mubr.msk.bf16.vlgmr.msra.gmra.mrb[36].mxu0 %vm1053_vm3, %v5513_v47 }
 0xf3f   : > { %4043 = vmatprep.mubr.msk.bf16.mxu0 %vm4747_vm1, %v4746_v3 }
 0xf40   : > { %4038 = vmatmul.mubr.msk.bf16.vlgmr.msra.gmra.mrb[44].mxu1 %vm1053_vm3, %v5515_v52 }
 0xf41   : > { %4049 = vmatprep.mubr.msk.bf16.mxu1 %vm4747_vm1, %v4746_v3 }
0x1011   : > { %v2251_v53 = vpop.f32.mrb[36].mxu0 }
0x1012   : > { %v4033_v54 = vpop.f32.mrb[37].mxu0  ;;  %v2303_v55 = vsel %vm1053_vm3, %v2251_v53, -inf }
0x1013   : > { %2304 = vmax.xlane.f32.xlu0 %v2303_v55  ;;  %v2254_v56 = vpop.f32.mrb[38].mxu0  ;;  %v2297_v57 = vpop.f32.mrb[44].mxu1 }
0x1014   : > { %v4034_v58 = vpop.f32.mrb[39].mxu0  ;;  %v4039_v60 = vpop.f32.mrb[45].mxu1  ;;  %v2306_v61 = vsel %vm1053_vm3, %v2297_v57, -inf }
0x1015   : > { %2307 = vmax.xlane.f32.xlu1 %v2306_v61  ;;  %v2300_v62 = vpop.f32.mrb[46].mxu1 }
0x1016   : > { %v4040_v0 = vpop.f32.mrb[47].mxu1 }
0x1026   : > { %2377 = vrot.lane.b32.xlu1 %v5503_v40, %s4748_s6 }
0x1029   : > { %2328 = vrot.lane.b32.xlu0 %v5501_v37, %s4748_s6 }
0x10a0   : > { %v2305_v1 = vpop.xlane.xlu0 %2304 }
0x10a1   : > { %v2309_v2 = vsub.f32 %v2251_v53, %v2305_v1 }
0x10a2   : > { %v2308_v5 = vpop.xlane.xlu1 %2307 }
0x10a3   : > { %v2311_v6 = vmul.f32 1.442695, %v2309_v2  ;;  %v2310_v13 = vsub.f32 %v2297_v57, %v2308_v5 }
0x10a4   : > { %v2329_v4 = vpop.permute.xlu0 %2328 }
0x10a5   : > { %4353 = vpow2.f32 %v2311_v6  ;;  %v2313_v46 = vmul.f32 1.442695, %v2310_v13  ;;  %v2334_v50 = vsel %vm1178_vm4, %v2329_v4, 0 }
0x10a6   : > { %4042 = vmatpush3.bf16.msra.mxu0 %v2334_v50  ;;  %v2378_v51 = vpop.permute.xlu1 %2377 }
0x10a7   : > { %4355 = vpow2.f32 %v2313_v46  ;;  %v2383_v7 = vsel %vm1178_vm4, %v2378_v51, 0  ;;  %4053 = vmatprep.subr.bf16.mxu0 %v4746_v3 }
0x10a8   : > { %4048 = vmatpush3.bf16.msra.mxu1 %v2383_v7 }
0x10a9   : > { %4059 = vmatprep.subr.bf16.mxu1 %v4746_v3 }
0x10af   : > { %v4354_v8 = vpop.eup %4353 }
0x10b0   : > { %v2315_v9 = vsel %vm1053_vm3, %v4354_v8, 0.0 }
0x10b1   : > { %v4356_v10 = vpop.eup %4355  ;;  %2316 = vadd.xlane.f32.xlu0 %v2315_v9 }
0x10b2   : > { %v2318_v11 = vsel %vm1053_vm3, %v4356_v10, 0.0 }
0x10b3   : > { %2319 = vadd.xlane.f32.xlu1 %v2318_v11 }
0x10c4   : > { %2428 = vrot.lane.b32.xlu1 %v5501_v37, %s4751_s11 }
0x10c7   : > { %2479 = vrot.lane.b32.xlu0 %v5503_v40, %s4751_s11 }
0x10c8   : > { %2426 = vrot.lane.b32.xlu1 %v5513_v47, %s4751_s11 }
0x10cb   : > { %2477 = vrot.lane.b32.xlu0 %v5515_v52, %s4751_s11 }
0x113e   : > { %v2317_v12 = vpop.xlane.xlu0 %2316 }
0x113f   : > { %4357 = vrcp.f32 %v2317_v12 }
0x1140   : > { %v2320_v14 = vpop.xlane.xlu1 %2319 }
0x1141   : > { %4359 = vrcp.f32 %v2320_v14 }
0x1142   : > { %v2480_v24 = vpop.permute.xlu0 %2479 }
0x1143   : > { %v2485_v27 = vsel %vm1053_vm3, %v2480_v24, 0 }
0x1144   : > { %v2429_v20 = vpop.permute.xlu1 %2428 }
0x1145   : > { %v2434_v25 = vsel %vm1053_vm3, %v2429_v20, 0 }
0x1146   : > { %v2478_v31 = vpop.permute.xlu0 %2477 }
0x1148   : > { %v2427_v28 = vpop.permute.xlu1 %2426 }
0x1149   : > { %v4358_v15 = vpop.eup %4357 }
0x114a   : > { %v2323_v17 = vmul.f32 %v4358_v15, %v4354_v8 }
0x114b   : > { %v4360_v18 = vpop.eup %4359 }
0x114c   : > { %v2324_v21 = vmul.f32 %v4360_v18, %v4356_v10  ;;  %v2325_v23 = vpack.c.bf16 %v2323_v17, %v2323_v17 }
0x114e   : > { %4044 = vmatmul.mubr.msk.bf16.vlgmr.msra.gmra.mrb[40].mxu0 %vm1053_vm3, %v2325_v23  ;;  %v2326_v26 = vpack.c.bf16 %v2324_v21, %v2324_v21 }
0x114f   : > { %4054 = vmatpush3.bf16.xpose.msra.mxu0 %v2434_v25  ;;  %4055 = vmatprep.mubr.msk.bf16.mxu0 %vm4747_vm1, %v4746_v3 }
0x1150   : > { %4050 = vmatmul.mubr.msk.bf16.vlgmr.msra.gmra.mrb[48].mxu1 %vm1053_vm3, %v2326_v26  ;;  %4065 = vmatprep.subr.bf16.mxu0 %v4746_v3 }
0x1151   : > { %4060 = vmatpush3.bf16.xpose.msra.mxu1 %v2485_v27  ;;  %4061 = vmatprep.mubr.msk.bf16.mxu1 %vm4747_vm1, %v4746_v3 }
0x1152   : > { %4071 = vmatprep.subr.bf16.mxu1 %v4746_v3 }
0x1156   : > { %4056 = vmatmul.mubr.msk.bf16.vlgmr.msra.gmra.mrb[44].mxu0 %vm1053_vm3, %v2427_v28 }
0x1157   : > { %4067 = vmatprep.mubr.msk.bf16.mxu0 %vm4747_vm1, %v4746_v3 }
0x1158   : > { %4062 = vmatmul.mubr.msk.bf16.vlgmr.msra.gmra.mrb[52].mxu1 %vm1053_vm3, %v2478_v31 }
0x1159   : > { %4073 = vmatprep.mubr.msk.bf16.mxu1 %vm4747_vm1, %v4746_v3 }
0x1221   : > { %v5561_v32 = vpop.f32.mrb[40].mxu0 }
0x1222   : > { %v4045_v33 = vpop.f32.mrb[41].mxu0 }
0x1223   : > { %v2373_v34 = vpop.f32.mrb[42].mxu0  ;;  %v5563_v35 = vpop.f32.mrb[48].mxu1 }
0x1224   : > { %v4046_v36 = vpop.f32.mrb[43].mxu0  ;;  %v4051_v38 = vpop.f32.mrb[49].mxu1 }
0x1225   : > { %v2422_v39 = vpop.f32.mrb[50].mxu1 }
0x1226   : > { %v4052_v41 = vpop.f32.mrb[51].mxu1 }
0x1229   : > { %v2470_v42 = vpop.f32.mrb[44].mxu0 }
0x122a   : > { %v4057_v43 = vpop.f32.mrb[45].mxu0  ;;  %v2527_v44 = vsel %vm1053_vm3, %v2470_v42, -inf }
0x122b   : > { %2528 = vmax.xlane.f32.xlu1 %v2527_v44  ;;  %v2473_v63 = vpop.f32.mrb[46].mxu0  ;;  %v2521_v45 = vpop.f32.mrb[52].mxu1 }
0x122c   : > { %v4058_v59 = vpop.f32.mrb[47].mxu0  ;;  %v4063_v48 = vpop.f32.mrb[53].mxu1  ;;  %v2530_v49 = vsel %vm1053_vm3, %v2521_v45, -inf }
0x122d   : > { %2531 = vmax.xlane.f32.xlu0 %v2530_v49  ;;  %v2524_v53 = vpop.f32.mrb[54].mxu1 }
0x122e   : > { %v4064_v54 = vpop.f32.mrb[55].mxu1 }
0x123c   : > { %2599 = vrot.lane.b32.xlu1 %v5503_v40, %s4750_s10 }
0x1243   : > { %2551 = vrot.lane.b32.xlu0 %v5501_v37, %s4750_s10 }
0x12b8   : > { %v2529_v55 = vpop.xlane.xlu1 %2528 }
0x12b9   : > { %v2533_v56 = vsub.f32 %v2470_v42, %v2529_v55 }
0x12ba   : > { %v2532_v57 = vpop.xlane.xlu0 %2531 }
0x12bb   : > { %v2535_v58 = vmul.f32 1.442695, %v2533_v56  ;;  %v2534_v60 = vsub.f32 %v2521_v45, %v2532_v57 }
0x12bc   : > { %v2600_v61 = vpop.permute.xlu1 %2599 }
0x12bd   : > { %4361 = vpow2.f32 %v2535_v58  ;;  %v2537_v62 = vmul.f32 1.442695, %v2534_v60  ;;  %v2605_v0 = vsel %vm1178_vm4, %v2600_v61, 0 }
0x12be   : > { %4072 = vmatpush3.bf16.msra.mxu1 %v2605_v0  ;;  %v2552_v1 = vpop.permute.xlu0 %2551 }
0x12bf   : > { %4363 = vpow2.f32 %v2537_v62  ;;  %v2557_v2 = vsel %vm1178_vm4, %v2552_v1, 0  ;;  %4083 = vmatprep.subr.bf16.mxu1 %v4746_v3 }
0x12c0   : > { %4066 = vmatpush3.bf16.msra.mxu0 %v2557_v2 }
0x12c1   : > { %4077 = vmatprep.subr.bf16.mxu0 %v4746_v3 }
0x12c7   : > { %v4362_v5 = vpop.eup %4361 }
0x12c8   : > { %v2539_v6 = vsel %vm1053_vm3, %v4362_v5, 0.0 }
0x12c9   : > { %v4364_v13 = vpop.eup %4363  ;;  %2540 = vadd.xlane.f32.xlu0 %v2539_v6 }
0x12ca   : > { %v2542_v4 = vsel %vm1053_vm3, %v4364_v13, 0.0 }
0x12cb   : > { %2543 = vadd.xlane.f32.xlu1 %v2542_v4 }
0x12dc   : > { %2649 = vrot.lane.b32.xlu1 %v5501_v37, %s4754_s15 }
0x12df   : > { %2699 = vrot.lane.b32.xlu0 %v5503_v40, %s4754_s15 }
0x12e0   : > { %2647 = vrot.lane.b32.xlu1 %v5513_v47, %s4754_s15 }
0x12e3   : > { %2697 = vrot.lane.b32.xlu0 %v5515_v52, %s4754_s15 }
0x1356   : > { %v2541_v46 = vpop.xlane.xlu0 %2540 }
0x1357   : > { %4365 = vrcp.f32 %v2541_v46 }
0x1358   : > { %v2544_v50 = vpop.xlane.xlu1 %2543 }
0x1359   : > { %4367 = vrcp.f32 %v2544_v50 }
0x135a   : > { %v2700_v12 = vpop.permute.xlu0 %2699 }
0x135b   : > { %v2705_v17 = vsel %vm1053_vm3, %v2700_v12, 0 }
0x135c   : > { %v2650_v9 = vpop.permute.xlu1 %2649 }
0x135d   : > { %v2655_v14 = vsel %vm1053_vm3, %v2650_v9, 0 }
0x135e   : > { %v2698_v20 = vpop.permute.xlu0 %2697 }
0x1360   : > { %v2648_v18 = vpop.permute.xlu1 %2647 }
0x1361   : > { %v4366_v51 = vpop.eup %4365 }
0x1362   : > { %v2547_v7 = vmul.f32 %v4366_v51, %v4362_v5 }
0x1363   : > { %v4368_v8 = vpop.eup %4367 }
0x1364   : > { %v2548_v10 = vmul.f32 %v4368_v8, %v4364_v13  ;;  %v2549_v11 = vpack.c.bf16 %v2547_v7, %v2547_v7 }
0x1366   : > { %4068 = vmatmul.mubr.msk.bf16.vlgmr.msra.gmra.mrb[48].mxu0 %vm1053_vm3, %v2549_v11  ;;  %v2550_v15 = vpack.c.bf16 %v2548_v10, %v2548_v10 }
0x1367   : > { %4078 = vmatpush3.bf16.xpose.msra.mxu0 %v2655_v14  ;;  %4079 = vmatprep.mubr.msk.bf16.mxu0 %vm4747_vm1, %v4746_v3 }
0x1368   : > { %4074 = vmatmul.mubr.msk.bf16.vlgmr.msra.gmra.mrb[56].mxu1 %vm1053_vm3, %v2550_v15  ;;  %4089 = vmatprep.subr.bf16.mxu0 %v4746_v3 }
0x1369   : > { %4084 = vmatpush3.bf16.xpose.msra.mxu1 %v2705_v17  ;;  %4085 = vmatprep.mubr.msk.bf16.mxu1 %vm4747_vm1, %v4746_v3 }
0x136a   : > { %4095 = vmatprep.subr.bf16.mxu1 %v4746_v3 }
0x136e   : > { %4080 = vmatmul.mubr.msk.bf16.vlgmr.msra.gmra.mrb[52].mxu0 %vm1053_vm3, %v2648_v18 }
0x136f   : > { %4091 = vmatprep.mubr.msk.bf16.mxu0 %vm4747_vm1, %v4746_v3 }
0x1370   : > { %4086 = vmatmul.mubr.msk.bf16.vlgmr.msra.gmra.mrb[60].mxu1 %vm1053_vm3, %v2698_v20 }
0x1371   : > { %4097 = vmatprep.mubr.msk.bf16.mxu1 %vm4747_vm1, %v4746_v3 }
0x1439   : > { %v5601_v21 = vpop.f32.mrb[48].mxu0 }
0x143a   : > { %v4069_v23 = vpop.f32.mrb[49].mxu0 }
0x143b   : > { %v2596_v24 = vpop.f32.mrb[50].mxu0  ;;  %v5603_v25 = vpop.f32.mrb[56].mxu1 }
0x143c   : > { %v4286_v26 = vpack.i.bf16 %v5603_v25, %v5601_v21  ;;  %v4070_v27 = vpop.f32.mrb[51].mxu0  ;;  %v4075_v28 = vpop.f32.mrb[57].mxu1 }
0x143d   : > { %v2644_v31 = vpop.f32.mrb[58].mxu1 }
0x143e   : > { %v4076_v33 = vpop.f32.mrb[59].mxu1 }
0x1441   : > { %v2691_v34 = vpop.f32.mrb[52].mxu0 }
0x1442   : > { %v4081_v36 = vpop.f32.mrb[53].mxu0  ;;  %v2747_v38 = vsel %vm1053_vm3, %v2691_v34, -inf }
0x1443   : > { %2748 = vmax.xlane.f32.xlu1 %v2747_v38  ;;  %v2694_v39 = vpop.f32.mrb[54].mxu0  ;;  %v2741_v41 = vpop.f32.mrb[60].mxu1 }
0x1444   : > { %v4082_v42 = vpop.f32.mrb[55].mxu0  ;;  %v4087_v43 = vpop.f32.mrb[61].mxu1  ;;  %v2750_v44 = vsel %vm1053_vm3, %v2741_v41, -inf }
0x1445   : > { %2751 = vmax.xlane.f32.xlu0 %v2750_v44  ;;  %v2744_v63 = vpop.f32.mrb[62].mxu1 }
0x1446   : > { %v4088_v45 = vpop.f32.mrb[63].mxu1 }
0x1454   : > { %2819 = vrot.lane.b32.xlu1 %v5503_v40, %s4753_s18 }
0x145b   : > { %2771 = vrot.lane.b32.xlu0 %v5501_v37, %s4753_s18 }
0x14d0   : > { %v2749_v59 = vpop.xlane.xlu1 %2748 }
0x14d1   : > { %v2753_v48 = vsub.f32 %v2691_v34, %v2749_v59 }
0x14d2   : > { %v2752_v49 = vpop.xlane.xlu0 %2751 }
0x14d3   : > { %v2755_v53 = vmul.f32 1.442695, %v2753_v48  ;;  %v2754_v54 = vsub.f32 %v2741_v41, %v2752_v49 }
0x14d4   : > { %v2820_v55 = vpop.permute.xlu1 %2819 }
0x14d5   : > { %4369 = vpow2.f32 %v2755_v53  ;;  %v2757_v56 = vmul.f32 1.442695, %v2754_v54  ;;  %v2825_v57 = vsel %vm1178_vm4, %v2820_v55, 0 }
0x14d6   : > { %4096 = vmatpush3.bf16.msra.mxu1 %v2825_v57  ;;  %v2772_v58 = vpop.permute.xlu0 %2771 }
0x14d7   : > { %4371 = vpow2.f32 %v2757_v56  ;;  %v2777_v60 = vsel %vm1178_vm4, %v2772_v58, 0  ;;  %4107 = vmatprep.subr.bf16.mxu1 %v4746_v3 }
0x14d8   : > { %4090 = vmatpush3.bf16.msra.mxu0 %v2777_v60 }
0x14d9   : > { %4101 = vmatprep.subr.bf16.mxu0 %v4746_v3 }
0x14df   : > { %v4370_v61 = vpop.eup %4369 }
0x14e0   : > { %v2759_v62 = vsel %vm1053_vm3, %v4370_v61, 0.0 }
0x14e1   : > { %v4372_v0 = vpop.eup %4371  ;;  %2760 = vadd.xlane.f32.xlu0 %v2759_v62 }
0x14e2   : > { %v2762_v1 = vsel %vm1053_vm3, %v4372_v0, 0.0 }
0x14e3   : > { %2763 = vadd.xlane.f32.xlu1 %v2762_v1  ;;  %v4309_v1 = vld [vmem:[%s5265_s21] sm:$0xff]  }
0x14f4   : > { %2869 = vrot.lane.b32.xlu1 %v5501_v37, %s4757_s29 }
0x14f7   : > { %2919 = vrot.lane.b32.xlu0 %v5503_v40, %s4757_s29 }
0x14f8   : > { %2867 = vrot.lane.b32.xlu1 %v5513_v47, %s4757_s29 }
0x14fb   : > { %2917 = vrot.lane.b32.xlu0 %v5515_v52, %s4757_s29 }
0x156e   : > { %v2761_v2 = vpop.xlane.xlu0 %2760 }
0x156f   : > { %4373 = vrcp.f32 %v2761_v2  ;;  %v4310_v2 = vld [vmem:[%s5265_s21 + $0x8] sm:$0xff]  }
0x1570   : > { %v2764_v5 = vpop.xlane.xlu1 %2763 }
0x1571   : > { %4375 = vrcp.f32 %v2764_v5 }
0x1572   : > { %v2920_v7 = vpop.permute.xlu0 %2919 }
0x1573   : > { %v2925_v47 = vsel %vm1053_vm3, %v2920_v7, 0 }
0x1574   : > { %v2870_v46 = vpop.permute.xlu1 %2869 }
0x1575   : > { %v2875_v8 = vsel %vm1053_vm3, %v2870_v46, 0 }
0x1576   : > { %v2918_v10 = vpop.permute.xlu0 %2917 }
0x1578   : > { %v2868_v52 = vpop.permute.xlu1 %2867 }
0x1579   : > { %v4374_v6 = vpop.eup %4373 }
0x157a   : > { %v2767_v13 = vmul.f32 %v4374_v6, %v4370_v61 }
0x157b   : > { %v4376_v4 = vpop.eup %4375 }
0x157c   : > { %v2768_v50 = vmul.f32 %v4376_v4, %v4372_v0  ;;  %v2769_v51 = vpack.c.bf16 %v2767_v13, %v2767_v13 }
0x157e   : > { %4092 = vmatmul.mubr.msk.bf16.vlgmr.msra.gmra.mrb[56].mxu0 %vm1053_vm3, %v2769_v51  ;;  %v2770_v9 = vpack.c.bf16 %v2768_v50, %v2768_v50 }
0x157f   : > { %4102 = vmatpush3.bf16.xpose.msra.mxu0 %v2875_v8  ;;  %4103 = vmatprep.mubr.msk.bf16.mxu0 %vm4747_vm1, %v4746_v3 }
0x1580   : > { %4098 = vmatmul.mubr.msk.bf16.vlgmr.msra.gmra.mrb[64].mxu1 %vm1053_vm3, %v2770_v9  ;;  %4113 = vmatprep.subr.bf16.mxu0 %v4746_v3 }
0x1581   : > { %4108 = vmatpush3.bf16.xpose.msra.mxu1 %v2925_v47  ;;  %4109 = vmatprep.mubr.msk.bf16.mxu1 %vm4747_vm1, %v4746_v3 }
0x1582   : > { %4119 = vmatprep.subr.bf16.mxu1 %v4746_v3 }
0x1586   : > { %4104 = vmatmul.mubr.msk.bf16.vlgmr.msra.gmra.mrb[60].mxu0 %vm1053_vm3, %v2868_v52 }
0x1587   : > { %4115 = vmatprep.mubr.msk.bf16.mxu0 %vm4747_vm1, %v4746_v3 }
0x1588   : > { %4110 = vmatmul.mubr.msk.bf16.vlgmr.msra.gmra.mrb[68].mxu1 %vm1053_vm3, %v2918_v10 }
0x1589   : > { %4121 = vmatprep.mubr.msk.bf16.mxu1 %vm4747_vm1, %v4746_v3 }
0x1651   : > { %v2813_v11 = vpop.f32.mrb[56].mxu0 }
0x1652   : > { %v4093_v12 = vpop.f32.mrb[57].mxu0 }
0x1653   : > { %v2816_v14 = vpop.f32.mrb[58].mxu0  ;;  %v2861_v15 = vpop.f32.mrb[64].mxu1 }
0x1654   : > { %v4291_v17 = vpack.i.bf16 %v2861_v15, %v2813_v11  ;;  %v4094_v18 = vpop.f32.mrb[59].mxu0  ;;  %v4099_v20 = vpop.f32.mrb[65].mxu1 }
0x1655   : > { %v2864_v23 = vpop.f32.mrb[66].mxu1 }
0x1656   : > { %v4100_v24 = vpop.f32.mrb[67].mxu1 }
0x1659   : > { %v2911_v27 = vpop.f32.mrb[60].mxu0 }
0x165a   : > { %v4105_v28 = vpop.f32.mrb[61].mxu0  ;;  %v2967_v31 = vsel %vm1053_vm3, %v2911_v27, -inf }
0x165b   : > { %2968 = vmax.xlane.f32.xlu1 %v2967_v31  ;;  %v2914_v33 = vpop.f32.mrb[62].mxu0  ;;  %v2961_v34 = vpop.f32.mrb[68].mxu1 }
0x165c   : > { %v4106_v36 = vpop.f32.mrb[63].mxu0  ;;  %v4111_v38 = vpop.f32.mrb[69].mxu1  ;;  %v2970_v39 = vsel %vm1053_vm3, %v2961_v34, -inf }
0x165d   : > { %2971 = vmax.xlane.f32.xlu0 %v2970_v39  ;;  %v2964_v41 = vpop.f32.mrb[70].mxu1 }
0x165e   : > { %v4112_v42 = vpop.f32.mrb[71].mxu1 }
0x16e8   : > { %v2969_v43 = vpop.xlane.xlu1 %2968 }
0x16e9   : > { %v2973_v44 = vsub.f32 %v2911_v27, %v2969_v43 }
0x16ea   : > { %v2972_v63 = vpop.xlane.xlu0 %2971 }
0x16eb   : > { %v2975_v45 = vmul.f32 1.442695, %v2973_v44  ;;  %v2974_v59 = vsub.f32 %v2961_v34, %v2972_v63 }
0x16ed   : > { %4377 = vpow2.f32 %v2975_v45  ;;  %v2977_v48 = vmul.f32 1.442695, %v2974_v59 }
0x16ef   : > { %4379 = vpow2.f32 %v2977_v48 }
0x16f7   : > { %v4378_v49 = vpop.eup %4377 }
0x16f8   : > { %v2979_v53 = vsel %vm1053_vm3, %v4378_v49, 0.0 }
0x16f9   : > { %v4380_v54 = vpop.eup %4379  ;;  %2980 = vadd.xlane.f32.xlu0 %v2979_v53 }
0x16fa   : > { %v2982_v55 = vsel %vm1053_vm3, %v4380_v54, 0.0 }
0x16fb   : > { %2983 = vadd.xlane.f32.xlu1 %v2982_v55 }
0x170c   : > { %3039 = vrot.lane.b32.xlu1 %v5503_v40, %s4756_s3 }
0x170f   : > { %2991 = vrot.lane.b32.xlu0 %v5501_v37, %s4756_s3 }
0x1710   : > { %4287 = vrot.lane.b32.xlu1 %v4286_v26, %s4759_s25 }
0x1713   : > { %4292 = vrot.lane.b32.xlu0 %v4291_v17, %s4760_s4 }
0x1786   : > { %v2981_v56 = vpop.xlane.xlu0 %2980 }
0x1787   : > { %4381 = vrcp.f32 %v2981_v56  ;;  %v4311_v56 = vld [vmem:[%s5268_s26] sm:$0xff]  }
0x1788   : > { %v2984_v57 = vpop.xlane.xlu1 %2983 }
0x1789   : > { %4383 = vrcp.f32 %v2984_v57  ;;  %v4312_v57 = vld [vmem:[%s5268_s26 + $0x8] sm:$0xff]  }
0x178a   : > { %v2992_v58 = vpop.permute.xlu0 %2991 }
0x178b   : > { %v2997_v60 = vsel %vm1178_vm4, %v2992_v58, 0  ;;  %v4313_v58 = vld [vmem:[%s5256_s27] sm:$0xff]  }
0x178c   : > { %v3040_v61 = vpop.permute.xlu1 %3039  ;;  %4114 = vmatpush3.bf16.msra.mxu0 %v2997_v60  ;;  %v4314_v60 = vld [vmem:[%s5256_s27 + $0x8] sm:$0xff]  }
0x178d   : > { %v3045_v40 = vsel %vm1178_vm4, %v3040_v61, 0  ;;  %4125 = vmatprep.subr.bf16.mxu0 %v4746_v3 }
0x178e   : > { %4120 = vmatpush3.bf16.msra.mxu1 %v3045_v40  ;;  %v4293_v10 = vpop.permute.xlu0 %4292 }
0x178f   : > { %4133 = vmatprep.subr.bf16.mxu1 %v4746_v3  ;;  %v4295_v14 = vunpack.i.h.bf16 %v4293_v10  ;;  %v4294_v15 = vunpack.i.l.bf16 %v4293_v10 }
0x1790   : > { %v4288_v9 = vpop.permute.xlu1 %4287 }
0x1791   : > { %v4382_v37 = vpop.eup %4381  ;;  %v4290_v47 = vunpack.i.h.bf16 %v4288_v9  ;;  %v4289_v52 = vunpack.i.l.bf16 %v4288_v9  ;;  %v4316_v9 = vld [vmem:[%s5256_s27 + $0x18] sm:$0xff]  }
0x1792   : > { %v2987_v21 = vmul.f32 %v4382_v37, %v4378_v49 }
0x1793   : > { %v4384_v25 = vpop.eup %4383  ;;  %v3112_v11 = vsel %vm1053_vm3, %v5563_v35, %v4290_v47  ;;  %v3111_v12 = vsel %vm1053_vm3, %v5561_v32, %v4289_v52  ;;  %v3789_v32 = vld [vmem:[%s803_s12] ss:$0 sm:$0xff] }
0x1794   : > { %v2988_v26 = vmul.f32 %v4384_v25, %v4380_v54  ;;  %v2989_v62 = vpack.c.bf16 %v2987_v21, %v2987_v21  ;;  %v3113_v23 = vsel %vm1956_vm5, %v3111_v12, %v4294_v15  ;;  %v3114_v24 = vsel %vm1956_vm5, %v3112_v11, %v4295_v14  ;;  %v3793_v47 = vld [vmem:[%s954_s17] ss:$0 sm:$0xff] }
0x1796   : > { %4116 = vmatmul.mubr.msk.bf16.vlgmr.msra.gmra.mrb[64].mxu0 %vm1053_vm3, %v2989_v62  ;;  %v2990_v0 = vpack.c.bf16 %v2988_v26, %v2988_v26  ;;  %v3215_v62 = vsub.s32 1, %v5479_v16 }
0x1797   : > { %4129 = vmatprep.mubr.msk.bf16.mxu0 %vm4747_vm1, %v4746_v3  ;;  %4126 = vmatpush3.bf16.msra.mxu0 %v4309_v1 }
0x1798   : > { %4122 = vmatmul.mubr.msk.bf16.vlgmr.msra.gmra.mrb[72].mxu1 %vm1053_vm3, %v2990_v0  ;;  %4127 = vmatprep.subr.bf16.mxu0 %v4746_v3  ;;  %v3216_v1 = vrot.slane %v5483_v19, %v3215_v62 }
0x1799   : > { %4137 = vmatprep.mubr.msk.bf16.mxu1 %vm4747_vm1, %v4746_v3  ;;  %4134 = vmatpush3.bf16.msra.mxu1 %v4311_v56  ;;  %v3410_v56 = vsub.s32 2, %v5479_v16 }
0x179a   : > { %4135 = vmatprep.subr.bf16.mxu1 %v4746_v3 }
0x179b   : > { %4128 = vmatpush3.bf16.msra.mxu0 %v4310_v2 }
0x179c   : > { %4141 = vmatprep.subr.bf16.mxu0 %v4746_v3 }
0x179d   : > { %4136 = vmatpush3.bf16.msra.mxu1 %v4312_v57  ;;  %v3411_v57 = vrot.slane %v5483_v19, %v3410_v56 }
0x1869   : > { %v3033_v5 = vpop.f32.mrb[64].mxu0 }
0x186a   : > { %v4117_v6 = vpop.f32.mrb[65].mxu0 }
0x186b   : > { %v3036_v13 = vpop.f32.mrb[66].mxu0  ;;  %v3081_v4 = vpop.f32.mrb[72].mxu1 }
0x186c   : > { %v4296_v46 = vpack.i.bf16 %v3081_v4, %v3033_v5  ;;  %v4118_v50 = vpop.f32.mrb[67].mxu0  ;;  %v4123_v51 = vpop.f32.mrb[73].mxu1  ;;  %v3222_v4 = vrot.slane %v5487_v22, %v3215_v62 }
0x186d   : > { %v3084_v7 = vpop.f32.mrb[74].mxu1 }
0x186e   : > { %4297 = vrot.lane.b32.xlu1 %v4296_v46, %s4761_s9  ;;  %v4124_v8 = vpop.f32.mrb[75].mxu1 }
0x186f   : > { %v4315_v8 = vld [vmem:[%s5256_s27 + $0x10] sm:$0xff]  }
0x18e0   : > { %v4298_v17 = vpop.permute.xlu1 %4297 }
0x18e1   : > { %v4300_v18 = vunpack.i.h.bf16 %v4298_v17  ;;  %v4299_v20 = vunpack.i.l.bf16 %v4298_v17 }
0x18e3   : > { %v3116_v27 = vsel %vm1959_vm6, %v3114_v24, %v4300_v18  ;;  %v3115_v28 = vsel %vm1959_vm6, %v3113_v23, %v4299_v20 }
0x18e4   : > { %v3117_v31 = vpack.c.bf16 %v3116_v27, %v3115_v28 }
0x18e6   : > { %4130 = vmatmul.mubr.msk.bf16.vlgmr.msra.gmra.mrb[68].mxu0 %vm1003_vm2, %v3117_v31 }
0x18e7   : > { %4149 = vmatprep.mubr.msk.bf16.mxu0 %vm4747_vm1, %v4746_v3  ;;  %4142 = vmatpush3.bf16.msra.mxu0 %v4313_v58 }
0x18e8   : > { %4143 = vmatprep.subr.bf16.mxu0 %v4746_v3 }
0x18eb   : > { %4144 = vmatpush3.bf16.msra.mxu0 %v4314_v60 }
0x18ec   : > { %4145 = vmatprep.subr.bf16.mxu0 %v4746_v3 }
0x18ef   : > { %4146 = vmatpush3.bf16.msra.mxu0 %v4315_v8 }
0x18f0   : > { %4147 = vmatprep.subr.bf16.mxu0 %v4746_v3  ;;  %v3797_v3 = vld [vmem:[%s962_s5] ss:$0 sm:$0xff] }
0x18f3   : > { %4148 = vmatpush3.bf16.msra.mxu0 %v4316_v9 }
0x19b9   : > { %v3178_v35 = vpop.f32.mrb[68].mxu0 }
0x19ba   : > { %v3179_v33 = vadd.f32 %v3789_v32, %v3178_v35  ;;  %v4131_v34 = vpop.f32.mrb[69].mxu0 }
0x19bb   : > { %v3181_v36 = vpop.f32.mrb[70].mxu0 }
0x19bc   : > { %v3182_v38 = vadd.f32 %v3789_v32, %v3181_v36  ;;  %v4132_v39 = vpop.f32.mrb[71].mxu0  ;;  %v3185_v41 = vadd.f32 %v3179_v33, %v5490_v29 }
0x19be   : > { %v3187_v42 = vsel %vm1003_vm2, %v3185_v41, 0.0  ;;  %v3186_v43 = vadd.f32 %v3182_v38, %v5492_v30 }
0x19bf   : > { %3188 = vadd.xlane.f32.xlu0 %v3187_v42 }
0x19c0   : > { %v3190_v44 = vsel %vm1003_vm2, %v3186_v43, 0.0 }
0x19c1   : > { %3191 = vadd.xlane.f32.xlu1 %v3190_v44 }
0x1a4c   : > { %v3189_v63 = vpop.xlane.xlu0 %3188 }
0x1a4d   : > { %v3193_v45 = vmul.f32 0.03125, %v3189_v63 }
0x1a4e   : > { %v3192_v59 = vpop.xlane.xlu1 %3191 }
0x1a4f   : > { %v3195_v48 = vsub.f32 %v3185_v41, %v3193_v45  ;;  %v3194_v49 = vmul.f32 0.03125, %v3192_v59 }
0x1a51   : > { %v3196_v53 = vsub.f32 %v3186_v43, %v3194_v49  ;;  %v3197_v54 = vmul.f32 %v3195_v48, %v3195_v48 }
0x1a53   : > { %v3199_v29 = vsel %vm1003_vm2, %v3197_v54, 0.0  ;;  %v3198_v55 = vmul.f32 %v3196_v53, %v3196_v53 }
0x1a54   : > { %3200 = vadd.xlane.f32.xlu0 %v3199_v29 }
0x1a55   : > { %v3202_v30 = vsel %vm1003_vm2, %v3198_v55, 0.0 }
0x1a58   : > { %3203 = vadd.xlane.f32.xlu0 %v3202_v30 }
0x1ae1   : > { %v3201_v61 = vpop.xlane.xlu0 %3200 }
0x1ae2   : > { %v3205_v40 = vmul.f32 0.03125, %v3201_v61  ;;  %v3417_v61 = vrot.slane %v5487_v22, %v3410_v56 }
0x1ae4   : > { %v3207_v37 = vadd.f32 1e-05, %v3205_v40 }
0x1ae5   : > { %v3204_v21 = vpop.xlane.xlu0 %3203 }
0x1ae6   : > { %4385 = vrsqrt.f32 %v3207_v37  ;;  %v3206_v25 = vmul.f32 0.03125, %v3204_v21 }
0x1ae8   : > { %v3208_v26 = vadd.f32 1e-05, %v3206_v25 }
0x1aea   : > { %4387 = vrsqrt.f32 %v3208_v26 }
0x1af0   : > { %v4386_v0 = vpop.eup %4385 }
0x1af1   : > { %v3211_v2 = vmul.f32 %v4386_v0, %v3195_v48 }
0x1af3   : > { %v3217_v6 = vmul.f32 %v3216_v1, %v3211_v2 }
0x1af4   : > { %v4388_v5 = vpop.eup %4387 }
0x1af5   : > { %v3212_v13 = vmul.f32 %v4388_v5, %v3196_v53  ;;  %v3223_v50 = vadd.f32 %v3222_v4, %v3217_v6 }
0x1af7   : > { %v3218_v46 = vmul.f32 %v3216_v1, %v3212_v13 }
0x1af9   : > { %v3224_v51 = vadd.f32 %v3222_v4, %v3218_v46 }
0x1afb   : > { %v3225_v7 = vpack.c.bf16 %v3224_v51, %v3223_v50 }
0x1afd   : > { %4138 = vmatmul.mubr.msk.bf16.vlgmr.msra.gmra.mrb[76].mxu1 %vm1003_vm2, %v3225_v7 }
0x1bd0   : > { %v3286_v52 = vpop.f32.mrb[76].mxu1 }
0x1bd1   : > { %v3287_v10 = vadd.f32 %v3793_v47, %v3286_v52  ;;  %v4139_v11 = vpop.f32.mrb[77].mxu1 }
0x1bd2   : > { %v3289_v12 = vpop.f32.mrb[78].mxu1 }
0x1bd3   : > { %v3290_v14 = vadd.f32 %v3793_v47, %v3289_v12  ;;  %v4140_v15 = vpop.f32.mrb[79].mxu1  ;;  %v3293_v17 = vmax.f32 %v3287_v10, 0.0 }
0x1bd5   : > { %v3294_v18 = vmax.f32 %v3290_v14, 0.0 }
0x1bd7   : > { %v3295_v20 = vpack.c.bf16 %v3294_v18, %v3293_v17 }
0x1bd9   : > { %4150 = vmatmul.mubr.msk.bf16.vlgmr.msra.gmra.mrb[72].mxu0 %vm3335_vm7, %v3295_v20 }
0x1cac   : > { %v3373_v23 = vpop.f32.mrb[72].mxu0 }
0x1cad   : > { %v3374_v24 = vadd.f32 %v3797_v3, %v3373_v23  ;;  %v4151_v27 = vpop.f32.mrb[73].mxu0 }
0x1cae   : > { %v3376_v28 = vpop.f32.mrb[74].mxu0 }
0x1caf   : > { %v3377_v31 = vadd.f32 %v3797_v3, %v3376_v28  ;;  %v4152_v32 = vpop.f32.mrb[75].mxu0  ;;  %v3380_v35 = vadd.f32 %v3374_v24, %v3223_v50 }
0x1cb1   : > { %v3382_v33 = vsel %vm1003_vm2, %v3380_v35, 0.0  ;;  %v3381_v34 = vadd.f32 %v3377_v31, %v3224_v51 }
0x1cb2   : > { %3383 = vadd.xlane.f32.xlu1 %v3382_v33 }
0x1cb3   : > { %v3385_v36 = vsel %vm1003_vm2, %v3381_v34, 0.0 }
0x1cb4   : > { %3386 = vadd.xlane.f32.xlu0 %v3385_v36 }
0x1d3f   : > { %v3384_v38 = vpop.xlane.xlu1 %3383 }
0x1d40   : > { %v3388_v39 = vmul.f32 0.03125, %v3384_v38 }
0x1d41   : > { %v3387_v41 = vpop.xlane.xlu0 %3386 }
0x1d42   : > { %v3390_v42 = vsub.f32 %v3380_v35, %v3388_v39  ;;  %v3389_v43 = vmul.f32 0.03125, %v3387_v41 }
0x1d44   : > { %v3391_v44 = vsub.f32 %v3381_v34, %v3389_v43  ;;  %v3392_v63 = vmul.f32 %v3390_v42, %v3390_v42 }
0x1d46   : > { %v3394_v45 = vsel %vm1003_vm2, %v3392_v63, 0.0  ;;  %v3393_v59 = vmul.f32 %v3391_v44, %v3391_v44 }
0x1d47   : > { %3395 = vadd.xlane.f32.xlu1 %v3394_v45 }
0x1d48   : > { %v3397_v48 = vsel %vm1003_vm2, %v3393_v59, 0.0 }
0x1d49   : > { %3398 = vadd.xlane.f32.xlu0 %v3397_v48 }
0x1dd4   : > { %v3396_v49 = vpop.xlane.xlu1 %3395 }
0x1dd5   : > { %v3400_v53 = vmul.f32 0.03125, %v3396_v49 }
0x1dd6   : > { %v3399_v54 = vpop.xlane.xlu0 %3398 }
0x1dd7   : > { %v3402_v29 = vadd.f32 1e-05, %v3400_v53  ;;  %v3401_v55 = vmul.f32 0.03125, %v3399_v54 }
0x1dd9   : > { %4389 = vrsqrt.f32 %v3402_v29  ;;  %v3403_v30 = vadd.f32 1e-05, %v3401_v55 }
0x1ddb   : > { %4391 = vrsqrt.f32 %v3403_v30 }
0x1de3   : > { %v4390_v58 = vpop.eup %4389 }
0x1de4   : > { %v3406_v60 = vmul.f32 %v4390_v58, %v3390_v42 }
0x1de5   : > { %v4392_v40 = vpop.eup %4391 }
0x1de6   : > { %v3412_v37 = vmul.f32 %v3411_v57, %v3406_v60  ;;  %v3407_v21 = vmul.f32 %v4392_v40, %v3391_v44 }
0x1de8   : > { %v3413_v25 = vmul.f32 %v3411_v57, %v3407_v21  ;;  %v3418_v26 = vadd.f32 %v3417_v61, %v3412_v37 }
0x1dea   : > { %v3419_v62 = vadd.f32 %v3417_v61, %v3413_v25  ;;  %3420 = vst.msk [vmem:[#allocation14] sm:$0xff] %vm1003_vm2, %v3418_v26 }
0x1dec   : > { %3421 = vst.msk [vmem:[#allocation14 + $0x8] sm:$0xff] %vm1003_vm2, %v3419_v62 }
0x1ded   : > { %4672 = shalt.err (!%p4669_p13)
}
0x1dee   : > { %s5876_s5 = sld [smem:[#allocation40_spill]] }
0x1df4   : > { %s4673_s23 = scalar_lea.hbm %s5876_s5, 256 }
0x1df5   : > { %p4674_p8 = scmp.ne.s32.totalorder %s5876_s5, %s4673_s23  ;;  %p4679_p2 = scmp.lt.u32.totalorder %s4673_s23, %s5876_s5 }
0x1df7   : > { %p4675_p5 = pnand %p4674_p8, %p4213_p0 }
0x1df9   : > { %p4676_p12 = pneg %p4675_p5 }
0x1dfb   : > { %p4681_p3 = pnand %p4679_p2, %p4676_p12 }
0x1dfd   : > { %4684 = shalt.err (!%p4681_p3)
}
0x1dfe   : > { %s4763_s10 = smov 128  }
0x1dff   : > { %4176 = dma.vmem_to_hbm [thread:$0]  (%p4213_p0), %s3429_s2, 256, %s5876_s5, [#allocation4], %s4763_s10, %s4763_s10, %s4759_s25  }
0x1e00   : > { %4714 = dma.done.wait (%p4213_p0), [#allocation4], 256  }
0x1e01   : > { %4716 = vsyncadd (%p4213_p0), [#allocation4], 4294967040 }
0x1e02 PF: > { %s5877_s30 = sld [smem:[#allocation20_spill]]  ;;  %s5878_s18 = sld [smem:[#allocation19_spill]] }
0x1e03   : > { %s5879_s29 = sld [smem:[#allocation21_spill]]  ;;  %s5880_s27 = smov %s4723_s28 }
0x1e08   : > { %p28_p4 = scmp.ge.s32.totalorder %s5877_s30, 4   ;;  %s5881_s28 = smov %s5878_s18 }
0x1e0a   :  { %30 = sbr.rel (!%p28_p4) target bundleno = 24 (0x18), region = 233 }
0x1e11   :  { %3444 = vsyncpa [#allocation3], 1 }
0x1e12   :  { %3446 = vsyncpa [#allocation3 + $0x1], 1 }
0x1e13   :  { %3447 = vsyncpa [#allocation6], 1 }
0x1e14   :  { %3448 = vsyncpa [#allocation4], 1 }
0x1e15   :  { %3450 = vsyncpa [#allocation4 + $0x1], 1 }

</bundles_post_ra>
